<compile_context>
chip_gen: v5e
topology: v5e:2x2
jax: 0.10.0
libtpu: 0.0.40
codegen_flags: <defaults>
</compile_context>

<pallas_src>
import math

import jax
import jax.numpy as jnp
from jax import lax
from jax.experimental import pallas as pl
from jax.experimental.pallas import tpu as pltpu


def cpsa_block(x, params, H, W, num_heads):
    """CPSABlock forward.  x: (B, N, C) float32 with N = H*W."""
    B, N, C = x.shape
    assert N == H * W and C % num_heads == 0
    assert H % 2 == 0 and W % 2 == 0, "kernel assumes even spatial dims"
    hd = C // num_heads
    H_D, W_D = H // 2, W // 2
    ND = H_D * W_D
    scale = 1.0 / math.sqrt(hd)  # F.scaled_dot_product_attention default scale

    # ---- weight prep (tiny host/XLA-side layout plumbing) ----
    # SDPA scale folded into the Q weight; all MXU weight operands pre-cast to bf16.
    wqT = (params["wq"].T * scale).astype(jnp.bfloat16)                       # (C, C)
    wsT = params["ws"].T.astype(jnp.bfloat16)                                 # (C, C)
    wpT = params["wp"].T.astype(jnp.bfloat16)                                 # (C, C)
    # depthwise conv weight (C,1,3,3) -> per-tap (9,1,C) table, tap index k = kh*3 + kw
    wc_taps = jnp.transpose(params["wc"].reshape(C, 9), (1, 0)).reshape(9, 1, C)
    bc = params["bc"].reshape(1, C)
    bp = params["bp"].reshape(1, C)
    gamma = params["gamma"].reshape(1, C)
    beta = params["beta"].reshape(1, C)

    def kernel(x_ref, wqT_ref, wsT_ref, wc_ref, bc_ref, wpT_ref, bp_ref, g_ref, b_ref,
               out_ref, s_buf, sc_ev, sc_od, o_buf):
        f32 = jnp.float32
        bf16 = jnp.bfloat16
        x_bf = x_ref[...].astype(bf16)                                        # (N, C)

        # ---- Q and S projections: two bf16 MXU matmuls, f32 accumulation ----
        q = jnp.dot(x_bf, wqT_ref[...], preferred_element_type=f32)           # (N, C), pre-scaled
        s = jnp.dot(x_bf, wsT_ref[...], preferred_element_type=f32)           # (N, C)

        # ---- stage s in natural image layout, then split column parity ONCE ----
        # (N,C)->(H,W,C) is a layout-preserving relabel when W % 8 == 0.
        s_buf[...] = s.reshape(H, W, C)
        # zero only the conv's zero-padding border (cheap; done every grid step)
        sc_ev[pl.ds(0, 1), :, :] = jnp.zeros((1, W_D, C), f32)
        sc_od[pl.ds(0, 1), :, :] = jnp.zeros((1, W_D + 1, C), f32)
        sc_od[:, pl.ds(0, 1), :] = jnp.zeros((H + 2, 1, C), f32)
        # sc_ev[1+r, j]   = s[r, 2j]     (even image columns)
        # sc_od[1+r, 1+j] = s[r, 2j+1]   (odd image columns; row 0 / col 0 stay zero = padding)
        sc_ev[pl.ds(1, H), :, :] = s_buf[:, pl.ds(0, W_D, stride=2), :]
        sc_od[pl.ds(1, H), pl.ds(1, W_D), :] = s_buf[:, pl.ds(1, W_D, stride=2), :]

        # ---- stride-2 3x3 depthwise conv as a 9-tap MAC at full channel width ----
        # Output (i,j), tap (kh,kw) needs input row 2i+kh-1 = scratch row 2i+kh.  The rows
        # {kh, kh+2, ...} come from one contiguous H-row load + a free outer (H_D, 2) reshape,
        # so no strided tap reads remain.
        def even_offset_rows(ref, kh):
            cols = ref.shape[1]
            v = ref[pl.ds(kh, H), :, :]                                       # contiguous load
            return v.reshape(H_D, 2, cols, C)[:, 0]                           # rows kh, kh+2, ...

        wc_all = wc_ref[...]                                                  # (9, 1, C)
        acc = jnp.zeros((H_D, W_D, C), f32) + bc_ref[...]                     # conv bias
        for kh in range(3):
            ev = even_offset_rows(sc_ev, kh)                                  # (H_D, W_D,   C)
            od = even_offset_rows(sc_od, kh)                                  # (H_D, W_D+1, C)
            acc = acc + od[:, 0:W_D, :] * wc_all[3 * kh + 0]                  # kw = 0
            acc = acc + ev * wc_all[3 * kh + 1]                               # kw = 1
            acc = acc + od[:, 1:W_D + 1, :] * wc_all[3 * kh + 2]              # kw = 2
        kv = acc.reshape(ND, C).astype(bf16)                                  # (ND, C)

        # ---- per-head SDPA; each head's output lands in o_buf at its lane offset ----
        for h in range(num_heads):
            qh = q[:, h * hd:(h + 1) * hd].astype(bf16)                       # (N, hd), pre-scaled
            kvh = kv[:, h * hd:(h + 1) * hd]                                  # (ND, hd)
            logits = lax.dot_general(qh, kvh, (((1,), (1,)), ((), ())),
                                     preferred_element_type=f32)              # (N, ND)
            logits = logits - jnp.max(logits, axis=-1, keepdims=True)
            p = jnp.exp(logits)
            p = p * pl.reciprocal(jnp.sum(p, axis=-1, keepdims=True), approx=True)
            o_buf[:, pl.ds(h * hd, hd)] = jnp.dot(p.astype(bf16), kvh,
                                                  preferred_element_type=f32)

        # ---- single full-C output projection + bias ----
        y = jnp.dot(o_buf[...].astype(bf16), wpT_ref[...],
                    preferred_element_type=f32) + bp_ref[...]                 # (N, C)

        # ---- residual around LayerNorm of the projected output: out = y + LN(y) ----
        mean = jnp.mean(y, axis=-1, keepdims=True)
        var = jnp.mean((y - mean) ** 2, axis=-1, keepdims=True)
        ln = (y - mean) * lax.rsqrt(var + 1e-5) * g_ref[...] + b_ref[...]
        out_ref[...] = (y + ln).astype(out_ref.dtype)

    # ---- VMEM budget sized from the real working set ----
    f32b = 4
    blocks = 2 * 2 * N * C * f32b                                   # x + out, double-buffered
    scratch = (H * W + (H + 2) * (2 * W_D + 1) + N) * C * f32b      # s_buf, sc_ev, sc_od, o_buf
    weights = 3 * C * C * 2 + (9 + 4) * C * f32b
    live = N * (2 * C + 2 * ND + 2 * C) * f32b                      # q, s, logits, p, o, y
    vmem_limit = min(max(2 * (blocks + scratch + weights + live), 32 << 20), 64 << 20)

    return pl.pallas_call(
        kernel,
        out_shape=jax.ShapeDtypeStruct((B, N, C), jnp.float32),
        grid=(B,),
        in_specs=[
            pl.BlockSpec((None, N, C), lambda b: (b, 0, 0)),        # x
            pl.BlockSpec((C, C), lambda b: (0, 0)),                 # scale * wq.T   (bf16)
            pl.BlockSpec((C, C), lambda b: (0, 0)),                 # ws.T           (bf16)
            pl.BlockSpec((9, 1, C), lambda b: (0, 0, 0)),           # conv tap weights
            pl.BlockSpec((1, C), lambda b: (0, 0)),                 # conv bias
            pl.BlockSpec((C, C), lambda b: (0, 0)),                 # wp.T           (bf16)
            pl.BlockSpec((1, C), lambda b: (0, 0)),                 # proj bias
            pl.BlockSpec((1, C), lambda b: (0, 0)),                 # LN gamma
            pl.BlockSpec((1, C), lambda b: (0, 0)),                 # LN beta
        ],
        out_specs=pl.BlockSpec((None, N, C), lambda b: (b, 0, 0)),
        scratch_shapes=[
            pltpu.VMEM((H, W, C), jnp.float32),                     # s staging (natural layout)
            pltpu.VMEM((H + 2, W_D, C), jnp.float32),               # even-column padded scratch
            pltpu.VMEM((H + 2, W_D + 1, C), jnp.float32),           # odd-column padded scratch
            pltpu.VMEM((N, C), jnp.float32),                        # per-head attention outputs
        ],
        compiler_params=pltpu.CompilerParams(
            dimension_semantics=("parallel",),
            vmem_limit_bytes=vmem_limit),
    )(x, wqT, wsT, wc_taps, bc, wpT, bp, gamma, beta)


# ------------------------------ pure-JAX reference ------------------------------
def cpsa_reference(x, params, H, W, num_heads):
    B, N, C = x.shape
    hd = C // num_heads
    q = x @ params["wq"].T
    s = x @ params["ws"].T
    s_img = s.reshape(B, H, W, C).transpose(0, 3, 1, 2)              # NCHW
    s_conv = lax.conv_general_dilated(
        s_img, params["wc"], window_strides=(2, 2), padding=((1, 1), (1, 1)),
        feature_group_count=C, dimension_numbers=("NCHW", "OIHW", "NCHW"))
    s_conv = s_conv + params["bc"][None, :, None, None]
    H_D, W_D = s_conv.shape[2], s_conv.shape[3]
    kv = s_conv.reshape(B, C, H_D * W_D).transpose(0, 2, 1)
    qh = q.reshape(B, N, num_heads, hd).transpose(0, 2, 1, 3)
    kh = kv.reshape(B, H_D * W_D, num_heads, hd).transpose(0, 2, 1, 3)
    logits = jnp.einsum("bhnd,bhmd->bhnm", qh, kh) / math.sqrt(hd)
    attn = jax.nn.softmax(logits, axis=-1)
    o = jnp.einsum("bhnm,bhmd->bhnd", attn, kh)
    o = o.transpose(0, 2, 1, 3).reshape(B, N, C)
    y = o @ params["wp"].T + params["bp"]
    mean = y.mean(-1, keepdims=True)
    var = ((y - mean) ** 2).mean(-1, keepdims=True)
    ln = (y - mean) / jnp.sqrt(var + 1e-5) * params["gamma"] + params["beta"]
    return y + ln


if __name__ == "__main__":
    B, H, W, C, num_heads = 2, 16, 16, 32, 2
    N = H * W
    key = jax.random.PRNGKey(0)
    ks = jax.random.split(key, 7)
    params = {
        "wq": 0.05 * jax.random.normal(ks[0], (C, C), jnp.float32),
        "ws": 0.05 * jax.random.normal(ks[1], (C, C), jnp.float32),
        "wc": 0.20 * jax.random.normal(ks[2], (C, 1, 3, 3), jnp.float32),
        "bc": 0.05 * jax.random.normal(ks[3], (C,), jnp.float32),
        "wp": 0.05 * jax.random.normal(ks[4], (C, C), jnp.float32),
        "bp": 0.05 * jax.random.normal(ks[5], (C,), jnp.float32),
        "gamma": jnp.ones((C,), jnp.float32),   # nn.LayerNorm default init
        "beta": jnp.zeros((C,), jnp.float32),
    }
    x = jax.random.normal(ks[6], (B, N, C), jnp.float32)

    run = jax.jit(cpsa_block, static_argnums=(2, 3, 4))
    out = jax.block_until_ready(run(x, params, H, W, num_heads))
    ref = jax.block_until_ready(cpsa_reference(x, params, H, W, num_heads))

    assert out.shape == (B, N, C)
    err = float(jnp.max(jnp.abs(out - ref)))
    assert err < 5e-2, f"max abs err too large: {err}"
    print("KERNEL_OK")
</pallas_src>

<mosaic_0001>
module attributes {stable_mosaic.version = 11 : i64} {
  func.func @kernel(%arg0: i32, %arg1: memref<1x256x32xf32, #tpu.memory_space<vmem>>, %arg2: memref<32x32xbf16, #tpu.memory_space<vmem>>, %arg3: memref<32x32xbf16, #tpu.memory_space<vmem>>, %arg4: memref<9x1x32xf32, #tpu.memory_space<vmem>>, %arg5: memref<1x32xf32, #tpu.memory_space<vmem>>, %arg6: memref<32x32xbf16, #tpu.memory_space<vmem>>, %arg7: memref<1x32xf32, #tpu.memory_space<vmem>>, %arg8: memref<1x32xf32, #tpu.memory_space<vmem>>, %arg9: memref<1x32xf32, #tpu.memory_space<vmem>>, %arg10: memref<1x256x32xf32, #tpu.memory_space<vmem>>, %arg11: memref<16x16x32xf32, #tpu.memory_space<vmem>>, %arg12: memref<18x8x32xf32, #tpu.memory_space<vmem>>, %arg13: memref<18x9x32xf32, #tpu.memory_space<vmem>>, %arg14: memref<256x32xf32, #tpu.memory_space<vmem>>) attributes {dimension_semantics = [#tpu.dimension_semantics<parallel>], iteration_bounds = array<i64: 2>, scalar_prefetch = 0 : i64, scratch_operands = 4 : i64, tpu.core_type = #tpu.core_type<tc>, window_params = [{transform_indices = @transform_0, window_bounds = array<i64: 1, 256, 32>}, {pipeline_mode = #tpu.pipeline_mode<synchronous>, transform_indices = @transform_1, window_bounds = array<i64: 32, 32>}, {pipeline_mode = #tpu.pipeline_mode<synchronous>, transform_indices = @transform_2, window_bounds = array<i64: 32, 32>}, {pipeline_mode = #tpu.pipeline_mode<synchronous>, transform_indices = @transform_3, window_bounds = array<i64: 9, 1, 32>}, {pipeline_mode = #tpu.pipeline_mode<synchronous>, transform_indices = @transform_4, window_bounds = array<i64: 1, 32>}, {pipeline_mode = #tpu.pipeline_mode<synchronous>, transform_indices = @transform_5, window_bounds = array<i64: 32, 32>}, {pipeline_mode = #tpu.pipeline_mode<synchronous>, transform_indices = @transform_6, window_bounds = array<i64: 1, 32>}, {pipeline_mode = #tpu.pipeline_mode<synchronous>, transform_indices = @transform_7, window_bounds = array<i64: 1, 32>}, {pipeline_mode = #tpu.pipeline_mode<synchronous>, transform_indices = @transform_8, window_bounds = array<i64: 1, 32>}, {transform_indices = @transform_9, window_bounds = array<i64: 1, 256, 32>}]} {
    %c0 = arith.constant 0 : index
    %c0_0 = arith.constant 0 : index
    %c0_1 = arith.constant 0 : index
    %0 = vector.load %arg1[%c0, %c0_0, %c0_1] : memref<1x256x32xf32, #tpu.memory_space<vmem>>, vector<1x256x32xf32>
    %1 = vector.shape_cast %0 : vector<1x256x32xf32> to vector<256x32xf32>
    %2 = arith.truncf %1 : vector<256x32xf32> to vector<256x32xbf16>
    %c0_2 = arith.constant 0 : index
    %c0_3 = arith.constant 0 : index
    %3 = vector.load %arg2[%c0_2, %c0_3] : memref<32x32xbf16, #tpu.memory_space<vmem>>, vector<32x32xbf16>
    %cst = arith.constant dense<0.000000e+00> : vector<256x32xf32>
    %4 = tpu.matmul %2, %3, %cst {dimension_numbers = #tpu.dot_dimension_numbers<[1], [0], [0], [1], [0, 0, 1, 1], [], []>} : vector<256x32xbf16>, vector<32x32xbf16>, vector<256x32xf32> -> vector<256x32xf32>
    %c0_4 = arith.constant 0 : index
    %c0_5 = arith.constant 0 : index
    %5 = vector.load %arg3[%c0_4, %c0_5] : memref<32x32xbf16, #tpu.memory_space<vmem>>, vector<32x32xbf16>
    %cst_6 = arith.constant dense<0.000000e+00> : vector<256x32xf32>
    %6 = tpu.matmul %2, %5, %cst_6 {dimension_numbers = #tpu.dot_dimension_numbers<[1], [0], [0], [1], [0, 0, 1, 1], [], []>} : vector<256x32xbf16>, vector<32x32xbf16>, vector<256x32xf32> -> vector<256x32xf32>
    %7 = vector.shape_cast %6 : vector<256x32xf32> to vector<16x16x32xf32>
    %c0_7 = arith.constant 0 : index
    %c0_8 = arith.constant 0 : index
    %c0_9 = arith.constant 0 : index
    %8 = vector.load %arg11[%c0_7, %c0_8, %c0_9] : memref<16x16x32xf32, #tpu.memory_space<vmem>>, vector<16x16x32xf32>
    tpu.vector_store %arg11[%c0_7, %c0_8, %c0_9], %7 {strides = array<i32>} : memref<16x16x32xf32, #tpu.memory_space<vmem>>, vector<16x16x32xf32>,
    %cst_10 = arith.constant 0.000000e+00 : f32
    %9 = vector.broadcast %cst_10 : f32 to vector<1x8x32xf32>
    %c0_11 = arith.constant 0 : index
    %c0_12 = arith.constant 0 : index
    %c0_13 = arith.constant 0 : index
    %10 = vector.load %arg12[%c0_11, %c0_12, %c0_13] : memref<18x8x32xf32, #tpu.memory_space<vmem>>, vector<1x8x32xf32>
    tpu.vector_store %arg12[%c0_11, %c0_12, %c0_13], %9 {strides = array<i32>} : memref<18x8x32xf32, #tpu.memory_space<vmem>>, vector<1x8x32xf32>,
    %cst_14 = arith.constant 0.000000e+00 : f32
    %11 = vector.broadcast %cst_14 : f32 to vector<1x9x32xf32>
    %c0_15 = arith.constant 0 : index
    %c0_16 = arith.constant 0 : index
    %c0_17 = arith.constant 0 : index
    %12 = vector.load %arg13[%c0_15, %c0_16, %c0_17] : memref<18x9x32xf32, #tpu.memory_space<vmem>>, vector<1x9x32xf32>
    tpu.vector_store %arg13[%c0_15, %c0_16, %c0_17], %11 {strides = array<i32>} : memref<18x9x32xf32, #tpu.memory_space<vmem>>, vector<1x9x32xf32>,
    %cst_18 = arith.constant 0.000000e+00 : f32
    %13 = vector.broadcast %cst_18 : f32 to vector<18x1x32xf32>
    %c0_19 = arith.constant 0 : index
    %c0_20 = arith.constant 0 : index
    %c0_21 = arith.constant 0 : index
    %14 = vector.load %arg13[%c0_19, %c0_20, %c0_21] : memref<18x9x32xf32, #tpu.memory_space<vmem>>, vector<18x1x32xf32>
    tpu.vector_store %arg13[%c0_19, %c0_20, %c0_21], %13 {strides = array<i32>} : memref<18x9x32xf32, #tpu.memory_space<vmem>>, vector<18x1x32xf32>,
    %c0_22 = arith.constant 0 : index
    %c0_23 = arith.constant 0 : index
    %c0_24 = arith.constant 0 : index
    %15 = tpu.strided_load %arg11[%c0_22, %c0_23, %c0_24] {strides = array<i32: 1, 2, 1>} : memref<16x16x32xf32, #tpu.memory_space<vmem>>, vector<16x8x32xf32>
    %c1 = arith.constant 1 : index
    %c0_25 = arith.constant 0 : index
    %c0_26 = arith.constant 0 : index
    %16 = vector.load %arg12[%c1, %c0_25, %c0_26] : memref<18x8x32xf32, #tpu.memory_space<vmem>>, vector<16x8x32xf32>
    tpu.vector_store %arg12[%c1, %c0_25, %c0_26], %15 {strides = array<i32>} : memref<18x8x32xf32, #tpu.memory_space<vmem>>, vector<16x8x32xf32>,
    %c0_27 = arith.constant 0 : index
    %c1_28 = arith.constant 1 : index
    %c0_29 = arith.constant 0 : index
    %17 = tpu.strided_load %arg11[%c0_27, %c1_28, %c0_29] {strides = array<i32: 1, 2, 1>} : memref<16x16x32xf32, #tpu.memory_space<vmem>>, vector<16x8x32xf32>
    %c1_30 = arith.constant 1 : index
    %c1_31 = arith.constant 1 : index
    %c0_32 = arith.constant 0 : index
    %18 = vector.load %arg13[%c1_30, %c1_31, %c0_32] : memref<18x9x32xf32, #tpu.memory_space<vmem>>, vector<16x8x32xf32>
    tpu.vector_store %arg13[%c1_30, %c1_31, %c0_32], %17 {strides = array<i32>} : memref<18x9x32xf32, #tpu.memory_space<vmem>>, vector<16x8x32xf32>,
    %c0_33 = arith.constant 0 : index
    %c0_34 = arith.constant 0 : index
    %c0_35 = arith.constant 0 : index
    %19 = vector.load %arg4[%c0_33, %c0_34, %c0_35] : memref<9x1x32xf32, #tpu.memory_space<vmem>>, vector<9x1x32xf32>
    %cst_36 = arith.constant 0.000000e+00 : f32
    %20 = vector.broadcast %cst_36 : f32 to vector<8x8x32xf32>
    %c0_37 = arith.constant 0 : index
    %c0_38 = arith.constant 0 : index
    %21 = vector.load %arg5[%c0_37, %c0_38] : memref<1x32xf32, #tpu.memory_space<vmem>>, vector<1x32xf32>
    %22 = vector.shape_cast %21 : vector<1x32xf32> to vector<1x1x32xf32>
    %23 = vector.broadcast %22 : vector<1x1x32xf32> to vector<8x8x32xf32>
    %24 = arith.addf %20, %23 : vector<8x8x32xf32>
    %c0_39 = arith.constant 0 : index
    %c0_40 = arith.constant 0 : index
    %c0_41 = arith.constant 0 : index
    %25 = vector.load %arg12[%c0_39, %c0_40, %c0_41] : memref<18x8x32xf32, #tpu.memory_space<vmem>>, vector<16x8x32xf32>
    %26 = vector.shape_cast %25 : vector<16x8x32xf32> to vector<8x2x8x32xf32>
    %27 = vector.extract_strided_slice %26 {offsets = [0, 0, 0, 0], sizes = [8, 1, 8, 32], strides = [1, 1, 1, 1]} : vector<8x2x8x32xf32> to vector<8x1x8x32xf32>
    %28 = vector.shape_cast %27 : vector<8x1x8x32xf32> to vector<8x8x32xf32>
    %c0_42 = arith.constant 0 : index
    %c0_43 = arith.constant 0 : index
    %c0_44 = arith.constant 0 : index
    %29 = vector.load %arg13[%c0_42, %c0_43, %c0_44] : memref<18x9x32xf32, #tpu.memory_space<vmem>>, vector<16x9x32xf32>
    %30 = vector.shape_cast %29 : vector<16x9x32xf32> to vector<8x2x9x32xf32>
    %31 = vector.extract_strided_slice %30 {offsets = [0, 0, 0, 0], sizes = [8, 1, 9, 32], strides = [1, 1, 1, 1]} : vector<8x2x9x32xf32> to vector<8x1x9x32xf32>
    %32 = vector.shape_cast %31 : vector<8x1x9x32xf32> to vector<8x9x32xf32>
    %33 = vector.extract_strided_slice %32 {offsets = [0, 0, 0], sizes = [8, 8, 32], strides = [1, 1, 1]} : vector<8x9x32xf32> to vector<8x8x32xf32>
    %34 = vector.extract_strided_slice %19 {offsets = [0, 0, 0], sizes = [1, 1, 32], strides = [1, 1, 1]} : vector<9x1x32xf32> to vector<1x1x32xf32>
    %35 = vector.shape_cast %34 : vector<1x1x32xf32> to vector<1x32xf32>
    %36 = vector.shape_cast %35 : vector<1x32xf32> to vector<1x1x32xf32>
    %37 = vector.broadcast %36 : vector<1x1x32xf32> to vector<8x8x32xf32>
    %38 = arith.mulf %33, %37 : vector<8x8x32xf32>
    %39 = arith.addf %24, %38 : vector<8x8x32xf32>
    %40 = vector.extract_strided_slice %19 {offsets = [1, 0, 0], sizes = [1, 1, 32], strides = [1, 1, 1]} : vector<9x1x32xf32> to vector<1x1x32xf32>
    %41 = vector.shape_cast %40 : vector<1x1x32xf32> to vector<1x32xf32>
    %42 = vector.shape_cast %41 : vector<1x32xf32> to vector<1x1x32xf32>
    %43 = vector.broadcast %42 : vector<1x1x32xf32> to vector<8x8x32xf32>
    %44 = arith.mulf %28, %43 : vector<8x8x32xf32>
    %45 = arith.addf %39, %44 : vector<8x8x32xf32>
    %46 = vector.extract_strided_slice %32 {offsets = [0, 1, 0], sizes = [8, 8, 32], strides = [1, 1, 1]} : vector<8x9x32xf32> to vector<8x8x32xf32>
    %47 = vector.extract_strided_slice %19 {offsets = [2, 0, 0], sizes = [1, 1, 32], strides = [1, 1, 1]} : vector<9x1x32xf32> to vector<1x1x32xf32>
    %48 = vector.shape_cast %47 : vector<1x1x32xf32> to vector<1x32xf32>
    %49 = vector.shape_cast %48 : vector<1x32xf32> to vector<1x1x32xf32>
    %50 = vector.broadcast %49 : vector<1x1x32xf32> to vector<8x8x32xf32>
    %51 = arith.mulf %46, %50 : vector<8x8x32xf32>
    %52 = arith.addf %45, %51 : vector<8x8x32xf32>
    %c1_45 = arith.constant 1 : index
    %c0_46 = arith.constant 0 : index
    %c0_47 = arith.constant 0 : index
    %53 = vector.load %arg12[%c1_45, %c0_46, %c0_47] : memref<18x8x32xf32, #tpu.memory_space<vmem>>, vector<16x8x32xf32>
    %54 = vector.shape_cast %53 : vector<16x8x32xf32> to vector<8x2x8x32xf32>
    %55 = vector.extract_strided_slice %54 {offsets = [0, 0, 0, 0], sizes = [8, 1, 8, 32], strides = [1, 1, 1, 1]} : vector<8x2x8x32xf32> to vector<8x1x8x32xf32>
    %56 = vector.shape_cast %55 : vector<8x1x8x32xf32> to vector<8x8x32xf32>
    %c1_48 = arith.constant 1 : index
    %c0_49 = arith.constant 0 : index
    %c0_50 = arith.constant 0 : index
    %57 = vector.load %arg13[%c1_48, %c0_49, %c0_50] : memref<18x9x32xf32, #tpu.memory_space<vmem>>, vector<16x9x32xf32>
    %58 = vector.shape_cast %57 : vector<16x9x32xf32> to vector<8x2x9x32xf32>
    %59 = vector.extract_strided_slice %58 {offsets = [0, 0, 0, 0], sizes = [8, 1, 9, 32], strides = [1, 1, 1, 1]} : vector<8x2x9x32xf32> to vector<8x1x9x32xf32>
    %60 = vector.shape_cast %59 : vector<8x1x9x32xf32> to vector<8x9x32xf32>
    %61 = vector.extract_strided_slice %60 {offsets = [0, 0, 0], sizes = [8, 8, 32], strides = [1, 1, 1]} : vector<8x9x32xf32> to vector<8x8x32xf32>
    %62 = vector.extract_strided_slice %19 {offsets = [3, 0, 0], sizes = [1, 1, 32], strides = [1, 1, 1]} : vector<9x1x32xf32> to vector<1x1x32xf32>
    %63 = vector.shape_cast %62 : vector<1x1x32xf32> to vector<1x32xf32>
    %64 = vector.shape_cast %63 : vector<1x32xf32> to vector<1x1x32xf32>
    %65 = vector.broadcast %64 : vector<1x1x32xf32> to vector<8x8x32xf32>
    %66 = arith.mulf %61, %65 : vector<8x8x32xf32>
    %67 = arith.addf %52, %66 : vector<8x8x32xf32>
    %68 = vector.extract_strided_slice %19 {offsets = [4, 0, 0], sizes = [1, 1, 32], strides = [1, 1, 1]} : vector<9x1x32xf32> to vector<1x1x32xf32>
    %69 = vector.shape_cast %68 : vector<1x1x32xf32> to vector<1x32xf32>
    %70 = vector.shape_cast %69 : vector<1x32xf32> to vector<1x1x32xf32>
    %71 = vector.broadcast %70 : vector<1x1x32xf32> to vector<8x8x32xf32>
    %72 = arith.mulf %56, %71 : vector<8x8x32xf32>
    %73 = arith.addf %67, %72 : vector<8x8x32xf32>
    %74 = vector.extract_strided_slice %60 {offsets = [0, 1, 0], sizes = [8, 8, 32], strides = [1, 1, 1]} : vector<8x9x32xf32> to vector<8x8x32xf32>
    %75 = vector.extract_strided_slice %19 {offsets = [5, 0, 0], sizes = [1, 1, 32], strides = [1, 1, 1]} : vector<9x1x32xf32> to vector<1x1x32xf32>
    %76 = vector.shape_cast %75 : vector<1x1x32xf32> to vector<1x32xf32>
    %77 = vector.shape_cast %76 : vector<1x32xf32> to vector<1x1x32xf32>
    %78 = vector.broadcast %77 : vector<1x1x32xf32> to vector<8x8x32xf32>
    %79 = arith.mulf %74, %78 : vector<8x8x32xf32>
    %80 = arith.addf %73, %79 : vector<8x8x32xf32>
    %c2 = arith.constant 2 : index
    %c0_51 = arith.constant 0 : index
    %c0_52 = arith.constant 0 : index
    %81 = vector.load %arg12[%c2, %c0_51, %c0_52] : memref<18x8x32xf32, #tpu.memory_space<vmem>>, vector<16x8x32xf32>
    %82 = vector.shape_cast %81 : vector<16x8x32xf32> to vector<8x2x8x32xf32>
    %83 = vector.extract_strided_slice %82 {offsets = [0, 0, 0, 0], sizes = [8, 1, 8, 32], strides = [1, 1, 1, 1]} : vector<8x2x8x32xf32> to vector<8x1x8x32xf32>
    %84 = vector.shape_cast %83 : vector<8x1x8x32xf32> to vector<8x8x32xf32>
    %c2_53 = arith.constant 2 : index
    %c0_54 = arith.constant 0 : index
    %c0_55 = arith.constant 0 : index
    %85 = vector.load %arg13[%c2_53, %c0_54, %c0_55] : memref<18x9x32xf32, #tpu.memory_space<vmem>>, vector<16x9x32xf32>
    %86 = vector.shape_cast %85 : vector<16x9x32xf32> to vector<8x2x9x32xf32>
    %87 = vector.extract_strided_slice %86 {offsets = [0, 0, 0, 0], sizes = [8, 1, 9, 32], strides = [1, 1, 1, 1]} : vector<8x2x9x32xf32> to vector<8x1x9x32xf32>
    %88 = vector.shape_cast %87 : vector<8x1x9x32xf32> to vector<8x9x32xf32>
    %89 = vector.extract_strided_slice %88 {offsets = [0, 0, 0], sizes = [8, 8, 32], strides = [1, 1, 1]} : vector<8x9x32xf32> to vector<8x8x32xf32>
    %90 = vector.extract_strided_slice %19 {offsets = [6, 0, 0], sizes = [1, 1, 32], strides = [1, 1, 1]} : vector<9x1x32xf32> to vector<1x1x32xf32>
    %91 = vector.shape_cast %90 : vector<1x1x32xf32> to vector<1x32xf32>
    %92 = vector.shape_cast %91 : vector<1x32xf32> to vector<1x1x32xf32>
    %93 = vector.broadcast %92 : vector<1x1x32xf32> to vector<8x8x32xf32>
    %94 = arith.mulf %89, %93 : vector<8x8x32xf32>
    %95 = arith.addf %80, %94 : vector<8x8x32xf32>
    %96 = vector.extract_strided_slice %19 {offsets = [7, 0, 0], sizes = [1, 1, 32], strides = [1, 1, 1]} : vector<9x1x32xf32> to vector<1x1x32xf32>
    %97 = vector.shape_cast %96 : vector<1x1x32xf32> to vector<1x32xf32>
    %98 = vector.shape_cast %97 : vector<1x32xf32> to vector<1x1x32xf32>
    %99 = vector.broadcast %98 : vector<1x1x32xf32> to vector<8x8x32xf32>
    %100 = arith.mulf %84, %99 : vector<8x8x32xf32>
    %101 = arith.addf %95, %100 : vector<8x8x32xf32>
    %102 = vector.extract_strided_slice %88 {offsets = [0, 1, 0], sizes = [8, 8, 32], strides = [1, 1, 1]} : vector<8x9x32xf32> to vector<8x8x32xf32>
    %103 = vector.extract_strided_slice %19 {offsets = [8, 0, 0], sizes = [1, 1, 32], strides = [1, 1, 1]} : vector<9x1x32xf32> to vector<1x1x32xf32>
    %104 = vector.shape_cast %103 : vector<1x1x32xf32> to vector<1x32xf32>
    %105 = vector.shape_cast %104 : vector<1x32xf32> to vector<1x1x32xf32>
    %106 = vector.broadcast %105 : vector<1x1x32xf32> to vector<8x8x32xf32>
    %107 = arith.mulf %102, %106 : vector<8x8x32xf32>
    %108 = arith.addf %101, %107 : vector<8x8x32xf32>
    %109 = vector.shape_cast %108 : vector<8x8x32xf32> to vector<64x32xf32>
    %110 = arith.truncf %109 : vector<64x32xf32> to vector<64x32xbf16>
    %111 = vector.extract_strided_slice %4 {offsets = [0, 0], sizes = [256, 16], strides = [1, 1]} : vector<256x32xf32> to vector<256x16xf32>
    %112 = arith.truncf %111 : vector<256x16xf32> to vector<256x16xbf16>
    %113 = vector.extract_strided_slice %110 {offsets = [0, 0], sizes = [64, 16], strides = [1, 1]} : vector<64x32xbf16> to vector<64x16xbf16>
    %cst_56 = arith.constant dense<0.000000e+00> : vector<256x64xf32>
    %114 = tpu.matmul %112, %113, %cst_56 {dimension_numbers = #tpu.dot_dimension_numbers<[1], [1], [0], [0], [0, 0, 1, 0], [], []>} : vector<256x16xbf16>, vector<64x16xbf16>, vector<256x64xf32> -> vector<256x64xf32>
    %cst_57 = arith.constant dense<0xFF800000> : vector<256xf32>
    %115 = vector.multi_reduction <maximumf>, %114, %cst_57 [1] : vector<256x64xf32> to vector<256xf32>
    %116 = vector.shape_cast %115 : vector<256xf32> to vector<256x1xf32>
    %117 = vector.broadcast %116 : vector<256x1xf32> to vector<256x64xf32>
    %118 = arith.subf %114, %117 : vector<256x64xf32>
    %119 = math.exp %118 : vector<256x64xf32>
    %cst_58 = arith.constant dense<0.000000e+00> : vector<256xf32>
    %120 = vector.multi_reduction <add>, %119, %cst_58 [1] : vector<256x64xf32> to vector<256xf32>
    %121 = vector.shape_cast %120 : vector<256xf32> to vector<256x1xf32>
    %122 = tpu.reciprocal %121 {approx = true} : vector<256x1xf32> -> vector<256x1xf32>
    %123 = vector.broadcast %122 : vector<256x1xf32> to vector<256x64xf32>
    %124 = arith.mulf %119, %123 : vector<256x64xf32>
    %125 = arith.truncf %124 : vector<256x64xf32> to vector<256x64xbf16>
    %cst_59 = arith.constant dense<0.000000e+00> : vector<256x16xf32>
    %126 = tpu.matmul %125, %113, %cst_59 {dimension_numbers = #tpu.dot_dimension_numbers<[1], [0], [0], [1], [0, 0, 1, 1], [], []>} : vector<256x64xbf16>, vector<64x16xbf16>, vector<256x16xf32> -> vector<256x16xf32>
    %c0_60 = arith.constant 0 : index
    %c0_61 = arith.constant 0 : index
    %127 = vector.load %arg14[%c0_60, %c0_61] : memref<256x32xf32, #tpu.memory_space<vmem>>, vector<256x16xf32>
    tpu.vector_store %arg14[%c0_60, %c0_61], %126 {strides = array<i32>} : memref<256x32xf32, #tpu.memory_space<vmem>>, vector<256x16xf32>,
    %128 = vector.extract_strided_slice %4 {offsets = [0, 16], sizes = [256, 16], strides = [1, 1]} : vector<256x32xf32> to vector<256x16xf32>
    %129 = arith.truncf %128 : vector<256x16xf32> to vector<256x16xbf16>
    %130 = vector.extract_strided_slice %110 {offsets = [0, 16], sizes = [64, 16], strides = [1, 1]} : vector<64x32xbf16> to vector<64x16xbf16>
    %cst_62 = arith.constant dense<0.000000e+00> : vector<256x64xf32>
    %131 = tpu.matmul %129, %130, %cst_62 {dimension_numbers = #tpu.dot_dimension_numbers<[1], [1], [0], [0], [0, 0, 1, 0], [], []>} : vector<256x16xbf16>, vector<64x16xbf16>, vector<256x64xf32> -> vector<256x64xf32>
    %cst_63 = arith.constant dense<0xFF800000> : vector<256xf32>
    %132 = vector.multi_reduction <maximumf>, %131, %cst_63 [1] : vector<256x64xf32> to vector<256xf32>
    %133 = vector.shape_cast %132 : vector<256xf32> to vector<256x1xf32>
    %134 = vector.broadcast %133 : vector<256x1xf32> to vector<256x64xf32>
    %135 = arith.subf %131, %134 : vector<256x64xf32>
    %136 = math.exp %135 : vector<256x64xf32>
    %cst_64 = arith.constant dense<0.000000e+00> : vector<256xf32>
    %137 = vector.multi_reduction <add>, %136, %cst_64 [1] : vector<256x64xf32> to vector<256xf32>
    %138 = vector.shape_cast %137 : vector<256xf32> to vector<256x1xf32>
    %139 = tpu.reciprocal %138 {approx = true} : vector<256x1xf32> -> vector<256x1xf32>
    %140 = vector.broadcast %139 : vector<256x1xf32> to vector<256x64xf32>
    %141 = arith.mulf %136, %140 : vector<256x64xf32>
    %142 = arith.truncf %141 : vector<256x64xf32> to vector<256x64xbf16>
    %cst_65 = arith.constant dense<0.000000e+00> : vector<256x16xf32>
    %143 = tpu.matmul %142, %130, %cst_65 {dimension_numbers = #tpu.dot_dimension_numbers<[1], [0], [0], [1], [0, 0, 1, 1], [], []>} : vector<256x64xbf16>, vector<64x16xbf16>, vector<256x16xf32> -> vector<256x16xf32>
    %c0_66 = arith.constant 0 : index
    %c16 = arith.constant 16 : index
    %144 = vector.load %arg14[%c0_66, %c16] : memref<256x32xf32, #tpu.memory_space<vmem>>, vector<256x16xf32>
    tpu.vector_store %arg14[%c0_66, %c16], %143 {strides = array<i32>} : memref<256x32xf32, #tpu.memory_space<vmem>>, vector<256x16xf32>,
    %c0_67 = arith.constant 0 : index
    %c0_68 = arith.constant 0 : index
    %145 = vector.load %arg14[%c0_67, %c0_68] : memref<256x32xf32, #tpu.memory_space<vmem>>, vector<256x32xf32>
    %146 = arith.truncf %145 : vector<256x32xf32> to vector<256x32xbf16>
    %c0_69 = arith.constant 0 : index
    %c0_70 = arith.constant 0 : index
    %147 = vector.load %arg6[%c0_69, %c0_70] : memref<32x32xbf16, #tpu.memory_space<vmem>>, vector<32x32xbf16>
    %cst_71 = arith.constant dense<0.000000e+00> : vector<256x32xf32>
    %148 = tpu.matmul %146, %147, %cst_71 {dimension_numbers = #tpu.dot_dimension_numbers<[1], [0], [0], [1], [0, 0, 1, 1], [], []>} : vector<256x32xbf16>, vector<32x32xbf16>, vector<256x32xf32> -> vector<256x32xf32>
    %c0_72 = arith.constant 0 : index
    %c0_73 = arith.constant 0 : index
    %149 = vector.load %arg7[%c0_72, %c0_73] : memref<1x32xf32, #tpu.memory_space<vmem>>, vector<1x32xf32>
    %150 = vector.broadcast %149 : vector<1x32xf32> to vector<256x32xf32>
    %151 = arith.addf %148, %150 : vector<256x32xf32>
    %cst_74 = arith.constant dense<0.000000e+00> : vector<256xf32>
    %152 = vector.multi_reduction <add>, %151, %cst_74 [1] : vector<256x32xf32> to vector<256xf32>
    %153 = vector.shape_cast %152 : vector<256xf32> to vector<256x1xf32>
    %cst_75 = arith.constant 3.200000e+01 : f32
    %154 = vector.broadcast %cst_75 : f32 to vector<256x1xf32>
    %155 = arith.divf %153, %154 : vector<256x1xf32>
    %156 = vector.broadcast %155 : vector<256x1xf32> to vector<256x32xf32>
    %157 = arith.subf %151, %156 : vector<256x32xf32>
    %158 = arith.mulf %157, %157 : vector<256x32xf32>
    %cst_76 = arith.constant dense<0.000000e+00> : vector<256xf32>
    %159 = vector.multi_reduction <add>, %158, %cst_76 [1] : vector<256x32xf32> to vector<256xf32>
    %160 = vector.shape_cast %159 : vector<256xf32> to vector<256x1xf32>
    %cst_77 = arith.constant 3.200000e+01 : f32
    %161 = vector.broadcast %cst_77 : f32 to vector<256x1xf32>
    %162 = arith.divf %160, %161 : vector<256x1xf32>
    %163 = vector.broadcast %155 : vector<256x1xf32> to vector<256x32xf32>
    %164 = arith.subf %151, %163 : vector<256x32xf32>
    %cst_78 = arith.constant 9.99999974E-6 : f32
    %165 = vector.broadcast %cst_78 : f32 to vector<256x1xf32>
    %166 = arith.addf %162, %165 : vector<256x1xf32>
    %167 = math.rsqrt %166 : vector<256x1xf32>
    %168 = vector.broadcast %167 : vector<256x1xf32> to vector<256x32xf32>
    %169 = arith.mulf %164, %168 : vector<256x32xf32>
    %c0_79 = arith.constant 0 : index
    %c0_80 = arith.constant 0 : index
    %170 = vector.load %arg8[%c0_79, %c0_80] : memref<1x32xf32, #tpu.memory_space<vmem>>, vector<1x32xf32>
    %171 = vector.broadcast %170 : vector<1x32xf32> to vector<256x32xf32>
    %172 = arith.mulf %169, %171 : vector<256x32xf32>
    %c0_81 = arith.constant 0 : index
    %c0_82 = arith.constant 0 : index
    %173 = vector.load %arg9[%c0_81, %c0_82] : memref<1x32xf32, #tpu.memory_space<vmem>>, vector<1x32xf32>
    %174 = vector.broadcast %173 : vector<1x32xf32> to vector<256x32xf32>
    %175 = arith.addf %172, %174 : vector<256x32xf32>
    %176 = arith.addf %151, %175 : vector<256x32xf32>
    %c0_83 = arith.constant 0 : index
    %c0_84 = arith.constant 0 : index
    %c0_85 = arith.constant 0 : index
    %177 = vector.load %arg10[%c0_83, %c0_84, %c0_85] : memref<1x256x32xf32, #tpu.memory_space<vmem>>, vector<1x256x32xf32>
    %178 = vector.shape_cast %177 : vector<1x256x32xf32> to vector<256x32xf32>
    %179 = vector.shape_cast %176 : vector<256x32xf32> to vector<1x256x32xf32>
    tpu.vector_store %arg10[%c0_83, %c0_84, %c0_85], %179 {strides = array<i32>} : memref<1x256x32xf32, #tpu.memory_space<vmem>>, vector<1x256x32xf32>,
    return
  }
  func.func @transform_0(%arg0: i32) -> (i32, i32, i32) {
    %c0_i32 = arith.constant 0 : i32
    %c0_i32_0 = arith.constant 0 : i32
    %c0_i32_1 = arith.constant 0 : i32
    return %arg0, %c0_i32, %c0_i32_0 : i32, i32, i32
  }
  func.func @transform_1(%arg0: i32) -> (i32, i32) {
    %c0_i32 = arith.constant 0 : i32
    %c0_i32_0 = arith.constant 0 : i32
    %c0_i32_1 = arith.constant 0 : i32
    return %c0_i32, %c0_i32_0 : i32, i32
  }
  func.func @transform_2(%arg0: i32) -> (i32, i32) {
    %c0_i32 = arith.constant 0 : i32
    %c0_i32_0 = arith.constant 0 : i32
    %c0_i32_1 = arith.constant 0 : i32
    return %c0_i32, %c0_i32_0 : i32, i32
  }
  func.func @transform_3(%arg0: i32) -> (i32, i32, i32) {
    %c0_i32 = arith.constant 0 : i32
    %c0_i32_0 = arith.constant 0 : i32
    %c0_i32_1 = arith.constant 0 : i32
    %c0_i32_2 = arith.constant 0 : i32
    return %c0_i32, %c0_i32_0, %c0_i32_1 : i32, i32, i32
  }
  func.func @transform_4(%arg0: i32) -> (i32, i32) {
    %c0_i32 = arith.constant 0 : i32
    %c0_i32_0 = arith.constant 0 : i32
    %c0_i32_1 = arith.constant 0 : i32
    return %c0_i32, %c0_i32_0 : i32, i32
  }
  func.func @transform_5(%arg0: i32) -> (i32, i32) {
    %c0_i32 = arith.constant 0 : i32
    %c0_i32_0 = arith.constant 0 : i32
    %c0_i32_1 = arith.constant 0 : i32
    return %c0_i32, %c0_i32_0 : i32, i32
  }
  func.func @transform_6(%arg0: i32) -> (i32, i32) {
    %c0_i32 = arith.constant 0 : i32
    %c0_i32_0 = arith.constant 0 : i32
    %c0_i32_1 = arith.constant 0 : i32
    return %c0_i32, %c0_i32_0 : i32, i32
  }
  func.func @transform_7(%arg0: i32) -> (i32, i32) {
    %c0_i32 = arith.constant 0 : i32
    %c0_i32_0 = arith.constant 0 : i32
    %c0_i32_1 = arith.constant 0 : i32
    return %c0_i32, %c0_i32_0 : i32, i32
  }
  func.func @transform_8(%arg0: i32) -> (i32, i32) {
    %c0_i32 = arith.constant 0 : i32
    %c0_i32_0 = arith.constant 0 : i32
    %c0_i32_1 = arith.constant 0 : i32
    return %c0_i32, %c0_i32_0 : i32, i32
  }
  func.func @transform_9(%arg0: i32) -> (i32, i32, i32) {
    %c0_i32 = arith.constant 0 : i32
    %c0_i32_0 = arith.constant 0 : i32
    %c0_i32_1 = arith.constant 0 : i32
    return %arg0, %c0_i32, %c0_i32_0 : i32, i32, i32
  }
}

</mosaic_0001>

<bundles_post_ra>
// kernel: cpsa_block.1
= control target key start
LH: loop header
LB: loop body
LE: loop exit
PB: predicated region body
PF: predicated region fallthrough
CT: control target
= control target key end

     0   :  { %s4512_s30 = smov 0   ;;  %s6708_s0 = inlined_call_operand.vmem [shape: f32[2,256,32], index: 0, kind: input, shape index: {}]   ;;  %s6709_s1 = inlined_call_operand.vmem [shape: bf16[32,32], index: 1, kind: input, shape index: {}]   ;;  %s6710_s2 = inlined_call_operand.vmem [shape: bf16[32,32], index: 2, kind: input, shape index: {}]   ;;  %s6711_s3 = inlined_call_operand.vmem [shape: f32[9,1,32], index: 3, kind: input, shape index: {}]   ;;  %s6712_s4 = inlined_call_operand.vmem [shape: f32[1,32], index: 4, kind: input, shape index: {}]   ;;  %s6713_s5 = inlined_call_operand.vmem [shape: bf16[32,32], index: 5, kind: input, shape index: {}]   ;;  %s6714_s6 = inlined_call_operand.vmem [shape: f32[1,32], index: 6, kind: input, shape index: {}]   ;;  %s6715_s7 = inlined_call_operand.vmem [shape: f32[1,32], index: 7, kind: input, shape index: {}]   ;;  %s6716_s8 = inlined_call_operand.vmem [shape: f32[1,32], index: 8, kind: input, shape index: {}]   ;;  %s6717_s9 = inlined_call_operand.vmem [shape: f32[2,256,32], index: 9, kind: output, shape index: {}]  }
   0x1 LB: > { %s3938_s10 = sadd.s32 4294967295, %s4456_s30   ;;  %p3942_p0 = scmp.ge.s32.totalorder %s4456_s30, 1  ;;  %s4456_s30 = sphi %s4512_s30, %s19_s30  }
   0x2   : > { %p287_p1 = scmp.lt.s32.totalorder %s4456_s30, 3 }
   0x4   : > { %p288_p2 = pnand %p3942_p0, %p287_p1 }
   0x6   : > { %291 = sbr.rel (%p288_p2) target bundleno = 2021 (0x7e5), region = 56 }
   0xb   : > { %v4088_v0 = vld [vmem:[%s6709_s1 + $0x8] sm:$0xff]  ;;  %p323_p3 = scmp.lt.s32.totalorder %s3938_s10, 1  ;;  %v4087_v2 = vld [vmem:[%s6709_s1] sm:$0xff]  ;;  %vm398_vm0 = vcmask 261120   ;;  %vm675_vm1 = vcmask 253952   ;;  %v4458_v36 = vmov 0.0  }
   0xc   : > { %v4090_v1 = vld [vmem:[%s6710_s2 + $0x8] sm:$0xff]  ;;  %453 = vmatpush.bf16.msra.mxu0 %v4088_v0  ;;  %v4089_v3 = vld [vmem:[%s6710_s2] sm:$0xff]  ;;  %4093 = vmatpush.bf16.msra.mxu2 %v4088_v0  ;;  %673 = vst.msk [vmem:[#allocation3] sm:$0xff] %vm398_vm0, %v4458_v36  ;;  %s4459_s23 = smov 112   ;;  %vm903_vm2 = vcmask 1046528   ;;  %vm1264_vm3 = vcmask 130048  }
   0xd   : > { %558 = vmatpush.bf16.msra.mxu1 %v4090_v1  ;;  %s6758_s10 = smov (!%p323_p3, %s3938_s10), 1  ;;  %681 = vst.msk [vmem:[#allocation4 + $0x40] sm:$0x1] %vm675_vm1, %v4458_v36  ;;  %vm1414_vm4 = vcmask 523264   ;;  %vm2798_vm5 = vcmask 261248  }
   0xe   : > { %s4085_s19 = sshll.u32 %s6758_s10, 8  ;;  %682 = vst.msk [vmem:[#allocation4 + $0x50] sm:$0x1] %vm675_vm1, %v4458_v36 }
   0xf   : > { %s4540_s22 = scalar_lea.vmem %s6708_s0, %s4085_s19  ;;  %683 = vst.msk [vmem:[#allocation4 + $0x60] sm:$0x1] %vm675_vm1, %v4458_v36  ;;  %s6272_s21 = scalar_lea.vmem %s6717_s9, %s4085_s19 }
  0x10   : > { %454 = vmatpush.bf16.msra.mxu0 %v4087_v2  ;;  %v334_v4 = vld [vmem:[%s4540_s22] sm:$0xff]  ;;  %v335_v5 = vld [vmem:[%s4540_s22 + $0x8] sm:$0xff]  ;;  %4094 = vmatpush.bf16.msra.mxu2 %v4087_v2  ;;  %v336_v7 = vld [vmem:[%s4540_s22 + $0x10] sm:$0xff]  ;;  %684 = vst.msk [vmem:[#allocation4 + $0x70] sm:$0x1] %vm675_vm1, %v4458_v36 }
  0x11   : > { %559 = vmatpush.bf16.msra.mxu1 %v4089_v3  ;;  %v366_v6 = vpack.c.bf16 %v335_v5, %v334_v4  ;;  %v337_v8 = vld [vmem:[%s4540_s22 + $0x18] sm:$0xff]  ;;  %v338_v10 = vld [vmem:[%s4540_s22 + $0x20] sm:$0xff]  ;;  %v339_v11 = vld [vmem:[%s4540_s22 + $0x28] sm:$0xff]  ;;  %685 = vst.msk [vmem:[#allocation4 + $0x80] sm:$0x1] %vm675_vm1, %v4458_v36 }
  0x12   : > { %v367_v9 = vpack.c.bf16 %v337_v8, %v336_v7  ;;  %v368_v12 = vpack.c.bf16 %v339_v11, %v338_v10  ;;  %v340_v13 = vld [vmem:[%s4540_s22 + $0x30] sm:$0xff]  ;;  %v341_v14 = vld [vmem:[%s4540_s22 + $0x38] sm:$0xff]  ;;  %v342_v19 = vld [vmem:[%s4540_s22 + $0x40] sm:$0xff]  ;;  %674 = vst.msk [vmem:[#allocation4] sm:$0xff] %vm398_vm0, %v4458_v36 }
  0x13   : > { %3955 = vmatmul.msk.bf16.vlgmr.msra.gmra.mxu0 %vm398_vm0, %v366_v6  ;;  %v369_v15 = vpack.c.bf16 %v341_v14, %v340_v13  ;;  %v360_v16 = vld [vmem:[%s4540_s22 + $0xd0] sm:$0xff]  ;;  %v361_v17 = vld [vmem:[%s4540_s22 + $0xd8] sm:$0xff]  ;;  %v343_v20 = vld [vmem:[%s4540_s22 + $0x48] sm:$0xff]  ;;  %676 = vst.msk [vmem:[#allocation4 + $0x8] sm:$0x1] %vm675_vm1, %v4458_v36 }
  0x14   : > { %4095 = vmatpush.bf16.msrb.mxu2 %v4090_v1  ;;  %3979 = vmatmul.msk.bf16.vlgmr.msra.gmra.mxu1 %vm398_vm0, %v366_v6  ;;  %v379_v18 = vpack.c.bf16 %v361_v17, %v360_v16  ;;  %v370_v21 = vpack.c.bf16 %v343_v20, %v342_v19  ;;  %v362_v22 = vld [vmem:[%s4540_s22 + $0xe0] sm:$0xff]  ;;  %v363_v23 = vld [vmem:[%s4540_s22 + $0xe8] sm:$0xff]  ;;  %v344_v25 = vld [vmem:[%s4540_s22 + $0x50] sm:$0xff]  ;;  %678 = vst.msk [vmem:[#allocation4 + $0x10] sm:$0x1] %vm675_vm1, %v4458_v36 }
  0x15   : > { %v380_v24 = vpack.c.bf16 %v363_v23, %v362_v22  ;;  %v345_v26 = vld [vmem:[%s4540_s22 + $0x58] sm:$0xff]  ;;  %v364_v28 = vld [vmem:[%s4540_s22 + $0xf0] sm:$0xff]  ;;  %v346_v31 = vld [vmem:[%s4540_s22 + $0x60] sm:$0xff]  ;;  %679 = vst.msk [vmem:[#allocation4 + $0x20] sm:$0x1] %vm675_vm1, %v4458_v36 }
  0x16   : > { %3968 = vmatmul.msk.bf16.vlgmr.msra.gmra.mxu2 %vm398_vm0, %v379_v18  ;;  %v371_v27 = vpack.c.bf16 %v345_v26, %v344_v25  ;;  %v365_v29 = vld [vmem:[%s4540_s22 + $0xf8] sm:$0xff]  ;;  %v347_v32 = vld [vmem:[%s4540_s22 + $0x68] sm:$0xff]  ;;  %v348_v34 = vld [vmem:[%s4540_s22 + $0x70] sm:$0xff]  ;;  %680 = vst.msk [vmem:[#allocation4 + $0x30] sm:$0x1] %vm675_vm1, %v4458_v36 }
  0x17   : > { %v381_v30 = vpack.c.bf16 %v365_v29, %v364_v28  ;;  %v372_v33 = vpack.c.bf16 %v347_v32, %v346_v31  ;;  %v349_v35 = vld [vmem:[%s4540_s22 + $0x78] sm:$0xff]  ;;  %686 = vst.msk [vmem:[#allocation4 + $0x90] sm:$0x1] %vm675_vm1, %v4458_v36  ;;  %v350_v38 = vld [vmem:[%s4540_s22 + $0x80] sm:$0xff]  ;;  %v351_v39 = vld [vmem:[%s4540_s22 + $0x88] sm:$0xff] }
  0x18   : > { %4096 = vmatpush.bf16.msrb.mxu2 %v4089_v3  ;;  %v373_v37 = vpack.c.bf16 %v349_v35, %v348_v34  ;;  %687 = vst.msk [vmem:[#allocation4 + $0xa0] sm:$0x1] %vm675_vm1, %v4458_v36  ;;  %v374_v40 = vpack.c.bf16 %v351_v39, %v350_v38  ;;  %v352_v46 = vld [vmem:[%s4540_s22 + $0x90] sm:$0xff]  ;;  %v353_v47 = vld [vmem:[%s4540_s22 + $0x98] sm:$0xff]  ;;  %v354_v56 = vld [vmem:[%s4540_s22 + $0xa0] sm:$0xff] }
  0x19   : > { %688 = vst.msk [vmem:[#allocation4 + $0xb0] sm:$0x1] %vm675_vm1, %v4458_v36  ;;  %v375_v48 = vpack.c.bf16 %v353_v47, %v352_v46  ;;  %v355_v57 = vld [vmem:[%s4540_s22 + $0xa8] sm:$0xff]  ;;  %v356_v2 = vld [vmem:[%s4540_s22 + $0xb0] sm:$0xff]  ;;  %v357_v3 = vld [vmem:[%s4540_s22 + $0xb8] sm:$0xff] }
  0x1a   : > { %689 = vst.msk [vmem:[#allocation4 + $0xc0] sm:$0x1] %vm675_vm1, %v4458_v36  ;;  %v376_v58 = vpack.c.bf16 %v355_v57, %v354_v56  ;;  %v377_v4 = vpack.c.bf16 %v357_v3, %v356_v2  ;;  %v359_v13 = vld [vmem:[%s4540_s22 + $0xc8] sm:$0xff]  ;;  %v4692_v38 = vld [vmem:[%s6711_s3] ss:$0 sm:$0xff] }
  0x1b   : > { %690 = vst.msk [vmem:[#allocation4 + $0xd0] sm:$0x1] %vm675_vm1, %v4458_v36  ;;  %v4697_v39 = vld [vmem:[%s6711_s3 + $0x2] ss:$0 sm:$0xff] }
  0x1c   : > { %691 = vst.msk [vmem:[#allocation4 + $0xe0] sm:$0x1] %vm675_vm1, %v4458_v36 }
  0x1d   : > { %692 = vst.msk [vmem:[#allocation4 + $0xf0] sm:$0x1] %vm675_vm1, %v4458_v36 }
  0x1e   : > { %693 = vst.msk [vmem:[#allocation4 + $0x100] sm:$0x1] %vm675_vm1, %v4458_v36 }
  0x1f   : > { %677 = vst.msk [vmem:[#allocation4] sm:$0x1] %vm675_vm1, %v4458_v36 }
  0x23   : > { %3956 = vmatmul.msk.bf16.gmra.mxu0 %vm398_vm0, %v367_v9 }
  0x24   : > { %3980 = vmatmul.msk.bf16.gmra.mxu1 %vm398_vm0, %v367_v9 }
  0x26   : > { %3969 = vmatmul.msk.bf16.gmra.mxu2 %vm398_vm0, %v380_v24 }
  0x33   : > { %3957 = vmatmul.msk.bf16.gmra.mxu0 %vm398_vm0, %v368_v12 }
  0x34   : > { %3981 = vmatmul.msk.bf16.gmra.mxu1 %vm398_vm0, %v368_v12  ;;  %v358_v12 = vld [vmem:[%s4540_s22 + $0xc0] sm:$0xff] }
  0x35   : > { %v378_v14 = vpack.c.bf16 %v359_v13, %v358_v12 }
  0x36   : > { %3970 = vmatmul.msk.bf16.gmra.mxu2 %vm398_vm0, %v381_v30 }
  0x43   : > { %3958 = vmatmul.msk.bf16.gmra.mxu0 %vm398_vm0, %v369_v15 }
  0x44   : > { %3982 = vmatmul.msk.bf16.gmra.mxu1 %vm398_vm0, %v369_v15 }
  0x46   : > { %3992 = vmatmul.msk.bf16.vlgmr.msrb.gmra.mxu2 %vm398_vm0, %v379_v18 }
  0x53   : > { %3959 = vmatmul.msk.bf16.gmra.mxu0 %vm398_vm0, %v370_v21 }
  0x54   : > { %3983 = vmatmul.msk.bf16.gmra.mxu1 %vm398_vm0, %v370_v21 }
  0x56   : > { %3993 = vmatmul.msk.bf16.gmra.mxu2 %vm398_vm0, %v380_v24 }
  0x63   : > { %3960 = vmatmul.msk.bf16.gmra.mxu0 %vm398_vm0, %v371_v27 }
  0x64   : > { %3984 = vmatmul.msk.bf16.gmra.mxu1 %vm398_vm0, %v371_v27 }
  0x66   : > { %3994 = vmatmul.msk.bf16.gmra.mxu2 %vm398_vm0, %v381_v30 }
  0x73   : > { %3961 = vmatmul.msk.bf16.gmra.mxu0 %vm398_vm0, %v372_v33 }
  0x74   : > { %3985 = vmatmul.msk.bf16.gmra.mxu1 %vm398_vm0, %v372_v33 }
  0x83   : > { %3962 = vmatmul.msk.bf16.gmra.mxu0 %vm398_vm0, %v373_v37 }
  0x84   : > { %3986 = vmatmul.msk.bf16.gmra.mxu1 %vm398_vm0, %v373_v37 }
  0x90   : > { %v456_v41 = vpop.f32.mrf.mxu0 }
  0x91   : > { %v561_v42 = vpop.f32.mrf.mxu1 }
  0x92   : > { %641 = vst.msk [vmem:[#allocation2] sm:$0xff] %vm398_vm0, %v561_v42 }
  0x93   : > { %3963 = vmatmul.msk.bf16.gmra.mxu0 %vm398_vm0, %v374_v40 }
  0x94   : > { %3987 = vmatmul.msk.bf16.gmra.mxu1 %vm398_vm0, %v374_v40  ;;  %v814_v40 = vld [vmem:[#allocation4] sm:$0xff] }
  0x98   : > { %v458_v43 = vpop.f32.mrf.mxu0 }
  0x99   : > { %v563_v44 = vpop.f32.mrf.mxu1  ;;  %v4612_v45 = vpack.c.bf16 %v458_v43, %v456_v41  ;;  %v4652_v11 = vpop.f32.mrf.mxu2 }
  0x9a   : > { %642 = vst.msk [vmem:[#allocation2 + $0x8] sm:$0xff] %vm398_vm0, %v563_v44  ;;  %v815_v44 = vld [vmem:[#allocation4 + $0x8] sm:$0x1] }
  0x9b   : > { %1972 = vrot.lane.b32.xlu2 %v4612_v45, %s4459_s23 }
  0xa0   : > { %v461_v51 = vpop.f32.mrf.mxu0 }
  0xa1   : > { %v695_v49 = vld [vmem:[#allocation2] ss:$2 sm:$0xff]  ;;  %v744_v50 = vld [vmem:[#allocation2 + $0x1] ss:$2 sm:$0xff]  ;;  %v566_v52 = vpop.f32.mrf.mxu1  ;;  %v4658_v19 = vpop.f32.mrf.mxu2 }
  0xa2   : > { %727 = vst.msk [vmem:[#allocation3 + $0x8] sm:$0xff] %vm398_vm0, %v695_v49  ;;  %v4712_v49 = vld [vmem:[%s6711_s3 + $0x1] ss:$0 sm:$0xff] }
  0xa3   : > { %776 = vst.msk [vmem:[#allocation4 + $0x11] sm:$0xff] %vm398_vm0, %v744_v50  ;;  %3964 = vmatmul.msk.bf16.gmra.mxu0 %vm398_vm0, %v375_v48  ;;  %v833_v50 = vmul.f32 %v4692_v38, %v814_v40 }
  0xa4   : > { %643 = vst.msk [vmem:[#allocation2 + $0x10] sm:$0xff] %vm398_vm0, %v566_v52  ;;  %3988 = vmatmul.msk.bf16.gmra.mxu1 %vm398_vm0, %v375_v48  ;;  %v4707_v48 = vld [vmem:[%s6712_s4] ss:$0 sm:$0xff] }
  0xa5   : > { %v806_v52 = vld [vmem:[#allocation3] sm:$0xff] }
  0xa8   : > { %v463_v53 = vpop.f32.mrf.mxu0 }
  0xa9   : > { %v568_v54 = vpop.f32.mrf.mxu1  ;;  %v4623_v55 = vpack.c.bf16 %v463_v53, %v461_v51  ;;  %v4666_v23 = vpop.f32.mrf.mxu2  ;;  %v871_v53 = vmul.f32 %v4697_v39, %v814_v40 }
  0xaa   : > { %644 = vst.msk [vmem:[#allocation2 + $0x18] sm:$0xff] %vm398_vm0, %v568_v54  ;;  %v872_v54 = vmul.f32 %v4697_v39, %v815_v44  ;;  %v952_v44 = vld [vmem:[#allocation4 + $0x10] sm:$0xff] }
  0xab   : > { %1974 = vrot.lane.b32.xlu2 %v4623_v55, %s4459_s23  ;;  %v904_v2 = vrot.slane %v871_v53, 1 }
  0xac   : > { %v905_v3 = vrot.slane %v872_v54, 1 }
  0xb0   : > { %v466_v61 = vpop.f32.mrf.mxu0 }
  0xb1   : > { %v697_v59 = vld [vmem:[#allocation2 + $0x10] ss:$2 sm:$0xff]  ;;  %v746_v60 = vld [vmem:[#allocation2 + $0x11] ss:$2 sm:$0xff]  ;;  %v571_v62 = vpop.f32.mrf.mxu1  ;;  %v4672_v28 = vpop.f32.mrf.mxu2 }
  0xb2   : > { %728 = vst.msk [vmem:[#allocation3 + $0x10] sm:$0xff] %vm398_vm0, %v697_v59 }
  0xb3   : > { %777 = vst.msk [vmem:[#allocation4 + $0x21] sm:$0xff] %vm398_vm0, %v746_v60  ;;  %3965 = vmatmul.msk.bf16.gmra.mxu0 %vm398_vm0, %v376_v58 }
  0xb4   : > { %645 = vst.msk [vmem:[#allocation2 + $0x20] sm:$0xff] %vm398_vm0, %v571_v62  ;;  %3989 = vmatmul.msk.bf16.gmra.mxu1 %vm398_vm0, %v376_v58  ;;  %v852_v62 = vmul.f32 %v4712_v49, %v806_v52 }
  0xb8   : > { %v468_v63 = vpop.f32.mrf.mxu0 }
  0xb9   : > { %v573_v0 = vpop.f32.mrf.mxu1  ;;  %v4636_v1 = vpack.c.bf16 %v468_v63, %v466_v61  ;;  %v4678_v32 = vpop.f32.mrf.mxu2  ;;  %v841_v61 = vadd.f32 %v4707_v48, %v833_v50 }
  0xba   : > { %646 = vst.msk [vmem:[#allocation2 + $0x28] sm:$0xff] %vm398_vm0, %v573_v0  ;;  %v4723_v58 = vld [vmem:[#allocation4 + $0x20] sm:$0xff]  ;;  %v817_v59 = vld [vmem:[#allocation4 + $0x28] sm:$0x1] }
  0xbb   : > { %1976 = vrot.lane.b32.xlu0 %v4636_v1, %s4459_s23  ;;  %v834_v0 = vmul.f32 %v4692_v38, %v4723_v58  ;;  %v873_v13 = vmul.f32 %v4697_v39, %v4723_v58 }
  0xbd   : > { %v907_v40 = vrot.slane %v873_v13, 1 }
  0xc0   : > { %v4642_v7 = vpop.f32.mrf.mxu0 }
  0xc1   : > { %v699_v5 = vld [vmem:[#allocation2 + $0x20] ss:$2 sm:$0xff]  ;;  %v748_v6 = vld [vmem:[#allocation2 + $0x21] ss:$2 sm:$0xff]  ;;  %v576_v8 = vpop.f32.mrf.mxu1  ;;  %v4686_v37 = vpop.f32.mrf.mxu2 }
  0xc2   : > { %729 = vst.msk [vmem:[#allocation3 + $0x18] sm:$0xff] %vm398_vm0, %v699_v5 }
  0xc3   : > { %778 = vst.msk [vmem:[#allocation4 + $0x31] sm:$0xff] %vm398_vm0, %v748_v6  ;;  %3966 = vmatmul.msk.bf16.gmra.mxu0 %vm398_vm0, %v377_v4 }
  0xc4   : > { %647 = vst.msk [vmem:[#allocation2 + $0x30] sm:$0xff] %vm398_vm0, %v576_v8  ;;  %3990 = vmatmul.msk.bf16.gmra.mxu1 %vm398_vm0, %v377_v4 }
  0xc8   : > { %v4649_v9 = vpop.f32.mrf.mxu0 }
  0xc9   : > { %v578_v10 = vpop.f32.mrf.mxu1  ;;  %v626_v47 = vpop.f32.mrf.mxu2 }
  0xca   : > { %648 = vst.msk [vmem:[#allocation2 + $0x38] sm:$0xff] %vm398_vm0, %v578_v10  ;;  %v954_v52 = vld [vmem:[#allocation4 + $0x30] sm:$0xff]  ;;  %v955_v13 = vld [vmem:[#allocation4 + $0x38] sm:$0x1] }
  0xcb   : > { %667 = vst.msk [vmem:[#allocation2 + $0xd0] sm:$0xff] %vm398_vm0, %v626_v47 }
  0xd0   : > { %v476_v17 = vpop.f32.mrf.mxu0 }
  0xd1   : > { %v701_v15 = vld [vmem:[#allocation2 + $0x30] ss:$2 sm:$0xff]  ;;  %v750_v16 = vld [vmem:[#allocation2 + $0x31] ss:$2 sm:$0xff]  ;;  %v581_v18 = vpop.f32.mrf.mxu1 }
  0xd2   : > { %730 = vst.msk [vmem:[#allocation3 + $0x20] sm:$0xff] %vm398_vm0, %v701_v15 }
  0xd3   : > { %779 = vst.msk [vmem:[#allocation4 + $0x41] sm:$0xff] %vm398_vm0, %v750_v16  ;;  %3967 = vmatmul.msk.bf16.gmra.mxu0 %vm398_vm0, %v378_v14 }
  0xd4   : > { %649 = vst.msk [vmem:[#allocation2 + $0x40] sm:$0xff] %vm398_vm0, %v581_v18  ;;  %3991 = vmatmul.msk.bf16.gmra.mxu1 %vm398_vm0, %v378_v14  ;;  %v874_v14 = vmul.f32 %v4697_v39, %v817_v59 }
  0xd8   : > { %v478_v20 = vpop.f32.mrf.mxu0 }
  0xd9   : > { %v583_v21 = vpop.f32.mrf.mxu1  ;;  %v4663_v22 = vpack.c.bf16 %v478_v20, %v476_v17  ;;  %v4725_v60 = vld [vmem:[#allocation3 + $0x20] sm:$0xff]  ;;  %v628_v17 = vpop.f32.mrf.mxu2 }
  0xda   : > { %650 = vst.msk [vmem:[#allocation2 + $0x48] sm:$0xff] %vm398_vm0, %v583_v21  ;;  %v4701_v43 = vld [vmem:[#allocation4 + $0x40] sm:$0xff]  ;;  %v819_v46 = vld [vmem:[#allocation4 + $0x48] sm:$0x1]  ;;  %v854_v16 = vmul.f32 %v4712_v49, %v4725_v60  ;;  %v4744_v21 = vld [vmem:[%s6711_s3 + $0x3] ss:$0 sm:$0xff] }
  0xdb   : > { %1980 = vrot.lane.b32.xlu2 %v4663_v22, %s4459_s23  ;;  %v835_v51 = vmul.f32 %v4692_v38, %v4701_v43  ;;  %v875_v56 = vmul.f32 %v4697_v39, %v4701_v43  ;;  %v876_v57 = vmul.f32 %v4697_v39, %v819_v46  ;;  %668 = vst.msk [vmem:[#allocation2 + $0xd8] sm:$0xff] %vm398_vm0, %v628_v17  ;;  %v953_v46 = vld [vmem:[#allocation4 + $0x18] sm:$0x1] }
  0xdd   : > { %v843_v63 = vadd.f32 %v4707_v48, %v835_v51  ;;  %v910_v10 = vrot.slane %v875_v56, 1  ;;  %v911_v12 = vrot.slane %v876_v57, 1 }
  0xe0   : > { %v481_v26 = vpop.f32.mrf.mxu0 }
  0xe1   : > { %v703_v24 = vld [vmem:[#allocation2 + $0x40] ss:$2 sm:$0xff]  ;;  %v752_v25 = vld [vmem:[#allocation2 + $0x41] ss:$2 sm:$0xff]  ;;  %v586_v27 = vpop.f32.mrf.mxu1 }
  0xe2   : > { %731 = vst.msk [vmem:[#allocation3 + $0x28] sm:$0xff] %vm398_vm0, %v703_v24  ;;  %v860_v24 = vadd.f32 %v852_v62, %v841_v61  ;;  %v971_v62 = vmul.f32 %v4744_v21, %v952_v44 }
  0xe3   : > { %780 = vst.msk [vmem:[#allocation4 + $0x51] sm:$0xff] %vm398_vm0, %v752_v25  ;;  %v862_v25 = vadd.f32 %v854_v16, %v843_v63 }
  0xe4   : > { %651 = vst.msk [vmem:[#allocation2 + $0x50] sm:$0xff] %vm398_vm0, %v586_v27  ;;  %v4750_v27 = vld [vmem:[%s6711_s3 + $0x5] ss:$0 sm:$0xff] }
  0xe5   : > { %v4772_v63 = vmul.f32 %v4750_v27, %v952_v44  ;;  %v1012_v44 = vmul.f32 %v4750_v27, %v955_v13 }
  0xe8   : > { %v483_v29 = vpop.f32.mrf.mxu0 }
  0xe9   : > { %v588_v30 = vpop.f32.mrf.mxu1  ;;  %v4675_v31 = vpack.c.bf16 %v483_v29, %v481_v26  ;;  %v4752_v29 = vld [vmem:[#allocation3 + $0x10] sm:$0xff] }
  0xea   : > { %652 = vst.msk [vmem:[#allocation2 + $0x58] sm:$0xff] %vm398_vm0, %v588_v30  ;;  %v956_v20 = vld [vmem:[#allocation4 + $0x50] sm:$0xff]  ;;  %v957_v26 = vld [vmem:[#allocation4 + $0x58] sm:$0x1]  ;;  %v842_v30 = vadd.f32 %v4707_v48, %v834_v0  ;;  %v853_v56 = vmul.f32 %v4712_v49, %v4752_v29  ;;  %v4775_v0 = vmul.f32 %v4750_v27, %v953_v46 }
  0xeb   : > { %1982 = vrot.lane.b32.xlu0 %v4675_v31, %s4459_s23  ;;  %v973_v51 = vmul.f32 %v4744_v21, %v956_v20  ;;  %v1013_v53 = vmul.f32 %v4750_v27, %v956_v20  ;;  %v1014_v54 = vmul.f32 %v4750_v27, %v957_v26 }
  0xed   : > { %v1047_v26 = vrot.slane %v1013_v53, 1 }
  0xf0   : > { %v4682_v35 = vpop.f32.mrf.mxu0 }
  0xf1   : > { %v705_v33 = vld [vmem:[#allocation2 + $0x50] ss:$2 sm:$0xff]  ;;  %v754_v34 = vld [vmem:[#allocation2 + $0x51] ss:$2 sm:$0xff]  ;;  %v591_v36 = vpop.f32.mrf.mxu1 }
  0xf2   : > { %732 = vst.msk [vmem:[#allocation3 + $0x30] sm:$0xff] %vm398_vm0, %v705_v33  ;;  %v906_v33 = vsel %vm903_vm2, %v904_v2, %v905_v3 }
  0xf3   : > { %781 = vst.msk [vmem:[#allocation4 + $0x61] sm:$0xff] %vm398_vm0, %v754_v34  ;;  %v936_v57 = vadd.f32 %v906_v33, %v860_v24  ;;  %v944_v24 = vld [vmem:[#allocation3 + $0x8] sm:$0xff]  ;;  %v1048_v33 = vrot.slane %v1014_v54, 1 }
  0xf4   : > { %653 = vst.msk [vmem:[#allocation2 + $0x60] sm:$0xff] %vm398_vm0, %v591_v36  ;;  %v912_v36 = vsel %vm903_vm2, %v910_v10, %v911_v12  ;;  %v861_v10 = vadd.f32 %v853_v56, %v842_v30  ;;  %v1011_v30 = vmul.f32 %v4750_v27, %v954_v52 }
  0xf5   : > { %v938_v61 = vadd.f32 %v912_v36, %v862_v25  ;;  %v721_v36 = vld [vmem:[#allocation2 + $0xd0] ss:$2 sm:$0xff]  ;;  %v1049_v13 = vsel %vm903_vm2, %v1047_v26, %v1048_v33 }
  0xf6   : > { %740 = vst.msk [vmem:[#allocation3 + $0x70] sm:$0xff] %vm398_vm0, %v721_v36 }
  0xf7   : > { %v981_v20 = vadd.f32 %v973_v51, %v938_v61 }
  0xf8   : > { %v4699_v41 = vpop.f32.mrf.mxu0 }
  0xf9   : > { %v593_v42 = vpop.f32.mrf.mxu1  ;;  %v4768_v59 = vld [vmem:[#allocation3 + $0x30] sm:$0xff] }
  0xfa   : > { %654 = vst.msk [vmem:[#allocation2 + $0x68] sm:$0xff] %vm398_vm0, %v593_v42  ;;  %v4736_v15 = vld [vmem:[#allocation4 + $0x60] sm:$0xff]  ;;  %v821_v18 = vld [vmem:[#allocation4 + $0x68] sm:$0x1]  ;;  %v908_v42 = vrot.slane %v874_v14, 1  ;;  %v972_v14 = vmul.f32 %v4744_v21, %v954_v52  ;;  %v855_v25 = vmul.f32 %v4712_v49, %v4768_v59  ;;  %v979_v52 = vadd.f32 %v971_v62, %v936_v57 }
  0xfb   : > { %v836_v34 = vmul.f32 %v4692_v38, %v4736_v15  ;;  %v877_v47 = vmul.f32 %v4697_v39, %v4736_v15  ;;  %v878_v50 = vmul.f32 %v4697_v39, %v821_v18  ;;  %v1096_v61 = vld [vmem:[#allocation4 + $0x68] sm:$0x1]  ;;  %v4812_v57 = vld [vmem:[%s6711_s3 + $0x8] ss:$0 sm:$0xff] }
  0xfc   : > { %v909_v12 = vsel %vm903_vm2, %v907_v40, %v908_v42  ;;  %v1152_v33 = vmul.f32 %v4812_v57, %v4736_v15 }
  0xfd   : > { %v913_v17 = vrot.slane %v877_v47, 1  ;;  %v914_v18 = vrot.slane %v878_v50, 1  ;;  %v4800_v50 = vld [vmem:[%s6711_s3 + $0x6] ss:$0 sm:$0xff]  ;;  %v937_v51 = vadd.f32 %v909_v12, %v861_v10  ;;  %v1044_v10 = vrot.slane %v1011_v30, 1 }
  0xfe   : > { %v4824_v30 = vpack.c.bf16 %v4658_v19, %v4652_v11 }
  0xff   : > { %v915_v54 = vsel %vm903_vm2, %v913_v17, %v914_v18  ;;  %v980_v62 = vadd.f32 %v972_v14, %v937_v51  ;;  %v1045_v18 = vrot.slane %v1012_v44, 1  ;;  %v4835_v51 = vld [vmem:[%s6711_s3 + $0x7] ss:$0 sm:$0xff] }
 0x100   : > { %v491_v6 = vpop.f32.mrf.mxu0 }
 0x101   : > { %v707_v4 = vld [vmem:[#allocation2 + $0x60] ss:$2 sm:$0xff]  ;;  %v756_v5 = vld [vmem:[#allocation2 + $0x61] ss:$2 sm:$0xff]  ;;  %v596_v8 = vpop.f32.mrf.mxu1 }
 0x102   : > { %733 = vst.msk [vmem:[#allocation3 + $0x38] sm:$0xff] %vm398_vm0, %v707_v4  ;;  %v844_v4 = vadd.f32 %v4707_v48, %v836_v34  ;;  %v631_v34 = vpop.f32.mrf.mxu2 }
 0x103   : > { %782 = vst.msk [vmem:[#allocation4 + $0x71] sm:$0xff] %vm398_vm0, %v756_v5  ;;  %v946_v5 = vld [vmem:[#allocation3 + $0x28] sm:$0xff] }
 0x104   : > { %655 = vst.msk [vmem:[#allocation2 + $0x70] sm:$0xff] %vm398_vm0, %v596_v8  ;;  %v4781_v8 = vld [vmem:[%s6711_s3 + $0x4] ss:$0 sm:$0xff]  ;;  %v863_v46 = vadd.f32 %v855_v25, %v844_v4  ;;  %v1042_v4 = vrot.slane %v4775_v0, 1 }
 0x105   : > { %v992_v42 = vmul.f32 %v4781_v8, %v946_v5  ;;  %669 = vst.msk [vmem:[#allocation2 + $0xe0] sm:$0xff] %vm398_vm0, %v631_v34  ;;  %v990_v53 = vmul.f32 %v4781_v8, %v944_v24  ;;  %v1153_v34 = vmul.f32 %v4812_v57, %v1096_v61  ;;  %v1094_v61 = vld [vmem:[#allocation4 + $0x48] sm:$0x1] }
 0x106   : > { %v939_v26 = vadd.f32 %v915_v54, %v863_v46  ;;  %v1046_v54 = vsel %vm903_vm2, %v1044_v10, %v1045_v18  ;;  %v1151_v18 = vmul.f32 %v4812_v57, %v1094_v61 }
 0x107   : > { %v1000_v56 = vadd.f32 %v992_v42, %v981_v20  ;;  %v998_v42 = vadd.f32 %v990_v53, %v979_v52  ;;  %v1186_v53 = vrot.slane %v1152_v33, 1 }
 0x108   : > { %v493_v2 = vpop.f32.mrf.mxu0 }
 0x109   : > { %v598_v3 = vpop.f32.mrf.mxu1  ;;  %v4785_v16 = vpack.c.bf16 %v493_v2, %v491_v6  ;;  %v770_v6 = vld [vmem:[#allocation2 + $0xd1] ss:$2 sm:$0xff] }
 0x10a   : > { %656 = vst.msk [vmem:[#allocation2 + $0x78] sm:$0xff] %vm398_vm0, %v598_v3  ;;  %v958_v40 = vld [vmem:[#allocation4 + $0x70] sm:$0xff]  ;;  %v959_v47 = vld [vmem:[#allocation4 + $0x78] sm:$0x1]  ;;  %v945_v2 = vld [vmem:[#allocation3 + $0x18] sm:$0xff]  ;;  %v1041_v3 = vrot.slane %v4772_v63, 1  ;;  %v1112_v63 = vmul.f32 %v4800_v50, %v4736_v15  ;;  %v633_v15 = vpop.f32.mrf.mxu2 }
 0x10b   : > { %1986 = vrot.lane.b32.xlu2 %v4785_v16, %s4459_s23  ;;  %789 = vst.msk [vmem:[#allocation4 + $0xe1] sm:$0xff] %vm398_vm0, %v770_v6  ;;  %v974_v5 = vmul.f32 %v4744_v21, %v958_v40  ;;  %v1015_v12 = vmul.f32 %v4750_v27, %v958_v40  ;;  %v1016_v17 = vmul.f32 %v4750_v27, %v959_v47  ;;  %v947_v36 = vld [vmem:[#allocation3 + $0x38] sm:$0xff] }
 0x10c   : > { %v991_v14 = vmul.f32 %v4781_v8, %v945_v2  ;;  %v1075_v6 = vadd.f32 %v1049_v13, %v1000_v56  ;;  %v1043_v46 = vsel %vm903_vm2, %v1041_v3, %v1042_v4  ;;  %v993_v52 = vmul.f32 %v4781_v8, %v947_v36  ;;  %670 = vst.msk [vmem:[#allocation2 + $0xe8] sm:$0xff] %vm398_vm0, %v633_v15  ;;  %v1092_v3 = vld [vmem:[#allocation4 + $0x28] sm:$0x1] }
 0x10d   : > { %v982_v40 = vadd.f32 %v974_v5, %v939_v26  ;;  %v1050_v47 = vrot.slane %v1015_v12, 1  ;;  %v1051_v11 = vrot.slane %v1016_v17, 1  ;;  %v1187_v56 = vrot.slane %v1153_v34, 1 }
 0x10e   : > { %v999_v44 = vadd.f32 %v991_v14, %v980_v62  ;;  %v1120_v19 = vadd.f32 %v1112_v63, %v1075_v6  ;;  %v1131_v2 = vmul.f32 %v4835_v51, %v4768_v59  ;;  %v1110_v4 = vmul.f32 %v4800_v50, %v4723_v58 }
 0x10f   : > { %v1111_v5 = vmul.f32 %v4800_v50, %v4701_v43  ;;  %v1150_v13 = vmul.f32 %v4812_v57, %v4701_v43  ;;  %v1001_v62 = vadd.f32 %v993_v52, %v982_v40  ;;  %v1073_v10 = vadd.f32 %v1043_v46, %v998_v42 }
 0x110   : > { %v496_v25 = vpop.f32.mrf.mxu0  ;;  %v1074_v12 = vadd.f32 %v1046_v54, %v999_v44  ;;  %v4850_v17 = vpack.c.bf16 %v4686_v37, %v4678_v32  ;;  %v1052_v63 = vsel %vm903_vm2, %v1050_v47, %v1051_v11  ;;  %v1139_v59 = vadd.f32 %v1131_v2, %v1120_v19 }
 0x111   : > { %v709_v0 = vld [vmem:[#allocation2 + $0x70] ss:$2 sm:$0xff]  ;;  %v758_v20 = vld [vmem:[#allocation2 + $0x71] ss:$2 sm:$0xff]  ;;  %v601_v24 = vpop.f32.mrf.mxu1  ;;  %v1148_v26 = vmul.f32 %v4812_v57, %v4723_v58  ;;  %v1149_v43 = vmul.f32 %v4812_v57, %v1092_v3  ;;  %v1118_v14 = vadd.f32 %v1110_v4, %v1073_v10  ;;  %v1183_v6 = vrot.slane %v1150_v13, 1 }
 0x112   : > { %734 = vst.msk [vmem:[#allocation3 + $0x40] sm:$0xff] %vm398_vm0, %v709_v0  ;;  %v1119_v36 = vadd.f32 %v1111_v5, %v1074_v12  ;;  %v1076_v40 = vadd.f32 %v1052_v63, %v1001_v62  ;;  %v636_v46 = vpop.f32.mrf.mxu2  ;;  %v1184_v47 = vrot.slane %v1151_v18, 1  ;;  %v1129_v4 = vmul.f32 %v4835_v51, %v4752_v29 }
 0x113   : > { %783 = vst.msk [vmem:[#allocation4 + $0x81] sm:$0xff] %vm398_vm0, %v758_v20  ;;  %1998 = vrot.lane.b32.xlu2 %v4824_v30, %s4459_s23  ;;  %v1188_v20 = vsel %vm903_vm2, %v1186_v53, %v1187_v56  ;;  %v723_v11 = vld [vmem:[#allocation2 + $0xe0] ss:$2 sm:$0xff]  ;;  %v772_v19 = vld [vmem:[#allocation2 + $0xe1] ss:$2 sm:$0xff]  ;;  %v1180_v61 = vrot.slane %v1148_v26, 1 }
 0x114   : > { %657 = vst.msk [vmem:[#allocation2 + $0x80] sm:$0xff] %vm398_vm0, %v601_v24  ;;  %v1214_v15 = vadd.f32 %v1188_v20, %v1139_v59  ;;  %v1181_v2 = vrot.slane %v1149_v43, 1  ;;  %v1185_v13 = vsel %vm903_vm2, %v1183_v6, %v1184_v47  ;;  %v1137_v18 = vadd.f32 %v1129_v4, %v1118_v14 }
 0x115   : > { %671 = vst.msk [vmem:[#allocation2 + $0xf0] sm:$0xff] %vm398_vm0, %v636_v46  ;;  %v4926_v4 = vpack.c.bf16 %v4699_v41, %v4682_v35 }
 0x116   : > { %741 = vst.msk [vmem:[#allocation3 + $0x78] sm:$0xff] %vm398_vm0, %v723_v11  ;;  %v1222_v59 = vpack.c.bf16 %v1214_v15, %v1214_v15  ;;  %v1182_v20 = vsel %vm903_vm2, %v1180_v61, %v1181_v2 }
 0x117   : > { %790 = vst.msk [vmem:[#allocation4 + $0xf1] sm:$0xff] %vm398_vm0, %v772_v19 }
 0x118   : > { %v498_v24 = vpop.f32.mrf.mxu0  ;;  %v1254_v43 = vunpack.c.l.b16 %v1222_v59 }
 0x119   : > { %v603_v0 = vpop.f32.mrf.mxu1  ;;  %v4859_v33 = vld [vmem:[#allocation3 + $0x40] sm:$0xff]  ;;  %v4863_v34 = vpack.c.bf16 %v498_v24, %v496_v25  ;;  %v1130_v25 = vmul.f32 %v4835_v51, %v4725_v60 }
 0x11a   : > { %658 = vst.msk [vmem:[#allocation2 + $0x88] sm:$0xff] %vm398_vm0, %v603_v0  ;;  %v4861_v32 = vld [vmem:[#allocation4 + $0x80] sm:$0xff]  ;;  %v1098_v37 = vld [vmem:[#allocation4 + $0x88] sm:$0x1]  ;;  %v1132_v52 = vmul.f32 %v4835_v51, %v4859_v33  ;;  %v638_v29 = vpop.f32.mrf.mxu2 }
 0x11b   : > { %v1113_v42 = vmul.f32 %v4800_v50, %v4861_v32  ;;  %v1154_v58 = vmul.f32 %v4812_v57, %v4861_v32  ;;  %v1155_v44 = vmul.f32 %v4812_v57, %v1098_v37  ;;  %2002 = vrot.lane.b32.xlu2 %v4850_v17, %s4459_s23  ;;  %1988 = vrot.lane.b32.xlu0 %v4863_v34, %s4459_s23 }
 0x11c   : > { %v1138_v5 = vadd.f32 %v1130_v25, %v1119_v36  ;;  %v1212_v36 = vadd.f32 %v1182_v20, %v1137_v18  ;;  %672 = vst.msk [vmem:[#allocation2 + $0xf8] sm:$0xff] %vm398_vm0, %v638_v29  ;;  %v856_v18 = vmul.f32 %v4712_v49, %v4859_v33  ;;  %v4943_v33 = vpack.c.bf16 %v4672_v28, %v4666_v23 }
 0x11d   : > { %v1121_v54 = vadd.f32 %v1113_v42, %v1076_v40  ;;  %v1189_v53 = vrot.slane %v1154_v58, 1  ;;  %v1190_v56 = vrot.slane %v1155_v44, 1 }
 0x11e   : > { %v1213_v26 = vadd.f32 %v1185_v13, %v1138_v5  ;;  %v1220_v42 = vpack.c.bf16 %v1212_v36, %v1212_v36 }
 0x11f   : > { %v1140_v60 = vadd.f32 %v1132_v52, %v1121_v54  ;;  %v1191_v3 = vsel %vm903_vm2, %v1189_v53, %v1190_v56  ;;  %v4910_v53 = vpack.c.bf16 %v4649_v9, %v4642_v7  ;;  %v879_v7 = vmul.f32 %v4697_v39, %v4861_v32 }
 0x120   : > { %v4885_v0 = vpop.f32.mrf.mxu0  ;;  %v1221_v14 = vpack.c.bf16 %v1213_v26, %v1213_v26  ;;  %v1252_v25 = vunpack.c.l.b16 %v1220_v42 }
 0x121   : > { %v711_v62 = vld [vmem:[#allocation2 + $0x80] ss:$2 sm:$0xff]  ;;  %v760_v10 = vld [vmem:[#allocation2 + $0x81] ss:$2 sm:$0xff]  ;;  %v606_v12 = vpop.f32.mrf.mxu1  ;;  %v1215_v63 = vadd.f32 %v1191_v3, %v1140_v60  ;;  %v823_v60 = vld [vmem:[#allocation4 + $0x88] sm:$0x1]  ;;  %v837_v3 = vmul.f32 %v4692_v38, %v4861_v32 }
 0x122   : > { %735 = vst.msk [vmem:[#allocation3 + $0x48] sm:$0xff] %vm398_vm0, %v711_v62  ;;  %v1253_v44 = vunpack.c.l.b16 %v1221_v14  ;;  %v880_v9 = vmul.f32 %v4697_v39, %v823_v60  ;;  %v4954_v60 = vld [vmem:[#allocation4 + $0xe0] sm:$0xff] }
 0x123   : > { %784 = vst.msk [vmem:[#allocation4 + $0x91] sm:$0xff] %vm398_vm0, %v760_v10  ;;  %v1223_v24 = vpack.c.bf16 %v1215_v63, %v1215_v63  ;;  %v725_v46 = vld [vmem:[#allocation2 + $0xf0] ss:$2 sm:$0xff]  ;;  %v774_v15 = vld [vmem:[#allocation2 + $0xf1] ss:$2 sm:$0xff]  ;;  %v845_v5 = vadd.f32 %v4707_v48, %v837_v3  ;;  %v916_v63 = vrot.slane %v879_v7, 1 }
 0x124   : > { %659 = vst.msk [vmem:[#allocation2 + $0x90] sm:$0xff] %vm398_vm0, %v606_v12  ;;  %v4901_v47 = vpack.c.b16 %v1253_v44, %v1252_v25  ;;  %v917_v59 = vrot.slane %v880_v9, 1  ;;  %v829_v9 = vld [vmem:[#allocation4 + $0xe8] sm:$0x1] }
 0x125   : > { %v1255_v37 = vunpack.c.l.b16 %v1223_v24  ;;  %742 = vst.msk [vmem:[#allocation3 + $0x80] sm:$0xff] %vm398_vm0, %v725_v46  ;;  %v864_v20 = vadd.f32 %v856_v18, %v845_v5 }
 0x126   : > { %791 = vst.msk [vmem:[#allocation4 + $0x101] sm:$0xff] %vm398_vm0, %v774_v15  ;;  %v918_v29 = vsel %vm903_vm2, %v916_v63, %v917_v59  ;;  %v840_v63 = vmul.f32 %v4692_v38, %v4954_v60  ;;  %v885_v59 = vmul.f32 %v4697_v39, %v4954_v60 }
 0x127   : > { %v4892_v6 = vpack.c.b16 %v1255_v37, %v1254_v43  ;;  %v940_v44 = vadd.f32 %v918_v29, %v864_v20  ;;  %v4970_v20 = vld [vmem:[#allocation3 + $0x70] sm:$0xff] }
 0x128   : > { %v4896_v58 = vpop.f32.mrf.mxu0 }
 0x129   : > { %2006 = vrot.lane.b32.xlu1 %v4892_v6, %s4459_s23  ;;  %v608_v40 = vpop.f32.mrf.mxu1  ;;  %v4966_v18 = vpack.c.bf16 %v4896_v58, %v4885_v0 }
 0x12a   : > { %660 = vst.msk [vmem:[#allocation2 + $0x98] sm:$0xff] %vm398_vm0, %v608_v40  ;;  %v960_v41 = vld [vmem:[#allocation4 + $0x90] sm:$0xff]  ;;  %v961_v24 = vld [vmem:[#allocation4 + $0x98] sm:$0x1] }
 0x12b   : > { %v975_v36 = vmul.f32 %v4744_v21, %v960_v41  ;;  %v1017_v14 = vmul.f32 %v4750_v27, %v960_v41  ;;  %v1018_v40 = vmul.f32 %v4750_v27, %v961_v24  ;;  %v886_v24 = vmul.f32 %v4697_v39, %v829_v9 }
 0x130   : > { %v506_v52 = vpop.f32.mrf.mxu0 }
 0x131   : > { %v713_v11 = vld [vmem:[#allocation2 + $0x90] ss:$2 sm:$0xff]  ;;  %v762_v19 = vld [vmem:[#allocation2 + $0x91] ss:$2 sm:$0xff]  ;;  %2004 = vrot.lane.b32.xlu1 %v4901_v47, %s4459_s23  ;;  %v611_v54 = vpop.f32.mrf.mxu1 }
 0x132   : > { %736 = vst.msk [vmem:[#allocation3 + $0x50] sm:$0xff] %vm398_vm0, %v713_v11  ;;  %v948_v11 = vld [vmem:[#allocation3 + $0x48] sm:$0xff] }
 0x133   : > { %785 = vst.msk [vmem:[#allocation4 + $0xa1] sm:$0xff] %vm398_vm0, %v762_v19  ;;  %v994_v7 = vmul.f32 %v4781_v8, %v948_v11 }
 0x134   : > { %661 = vst.msk [vmem:[#allocation2 + $0xa0] sm:$0xff] %vm398_vm0, %v611_v54  ;;  %v983_v54 = vadd.f32 %v975_v36, %v940_v44 }
 0x138   : > { %v508_v61 = vpop.f32.mrf.mxu0 }
 0x139   : > { %1978 = vrot.lane.b32.xlu1 %v4910_v53, %s4459_s23  ;;  %v613_v56 = vpop.f32.mrf.mxu1  ;;  %v4915_v2 = vpack.c.bf16 %v508_v61, %v506_v52  ;;  %v811_v42 = vld [vmem:[#allocation3 + $0x50] sm:$0xff]  ;;  %v1054_v61 = vrot.slane %v1018_v40, 1 }
 0x13a   : > { %662 = vst.msk [vmem:[#allocation2 + $0xa8] sm:$0xff] %vm398_vm0, %v613_v56  ;;  %v824_v32 = vld [vmem:[#allocation4 + $0xa0] sm:$0xff]  ;;  %v825_v35 = vld [vmem:[#allocation4 + $0xa8] sm:$0x1]  ;;  %v857_v52 = vmul.f32 %v4712_v49, %v811_v42  ;;  %v1053_v56 = vrot.slane %v1017_v14, 1 }
 0x13b   : > { %1992 = vrot.lane.b32.xlu2 %v4915_v2, %s4459_s23  ;;  %v838_v26 = vmul.f32 %v4692_v38, %v824_v32  ;;  %v881_v43 = vmul.f32 %v4697_v39, %v824_v32  ;;  %v882_v37 = vmul.f32 %v4697_v39, %v825_v35  ;;  %v1156_v14 = vmul.f32 %v4812_v57, %v824_v32 }
 0x13c   : > { %v1055_v41 = vsel %vm903_vm2, %v1053_v56, %v1054_v61 }
 0x13d   : > { %v846_v25 = vadd.f32 %v4707_v48, %v838_v26  ;;  %v919_v23 = vrot.slane %v881_v43, 1  ;;  %v920_v28 = vrot.slane %v882_v37, 1  ;;  %v1114_v43 = vmul.f32 %v4800_v50, %v824_v32 }
 0x13e   : > { %v1192_v61 = vrot.slane %v1156_v14, 1 }
 0x13f   : > { %v865_v5 = vadd.f32 %v857_v52, %v846_v25  ;;  %v859_v25 = vmul.f32 %v4712_v49, %v4970_v20 }
 0x140   : > { %v511_v12 = vpop.f32.mrf.mxu0 }
 0x141   : > { %v715_v13 = vld [vmem:[#allocation2 + $0xa0] ss:$2 sm:$0xff]  ;;  %v764_v62 = vld [vmem:[#allocation2 + $0xa1] ss:$2 sm:$0xff]  ;;  %1984 = vrot.lane.b32.xlu1 %v4926_v4, %s4459_s23  ;;  %v616_v10 = vpop.f32.mrf.mxu1 }
 0x142   : > { %737 = vst.msk [vmem:[#allocation3 + $0x58] sm:$0xff] %vm398_vm0, %v715_v13 }
 0x143   : > { %786 = vst.msk [vmem:[#allocation4 + $0xb1] sm:$0xff] %vm398_vm0, %v764_v62  ;;  %v921_v62 = vsel %vm903_vm2, %v919_v23, %v920_v28  ;;  %v925_v23 = vrot.slane %v885_v59, 1  ;;  %v926_v28 = vrot.slane %v886_v24, 1 }
 0x144   : > { %663 = vst.msk [vmem:[#allocation2 + $0xb0] sm:$0xff] %vm398_vm0, %v616_v10  ;;  %v1002_v10 = vadd.f32 %v994_v7, %v983_v54  ;;  %v941_v58 = vadd.f32 %v921_v62, %v865_v5  ;;  %v1133_v7 = vmul.f32 %v4835_v51, %v811_v42  ;;  %v966_v62 = vld [vmem:[#allocation4 + $0xf0] sm:$0xff] }
 0x145   : > { %v978_v42 = vmul.f32 %v4744_v21, %v966_v62 }
 0x148   : > { %v513_v15 = vpop.f32.mrf.mxu0 }
 0x149   : > { %2000 = vrot.lane.b32.xlu1 %v4943_v33, %s4459_s23  ;;  %v618_v46 = vpop.f32.mrf.mxu1  ;;  %v4951_v19 = vpack.c.bf16 %v513_v15, %v511_v12  ;;  %v1100_v12 = vld [vmem:[#allocation4 + $0xa8] sm:$0x1]  ;;  %v848_v15 = vadd.f32 %v4707_v48, %v840_v63 }
 0x14a   : > { %664 = vst.msk [vmem:[#allocation2 + $0xb8] sm:$0xff] %vm398_vm0, %v618_v46  ;;  %v962_v3 = vld [vmem:[#allocation4 + $0xb0] sm:$0xff]  ;;  %v963_v13 = vld [vmem:[#allocation4 + $0xb8] sm:$0x1]  ;;  %v1157_v40 = vmul.f32 %v4812_v57, %v1100_v12  ;;  %v949_v44 = vld [vmem:[#allocation3 + $0x58] sm:$0xff]  ;;  %v1077_v46 = vadd.f32 %v1055_v41, %v1002_v10 }
 0x14b   : > { %1994 = vrot.lane.b32.xlu0 %v4951_v19, %s4459_s23  ;;  %v976_v35 = vmul.f32 %v4744_v21, %v962_v3  ;;  %v1019_v26 = vmul.f32 %v4750_v27, %v962_v3  ;;  %v1020_v29 = vmul.f32 %v4750_v27, %v963_v13  ;;  %v995_v56 = vmul.f32 %v4781_v8, %v949_v44  ;;  %v967_v10 = vld [vmem:[#allocation4 + $0xf8] sm:$0x1] }
 0x14c   : > { %v1122_v52 = vadd.f32 %v1114_v43, %v1077_v46  ;;  %v1193_v3 = vrot.slane %v1157_v40, 1  ;;  %v867_v9 = vadd.f32 %v859_v25, %v848_v15  ;;  %v927_v13 = vsel %vm903_vm2, %v925_v23, %v926_v28  ;;  %v951_v40 = vld [vmem:[#allocation3 + $0x78] sm:$0xff] }
 0x14d   : > { %v984_v11 = vadd.f32 %v976_v35, %v941_v58  ;;  %v1056_v54 = vrot.slane %v1019_v26, 1  ;;  %v1057_v32 = vrot.slane %v1020_v29, 1  ;;  %v1023_v43 = vmul.f32 %v4750_v27, %v966_v62 }
 0x14e   : > { %v1141_v63 = vadd.f32 %v1133_v7, %v1122_v52  ;;  %v1194_v35 = vsel %vm903_vm2, %v1192_v61, %v1193_v3  ;;  %v943_v29 = vadd.f32 %v927_v13, %v867_v9 }
 0x14f   : > { %v1003_v5 = vadd.f32 %v995_v56, %v984_v11  ;;  %v1058_v12 = vsel %vm903_vm2, %v1056_v54, %v1057_v32  ;;  %v997_v54 = vmul.f32 %v4781_v8, %v951_v40  ;;  %v1062_v32 = vrot.slane %v1023_v43, 1  ;;  %v1106_v43 = vld [vmem:[#allocation4 + $0x108] sm:$0x1] }
 0x150   : > { %v1216_v44 = vadd.f32 %v1194_v35, %v1141_v63  ;;  %v986_v28 = vadd.f32 %v978_v42, %v943_v29 }
 0x151   : > { %v717_v37 = vld [vmem:[#allocation2 + $0xb0] ss:$2 sm:$0xff]  ;;  %v766_v36 = vld [vmem:[#allocation2 + $0xb1] ss:$2 sm:$0xff]  ;;  %1990 = vrot.lane.b32.xlu1 %v4966_v18, %s4459_s23  ;;  %v621_v0 = vpop.f32.mrf.mxu1 }
 0x152   : > { %738 = vst.msk [vmem:[#allocation3 + $0x60] sm:$0xff] %vm398_vm0, %v717_v37  ;;  %v1024_v37 = vmul.f32 %v4750_v27, %v967_v10  ;;  %v1224_v10 = vpack.c.bf16 %v1216_v44, %v1216_v44  ;;  %v1163_v44 = vmul.f32 %v4812_v57, %v1106_v43 }
 0x153   : > { %787 = vst.msk [vmem:[#allocation4 + $0xc1] sm:$0xff] %vm398_vm0, %v766_v36  ;;  %v1078_v36 = vadd.f32 %v1058_v12, %v1003_v5  ;;  %v1005_v12 = vadd.f32 %v997_v54, %v986_v28 }
 0x154   : > { %665 = vst.msk [vmem:[#allocation2 + $0xc0] sm:$0xff] %vm398_vm0, %v621_v0  ;;  %v1063_v3 = vrot.slane %v1024_v37, 1 }
 0x156   : > { %v1064_v35 = vsel %vm903_vm2, %v1062_v32, %v1063_v3  ;;  %v1104_v32 = vld [vmem:[#allocation4 + $0xe8] sm:$0x1] }
 0x157   : > { %v1080_v37 = vadd.f32 %v1064_v35, %v1005_v12 }
 0x159   : > { %v623_v59 = vpop.f32.mrf.mxu1  ;;  %v1087_v41 = vld [vmem:[#allocation3 + $0x60] sm:$0xff] }
 0x15a   : > { %666 = vst.msk [vmem:[#allocation2 + $0xc8] sm:$0xff] %vm398_vm0, %v623_v59  ;;  %v1101_v24 = vld [vmem:[#allocation4 + $0xc0] sm:$0xff]  ;;  %v1102_v26 = vld [vmem:[#allocation4 + $0xc8] sm:$0x1]  ;;  %v1134_v15 = vmul.f32 %v4835_v51, %v1087_v41 }
 0x15b   : > { %v1115_v0 = vmul.f32 %v4800_v50, %v1101_v24  ;;  %v1158_v58 = vmul.f32 %v4812_v57, %v1101_v24  ;;  %v1159_v14 = vmul.f32 %v4812_v57, %v1102_v26  ;;  %v827_v23 = vld [vmem:[#allocation4 + $0xc8] sm:$0x1]  ;;  %v839_v61 = vmul.f32 %v4692_v38, %v1101_v24  ;;  %v1105_v38 = vld [vmem:[#allocation4 + $0x100] sm:$0xff] }
 0x15c   : > { %v883_v7 = vmul.f32 %v4697_v39, %v1101_v24  ;;  %v884_v9 = vmul.f32 %v4697_v39, %v827_v23  ;;  %v1256_v24 = vunpack.c.l.b16 %v1224_v10  ;;  %v858_v39 = vmul.f32 %v4712_v49, %v1087_v41 }
 0x15d   : > { %v1123_v46 = vadd.f32 %v1115_v0, %v1078_v36  ;;  %v1195_v25 = vrot.slane %v1158_v58, 1  ;;  %v1196_v11 = vrot.slane %v1159_v14, 1  ;;  %v847_v59 = vadd.f32 %v4707_v48, %v839_v61  ;;  %v1089_v14 = vld [vmem:[#allocation3 + $0x80] sm:$0xff] }
 0x15e   : > { %v922_v26 = vrot.slane %v883_v7, 1  ;;  %v923_v29 = vrot.slane %v884_v9, 1  ;;  %v1117_v36 = vmul.f32 %v4800_v50, %v1105_v38  ;;  %v1162_v48 = vmul.f32 %v4812_v57, %v1105_v38 }
 0x15f   : > { %v1142_v52 = vadd.f32 %v1134_v15, %v1123_v46  ;;  %v1197_v56 = vsel %vm903_vm2, %v1195_v25, %v1196_v11  ;;  %v866_v58 = vadd.f32 %v858_v39, %v847_v59  ;;  %v1136_v49 = vmul.f32 %v4835_v51, %v1089_v14 }
 0x160   : > { %v924_v40 = vsel %vm903_vm2, %v922_v26, %v923_v29  ;;  %v1125_v11 = vadd.f32 %v1117_v36, %v1080_v37  ;;  %v1135_v38 = vmul.f32 %v4835_v51, %v4970_v20  ;;  %v1314_v20 = vsel %vm1264_vm3, %v4901_v47, 0 }
 0x161   : > { %v719_v5 = vld [vmem:[#allocation2 + $0xc0] ss:$2 sm:$0xff]  ;;  %v768_v13 = vld [vmem:[#allocation2 + $0xc1] ss:$2 sm:$0xff]  ;;  %v1217_v62 = vadd.f32 %v1197_v56, %v1142_v52  ;;  %v942_v41 = vadd.f32 %v924_v40, %v866_v58  ;;  %v1201_v52 = vrot.slane %v1162_v48, 1  ;;  %v1202_v56 = vrot.slane %v1163_v44, 1  ;;  %v1977_v58 = vpop.permute.xlu0 %1976  ;;  %v516_v40 = vpop.f32.mrf.mxu0 }
 0x162   : > { %739 = vst.msk [vmem:[#allocation3 + $0x68] sm:$0xff] %vm398_vm0, %v719_v5  ;;  %v1160_v5 = vmul.f32 %v4812_v57, %v4954_v60  ;;  %v1144_v10 = vadd.f32 %v1136_v49, %v1125_v11 }
 0x163   : > { %788 = vst.msk [vmem:[#allocation4 + $0xd1] sm:$0xff] %vm398_vm0, %v768_v13  ;;  %v1225_v63 = vpack.c.bf16 %v1217_v62, %v1217_v62  ;;  %v1161_v13 = vmul.f32 %v4812_v57, %v1104_v32  ;;  %v1203_v12 = vsel %vm903_vm2, %v1201_v52, %v1202_v56 }
 0x164   : > { %v1198_v59 = vrot.slane %v1160_v5, 1  ;;  %v1219_v26 = vadd.f32 %v1203_v12, %v1144_v10 }
 0x165   : > { %v1257_v42 = vunpack.c.l.b16 %v1225_v63  ;;  %v1116_v63 = vmul.f32 %v4800_v50, %v4954_v60  ;;  %v1199_v35 = vrot.slane %v1161_v13, 1  ;;  %v1317_v60 = vsel %vm1264_vm3, %v4892_v6, 0 }
 0x167   : > { %v1262_v0 = vpack.c.b16 %v1257_v42, %v1256_v24  ;;  %v1200_v57 = vsel %vm903_vm2, %v1198_v59, %v1199_v35  ;;  %v1227_v42 = vpack.c.bf16 %v1219_v26, %v1219_v26 }
 0x169   : > { %2008 = vrot.lane.b32.xlu0 %v1262_v0, %s4459_s23  ;;  %v950_v46 = vld [vmem:[#allocation3 + $0x68] sm:$0xff]  ;;  %v1259_v37 = vunpack.c.l.b16 %v1227_v42  ;;  %v1320_v51 = vsel %vm1264_vm3, %v1262_v0, 0  ;;  %v5046_v14 = vpop.permute.xlu0 %1982 }
 0x16a   : > { %v964_v15 = vld [vmem:[#allocation4 + $0xd0] sm:$0xff]  ;;  %v965_v25 = vld [vmem:[#allocation4 + $0xd8] sm:$0x1]  ;;  %v996_v3 = vmul.f32 %v4781_v8, %v950_v46 }
 0x16b   : > { %v977_v23 = vmul.f32 %v4744_v21, %v964_v15  ;;  %v1021_v28 = vmul.f32 %v4750_v27, %v964_v15  ;;  %v1022_v54 = vmul.f32 %v4750_v27, %v965_v25  ;;  %v1973_v15 = vpop.permute.xlu2 %1972 }
 0x16d   : > { %v985_v61 = vadd.f32 %v977_v23, %v942_v41  ;;  %v1059_v7 = vrot.slane %v1021_v28, 1  ;;  %v1060_v9 = vrot.slane %v1022_v54, 1 }
 0x16f   : > { %v1004_v62 = vadd.f32 %v996_v3, %v985_v61  ;;  %v1061_v21 = vsel %vm903_vm2, %v1059_v7, %v1060_v9 }
 0x171   : > { %v1079_v27 = vadd.f32 %v1061_v21, %v1004_v62 }
 0x173   : > { %v1124_v8 = vadd.f32 %v1116_v63, %v1079_v27  ;;  %v1975_v25 = vpop.permute.xlu2 %1974 }
 0x175   : > { %v1143_v29 = vadd.f32 %v1135_v38, %v1124_v8 }
 0x177   : > { %v1218_v24 = vadd.f32 %v1200_v57, %v1143_v29 }
 0x179   : > { %v1226_v39 = vpack.c.bf16 %v1218_v24, %v1218_v24 }
 0x17b   : > { %v1258_v43 = vunpack.c.l.b16 %v1226_v39  ;;  %v1981_v61 = vpop.permute.xlu2 %1980 }
 0x17d   : > { %v1263_v36 = vpack.c.b16 %v1259_v37, %v1258_v43 }
 0x17f   : > { %4097 = vmatpush.bf16.msra.mxu3 %v1263_v36  ;;  %2010 = vrot.lane.b32.xlu0 %v1263_v36, %s4459_s23  ;;  %v1323_v50 = vsel %vm1264_vm3, %v1263_v36, 0 }
 0x180   : > { %1329 = vmatpush.bf16.xpose.msra.mxu2 %v1323_v50 }
 0x183   : > { %4098 = vmatpush.bf16.msra.mxu3 %v1262_v0  ;;  %v1987_v27 = vpop.permute.xlu2 %1986 }
 0x187   : > { %4099 = vmatpush.bf16.msra.mxu3 %v4892_v6 }
 0x188   : > { %1330 = vmatpush.bf16.xpose.msra.mxu2 %v1320_v51 }
 0x18b   : > { %4100 = vmatpush.bf16.msra.mxu3 %v4901_v47  ;;  %v5134_v35 = vpop.permute.xlu2 %1998 }
 0x190   : > { %1331 = vmatpush.bf16.xpose.msra.mxu2 %v1317_v60 }
 0x193   : > { %v5143_v38 = vpop.permute.xlu2 %2002 }
 0x198   : > { %1332 = vmatpush.bf16.xpose.msra.mxu2 %v1314_v20 }
 0x19b   : > { %v2007_v48 = vpop.permute.xlu1 %2006  ;;  %v1993_v24 = vpop.permute.xlu2 %1992 }
 0x19c   : > { %v2064_v46 = vsel %vm1264_vm3, %v2007_v48, 0 }
 0x19f   : > { %3995 = vmatmul.msk.bf16.vlgmr.msra.gmra.mxu2 %vm1264_vm3, %v4612_v45 }
 0x1a0   : > { %1839 = vmatpush.bf16.msrb.mxu2 %v1263_v36 }
 0x1a4   : > { %1840 = vmatpush.bf16.msrb.mxu2 %v1262_v0  ;;  %v5050_v0 = vpop.permute.xlu0 %1988 }
 0x1a8   : > { %1841 = vmatpush.bf16.msrb.mxu2 %v4892_v6  ;;  %v518_v6 = vpop.f32.mrf.mxu0 }
 0x1ac   : > { %1842 = vmatpush.bf16.msrb.mxu2 %v4901_v47  ;;  %v1240_v47 = vpack.c.bf16 %v518_v6, %v516_v40 }
 0x1ae   : > { %1996 = vrot.lane.b32.xlu1 %v1240_v47, %s4459_s23  ;;  %s4460_s23 = smov 16  }
 0x1af   : > { %3996 = vmatmul.msk.bf16.gmra.mxu2 %vm1264_vm3, %v4623_v55 }
 0x1bd   : > { %v5052_v45 = vpop.permute.xlu0 %1994 }
 0x1bf   : > { %3997 = vmatmul.msk.bf16.gmra.mxu2 %vm1264_vm3, %v4636_v1 }
 0x1cf   : > { %3998 = vmatmul.msk.bf16.gmra.mxu2 %vm1264_vm3, %v4910_v53 }
 0x1db   : > { %v2009_v55 = vpop.permute.xlu0 %2008 }
 0x1dc   : > { %v2067_v44 = vsel %vm1264_vm3, %v2009_v55, 0 }
 0x1df   : > { %3999 = vmatmul.msk.bf16.gmra.mxu2 %vm1264_vm3, %v4663_v22  ;;  %v2005_v22 = vpop.permute.xlu1 %2004 }
 0x1e7   : > { %v1979_v54 = vpop.permute.xlu1 %1978 }
 0x1ef   : > { %4000 = vmatmul.msk.bf16.gmra.mxu2 %vm1264_vm3, %v4675_v31  ;;  %v2061_v31 = vsel %vm1264_vm3, %v2005_v22, 0  ;;  %v1985_v21 = vpop.permute.xlu1 %1984 }
 0x1f1   : > { %v2011_v1 = vpop.permute.xlu0 %2010 }
 0x1f2   : > { %2585 = vmatpush.bf16.msrb.mxu1 %v2011_v1  ;;  %v2070_v53 = vsel %vm1264_vm3, %v2011_v1, 0 }
 0x1f3   : > { %2076 = vmatpush.bf16.xpose.msrb.mxu0 %v2070_v53 }
 0x1f6   : > { %2586 = vmatpush.bf16.msrb.mxu1 %v2009_v55 }
 0x1f7   : > { %v5149_v57 = vpop.permute.xlu1 %2000 }
 0x1fa   : > { %2587 = vmatpush.bf16.msrb.mxu1 %v2007_v48 }
 0x1fb   : > { %2077 = vmatpush.bf16.xpose.msrb.mxu0 %v2067_v44 }
 0x1fe   : > { %2588 = vmatpush.bf16.msrb.mxu1 %v2005_v22 }
 0x1ff   : > { %4001 = vmatmul.msk.bf16.gmra.mxu2 %vm1264_vm3, %v4926_v4  ;;  %v1991_v37 = vpop.permute.xlu1 %1990 }
 0x203   : > { %2078 = vmatpush.bf16.xpose.msrb.mxu0 %v2064_v46 }
 0x20b   : > { %2079 = vmatpush.bf16.xpose.msrb.mxu0 %v2061_v31 }
 0x20f   : > { %4002 = vmatmul.msk.bf16.gmra.mxu2 %vm1264_vm3, %v4785_v16 }
 0x212   : > { %4027 = vmatmul.msk.bf16.vlgmr.msrb.gmra.mxu0 %vm1264_vm3, %v1973_v15 }
 0x21f   : > { %4003 = vmatmul.msk.bf16.gmra.mxu2 %vm1264_vm3, %v4863_v34 }
 0x222   : > { %v5070_v11 = vpop.f32.mrf.mxu2  ;;  %4028 = vmatmul.msk.bf16.gmra.mxu0 %vm1264_vm3, %v1975_v25 }
 0x223   : > { %v1415_v4 = vsel %vm1414_vm4, %v5070_v11, -inf }
 0x224   : > { %1416 = vmax.xlane.f32.xlu2 %v1415_v4 }
 0x22a   : > { %v5075_v49 = vpop.f32.mrf.mxu2 }
 0x22b   : > { %v1418_v16 = vsel %vm1414_vm4, %v5075_v49, -inf }
 0x22c   : > { %1419 = vmax.xlane.f32.xlu2 %v1418_v16 }
 0x22f   : > { %4004 = vmatmul.msk.bf16.gmra.mxu2 %vm1264_vm3, %v4966_v18 }
 0x232   : > { %v5081_v34 = vpop.f32.mrf.mxu2  ;;  %4029 = vmatmul.msk.bf16.gmra.mxu0 %vm1264_vm3, %v1977_v58 }
 0x233   : > { %v1421_v41 = vsel %vm1414_vm4, %v5081_v34, -inf }
 0x234   : > { %1422 = vmax.xlane.f32.xlu1 %v1421_v41 }
 0x23a   : > { %v5086_v23 = vpop.f32.mrf.mxu2 }
 0x23b   : > { %v1424_v28 = vsel %vm1414_vm4, %v5086_v23, -inf }
 0x23c   : > { %1425 = vmax.xlane.f32.xlu0 %v1424_v28 }
 0x23f   : > { %4005 = vmatmul.msk.bf16.gmra.mxu2 %vm1264_vm3, %v4915_v2 }
 0x242   : > { %v5092_v32 = vpop.f32.mrf.mxu2  ;;  %4030 = vmatmul.msk.bf16.gmra.mxu0 %vm1264_vm3, %v1979_v54 }
 0x243   : > { %v1427_v18 = vsel %vm1414_vm4, %v5092_v32, -inf }
 0x244   : > { %1428 = vmax.xlane.f32.xlu2 %v1427_v18 }
 0x24a   : > { %v5097_v52 = vpop.f32.mrf.mxu2 }
 0x24b   : > { %v1430_v56 = vsel %vm1414_vm4, %v5097_v52, -inf }
 0x24c   : > { %1431 = vmax.xlane.f32.xlu0 %v1430_v56 }
 0x24f   : > { %4006 = vmatmul.msk.bf16.gmra.mxu2 %vm1264_vm3, %v4951_v19 }
 0x252   : > { %v5103_v2 = vpop.f32.mrf.mxu2  ;;  %4031 = vmatmul.msk.bf16.gmra.mxu0 %vm1264_vm3, %v1981_v61 }
 0x253   : > { %v1433_v3 = vsel %vm1414_vm4, %v5103_v2, -inf }
 0x254   : > { %1434 = vmax.xlane.f32.xlu1 %v1433_v3 }
 0x25a   : > { %v5108_v7 = vpop.f32.mrf.mxu2 }
 0x25b   : > { %v1436_v9 = vsel %vm1414_vm4, %v5108_v7, -inf }
 0x25c   : > { %1437 = vmax.xlane.f32.xlu0 %v1436_v9 }
 0x25f   : > { %4007 = vmatmul.msk.bf16.gmra.mxu2 %vm1264_vm3, %v1240_v47 }
 0x262   : > { %v5113_v5 = vpop.f32.mrf.mxu2  ;;  %4032 = vmatmul.msk.bf16.gmra.mxu0 %vm1264_vm3, %v5046_v14  ;;  %v5172_v14 = vpop.permute.xlu1 %1996 }
 0x263   : > { %v1439_v19 = vsel %vm1414_vm4, %v5113_v5, -inf }
 0x264   : > { %1440 = vmax.xlane.f32.xlu0 %v1439_v19 }
 0x26a   : > { %v5119_v13 = vpop.f32.mrf.mxu2 }
 0x26b   : > { %v1442_v62 = vsel %vm1414_vm4, %v5119_v13, -inf }
 0x26c   : > { %1443 = vmax.xlane.f32.xlu1 %v1442_v62 }
 0x26f   : > { %4008 = vmatmul.msk.bf16.gmra.mxu2 %vm1264_vm3, %v4824_v30 }
 0x272   : > { %v5125_v10 = vpop.f32.mrf.mxu2  ;;  %4033 = vmatmul.msk.bf16.gmra.mxu0 %vm1264_vm3, %v1985_v21 }
 0x273   : > { %v1445_v12 = vsel %vm1414_vm4, %v5125_v10, -inf }
 0x274   : > { %1446 = vmax.xlane.f32.xlu1 %v1445_v12 }
 0x27a   : > { %v5130_v63 = vpop.f32.mrf.mxu2 }
 0x27b   : > { %v1448_v59 = vsel %vm1414_vm4, %v5130_v63, -inf }
 0x27c   : > { %1449 = vmax.xlane.f32.xlu2 %v1448_v59 }
 0x27f   : > { %4009 = vmatmul.msk.bf16.gmra.mxu2 %vm1264_vm3, %v4943_v33 }
 0x282   : > { %v5138_v30 = vpop.f32.mrf.mxu2  ;;  %4034 = vmatmul.msk.bf16.gmra.mxu0 %vm1264_vm3, %v1987_v27 }
 0x283   : > { %v1451_v8 = vsel %vm1414_vm4, %v5138_v30, -inf }
 0x284   : > { %1452 = vmax.xlane.f32.xlu0 %v1451_v8 }
 0x28a   : > { %v5145_v26 = vpop.f32.mrf.mxu2 }
 0x28b   : > { %v1454_v29 = vsel %vm1414_vm4, %v5145_v26, -inf }
 0x28c   : > { %1455 = vmax.xlane.f32.xlu2 %v1454_v29 }
 0x28f   : > { %4010 = vmatmul.msk.bf16.gmra.mxu2 %vm1264_vm3, %v4850_v17  ;;  %v5153_v33 = vpop.f32.mrf.mxu0 }
 0x290   : > { %v2161_v43 = vsel %vm1414_vm4, %v5153_v33, -inf }
 0x292   : > { %v5155_v42 = vpop.f32.mrf.mxu2  ;;  %4035 = vmatmul.msk.bf16.gmra.mxu0 %vm1264_vm3, %v5050_v0 }
 0x293   : > { %v1457_v39 = vsel %vm1414_vm4, %v5155_v42, -inf }
 0x294   : > { %1458 = vmax.xlane.f32.xlu0 %v1457_v39  ;;  %2162 = vmax.xlane.f32.xlu2 %v2161_v43 }
 0x297   : > { %v1417_v36 = vpop.xlane.xlu2 %1416  ;;  %v5163_v50 = vpop.f32.mrf.mxu0 }
 0x298   : > { %v1511_v17 = vsub.f32 %v5070_v11, %v1417_v36  ;;  %v2164_v58 = vsel %vm1414_vm4, %v5163_v50, -inf }
 0x29a   : > { %v5166_v51 = vpop.f32.mrf.mxu2  ;;  %v1543_v60 = vmul.f32 1.442695, %v1511_v17 }
 0x29b   : > { %v1460_v20 = vsel %vm1414_vm4, %v5166_v51, -inf }
 0x29c   : > { %1461 = vmax.xlane.f32.xlu0 %v1460_v20  ;;  %2165 = vmax.xlane.f32.xlu2 %v2164_v58  ;;  %4126 = vpow2.f32 %v1543_v60 }
 0x29f   : > { %v1420_v0 = vpop.xlane.xlu2 %1419  ;;  %v5174_v40 = vpop.f32.mrf.mxu0 }
 0x2a0   : > { %v1512_v6 = vsub.f32 %v5075_v49, %v1420_v0  ;;  %v2167_v47 = vsel %vm1414_vm4, %v5174_v40, -inf }
 0x2a1   : > { %2168 = vmax.xlane.f32.xlu1 %v2167_v47 }
 0x2a2   : > { %v1545_v55 = vmul.f32 1.442695, %v1512_v6  ;;  %v5179_v1 = vpop.f32.mrf.mxu2  ;;  %4036 = vmatmul.msk.bf16.gmra.mxu0 %vm1264_vm3, %v1991_v37  ;;  %v5184_v48 = vpop.eup %4126 }
 0x2a3   : > { %v1463_v53 = vsel %vm1414_vm4, %v5179_v1, -inf  ;;  %v1607_v15 = vsel %vm1414_vm4, %v5184_v48, 0.0 }
 0x2a4   : > { %4128 = vpow2.f32 %v1545_v55  ;;  %1464 = vmax.xlane.f32.xlu0 %v1463_v53 }
 0x2a7   : > { %v5186_v44 = vpop.f32.mrf.mxu0  ;;  %v1423_v22 = vpop.xlane.xlu1 %1422 }
 0x2a8   : > { %v1513_v46 = vsub.f32 %v5081_v34, %v1423_v22  ;;  %v2170_v31 = vsel %vm1414_vm4, %v5186_v44, -inf }
 0x2a9   : > { %2171 = vmax.xlane.f32.xlu2 %v2170_v31  ;;  %1608 = vadd.xlane.f32.xlu1 %v1607_v15 }
 0x2aa   : > { %v5193_v25 = vpop.eup %4128  ;;  %v5195_v11 = vpop.f32.mrf.mxu2  ;;  %v1547_v4 = vmul.f32 1.442695, %v1513_v46 }
 0x2ab   : > { %v1610_v49 = vsel %vm1414_vm4, %v5193_v25, 0.0  ;;  %v1466_v28 = vsel %vm1414_vm4, %v5195_v11, -inf }
 0x2ac   : > { %1611 = vadd.xlane.f32.xlu0 %v1610_v49  ;;  %4130 = vpow2.f32 %v1547_v4 }
 0x2af   : > { %v1426_v16 = vpop.xlane.xlu0 %1425  ;;  %v5199_v34 = vpop.f32.mrf.mxu0 }
 0x2b0   : > { %v1514_v41 = vsub.f32 %v5086_v23, %v1426_v16  ;;  %v2173_v54 = vsel %vm1414_vm4, %v5199_v34, -inf }
 0x2b1   : > { %1467 = vmax.xlane.f32.xlu2 %v1466_v28  ;;  %2174 = vmax.xlane.f32.xlu1 %v2173_v54 }
 0x2b2   : > { %v5206_v18 = vpop.f32.mrf.mxu2  ;;  %4037 = vmatmul.msk.bf16.gmra.mxu0 %vm1264_vm3, %v1993_v24  ;;  %v1549_v56 = vmul.f32 1.442695, %v1514_v41  ;;  %v5211_v3 = vpop.eup %4130 }
 0x2b3   : > { %v1469_v61 = vsel %vm1414_vm4, %v5206_v18, -inf  ;;  %v1613_v21 = vsel %vm1414_vm4, %v5211_v3, 0.0 }
 0x2b4   : > { %1470 = vmax.xlane.f32.xlu0 %v1469_v61  ;;  %4132 = vpow2.f32 %v1549_v56 }
 0x2b7   : > { %v1429_v23 = vpop.xlane.xlu2 %1428  ;;  %v5213_v9 = vpop.f32.mrf.mxu0 }
 0x2b8   : > { %v1515_v19 = vsub.f32 %v5092_v32, %v1429_v23  ;;  %v2176_v62 = vsel %vm1414_vm4, %v5213_v9, -inf }
 0x2b9   : > { %2177 = vmax.xlane.f32.xlu2 %v2176_v62  ;;  %1614 = vadd.xlane.f32.xlu1 %v1613_v21 }
 0x2ba   : > { %v5220_v12 = vpop.f32.mrf.mxu2  ;;  %v1551_v27 = vmul.f32 1.442695, %v1515_v19  ;;  %v5222_v59 = vpop.eup %4132 }
 0x2bb   : > { %v1616_v32 = vsel %vm1414_vm4, %v5222_v59, 0.0  ;;  %v1472_v39 = vsel %vm1414_vm4, %v5220_v12, -inf }
 0x2bc   : > { %4134 = vpow2.f32 %v1551_v27 }
 0x2bf   : > { %v1432_v8 = vpop.xlane.xlu0 %1431  ;;  %v5224_v29 = vpop.f32.mrf.mxu0 }
 0x2c0   : > { %v1516_v24 = vsub.f32 %v5097_v52, %v1432_v8 }
 0x2c1   : > { %1617 = vadd.xlane.f32.xlu2 %v1616_v32  ;;  %1473 = vmax.xlane.f32.xlu1 %v1472_v39 }
 0x2c2   : > { %v5231_v43 = vpop.f32.mrf.mxu2  ;;  %4038 = vmatmul.msk.bf16.gmra.mxu0 %vm1264_vm3, %v5052_v45  ;;  %v1553_v37 = vmul.f32 1.442695, %v1516_v24  ;;  %v5235_v36 = vpop.eup %4134  ;;  %v2179_v45 = vsel %vm1414_vm4, %v5224_v29, -inf }
 0x2c3   : > { %v1619_v20 = vsel %vm1414_vm4, %v5235_v36, 0.0  ;;  %v1475_v31 = vsel %vm1414_vm4, %v5231_v43, -inf }
 0x2c4   : > { %4136 = vpow2.f32 %v1553_v37 }
 0x2c7   : > { %v5237_v17 = vpop.f32.mrf.mxu0  ;;  %v1435_v52 = vpop.xlane.xlu1 %1434 }
 0x2c8   : > { %v1517_v60 = vsub.f32 %v5103_v2, %v1435_v52  ;;  %v2182_v58 = vsel %vm1414_vm4, %v5237_v17, -inf }
 0x2c9   : > { %1620 = vadd.xlane.f32.xlu2 %v1619_v20  ;;  %2183 = vmax.xlane.f32.xlu0 %v2182_v58 }
 0x2ca   : > { %2180 = vmax.xlane.f32.xlu1 %v2179_v45  ;;  %v5246_v0 = vpop.f32.mrf.mxu2  ;;  %v1555_v6 = vmul.f32 1.442695, %v1517_v60  ;;  %v5248_v47 = vpop.eup %4136 }
 0x2cb   : > { %v1478_v22 = vsel %vm1414_vm4, %v5246_v0, -inf  ;;  %v1622_v46 = vsel %vm1414_vm4, %v5248_v47, 0.0 }
 0x2cc   : > { %4138 = vpow2.f32 %v1555_v6 }
 0x2cf   : > { %v1438_v55 = vpop.xlane.xlu0 %1437  ;;  %v5250_v2 = vpop.f32.mrf.mxu0 }
 0x2d0   : > { %v1518_v53 = vsub.f32 %v5108_v7, %v1438_v55  ;;  %v2185_v16 = vsel %vm1414_vm4, %v5250_v2, -inf }
 0x2d1   : > { %1479 = vmax.xlane.f32.xlu2 %v1478_v22  ;;  %1623 = vadd.xlane.f32.xlu0 %v1622_v46 }
 0x2d2   : > { %v1557_v15 = vmul.f32 1.442695, %v1518_v53  ;;  %1476 = vmax.xlane.f32.xlu1 %v1475_v31  ;;  %v5259_v4 = vpop.f32.mrf.mxu2  ;;  %4039 = vmatmul.msk.bf16.gmra.mxu0 %vm1264_vm3, %v5172_v14  ;;  %v5263_v7 = vpop.eup %4138 }
 0x2d3   : > { %v1625_v41 = vsel %vm1414_vm4, %v5263_v7, 0.0  ;;  %v1481_v21 = vsel %vm1414_vm4, %v5259_v4, -inf }
 0x2d4   : > { %4140 = vpow2.f32 %v1557_v15 }
 0x2d7   : > { %v5265_v49 = vpop.f32.mrf.mxu0  ;;  %v1441_v56 = vpop.xlane.xlu0 %1440 }
 0x2d8   : > { %v1519_v61 = vsub.f32 %v5113_v5, %v1441_v56  ;;  %v2188_v27 = vsel %vm1414_vm4, %v5265_v49, -inf }
 0x2d9   : > { %2186 = vmax.xlane.f32.xlu2 %v2185_v16  ;;  %1626 = vadd.xlane.f32.xlu0 %v1625_v41 }
 0x2da   : > { %v5271_v28 = vpop.eup %4140  ;;  %v5273_v54 = vpop.f32.mrf.mxu2  ;;  %v1559_v5 = vmul.f32 1.442695, %v1519_v61 }
 0x2db   : > { %v1628_v14 = vsel %vm1414_vm4, %v5271_v28, 0.0  ;;  %v1484_v52 = vsel %vm1414_vm4, %v5273_v54, -inf }
 0x2dc   : > { %1629 = vadd.xlane.f32.xlu1 %v1628_v14 }
 0x2df   : > { %v5278_v23 = vpop.f32.mrf.mxu0  ;;  %v1444_v19 = vpop.xlane.xlu1 %1443 }
 0x2e0   : > { %v1520_v62 = vsub.f32 %v5119_v13, %v1444_v19  ;;  %v2191_v32 = vsel %vm1414_vm4, %v5278_v23, -inf }
 0x2e1   : > { %1482 = vmax.xlane.f32.xlu2 %v1481_v21  ;;  %2189 = vmax.xlane.f32.xlu0 %v2188_v27 }
 0x2e2   : > { %v1561_v8 = vmul.f32 1.442695, %v1520_v62  ;;  %v5285_v24 = vpop.f32.mrf.mxu2  ;;  %4040 = vmatmul.msk.bf16.gmra.mxu0 %vm1264_vm3, %v5134_v35 }
 0x2e3   : > { %v1487_v56 = vsel %vm1414_vm4, %v5285_v24, -inf }
 0x2e4   : > { %4142 = vpow2.f32 %v1561_v8  ;;  %2192 = vmax.xlane.f32.xlu1 %v2191_v32 }
 0x2e5   : > { %4144 = vpow2.f32 %v1559_v5 }
 0x2e7   : > { %v5291_v13 = vpop.f32.mrf.mxu0  ;;  %v1447_v39 = vpop.xlane.xlu1 %1446 }
 0x2e8   : > { %v1521_v37 = vsub.f32 %v5125_v10, %v1447_v39  ;;  %v2194_v8 = vsel %vm1414_vm4, %v5291_v13, -inf }
 0x2e9   : > { %1485 = vmax.xlane.f32.xlu0 %v1484_v52 }
 0x2ea   : > { %v5296_v60 = vpop.eup %4142  ;;  %v1563_v20 = vmul.f32 1.442695, %v1521_v37  ;;  %v5298_v35 = vpop.f32.mrf.mxu2 }
 0x2eb   : > { %v1634_v58 = vsel %vm1414_vm4, %v5296_v60, 0.0  ;;  %v1490_v45 = vsel %vm1414_vm4, %v5298_v35, -inf  ;;  %v5304_v6 = vpop.eup %4144 }
 0x2ec   : > { %4146 = vpow2.f32 %v1563_v20  ;;  %1635 = vadd.xlane.f32.xlu2 %v1634_v58  ;;  %1491 = vmax.xlane.f32.xlu1 %v1490_v45  ;;  %v1631_v55 = vsel %vm1414_vm4, %v5304_v6, 0.0 }
 0x2ef   : > { %v5306_v10 = vpop.f32.mrf.mxu0  ;;  %v1450_v41 = vpop.xlane.xlu2 %1449 }
 0x2f0   : > { %v2197_v46 = vsel %vm1414_vm4, %v5306_v10, -inf  ;;  %v1522_v21 = vsub.f32 %v5130_v63, %v1450_v41 }
 0x2f1   : > { %1632 = vadd.xlane.f32.xlu0 %v1631_v55 }
 0x2f2   : > { %v5310_v53 = vpop.eup %4146  ;;  %v5312_v22 = vpop.f32.mrf.mxu2  ;;  %4041 = vmatmul.msk.bf16.gmra.mxu0 %vm1264_vm3, %v5149_v57  ;;  %v1565_v39 = vmul.f32 1.442695, %v1522_v21 }
 0x2f3   : > { %v1637_v31 = vsel %vm1414_vm4, %v5310_v53, 0.0  ;;  %v1493_v19 = vsel %vm1414_vm4, %v5312_v22, -inf }
 0x2f4   : > { %2198 = vmax.xlane.f32.xlu2 %v2197_v46  ;;  %1638 = vadd.xlane.f32.xlu1 %v1637_v31 }
 0x2f7   : > { %v1453_v15 = vpop.xlane.xlu0 %1452  ;;  %v5320_v16 = vpop.f32.mrf.mxu0 }
 0x2f8   : > { %v1523_v14 = vsub.f32 %v5138_v30, %v1453_v15  ;;  %v2200_v20 = vsel %vm1414_vm4, %v5320_v16, -inf }
 0x2f9   : > { %1488 = vmax.xlane.f32.xlu0 %v1487_v56 }
 0x2fa   : > { %v1567_v61 = vmul.f32 1.442695, %v1523_v14  ;;  %v5325_v57 = vpop.f32.mrf.mxu2 }
 0x2fb   : > { %v1496_v62 = vsel %vm1414_vm4, %v5325_v57, -inf }
 0x2fc   : > { %4148 = vpow2.f32 %v1567_v61  ;;  %1494 = vmax.xlane.f32.xlu1 %v1493_v19  ;;  %1497 = vmax.xlane.f32.xlu2 %v1496_v62 }
 0x2fd   : > { %4150 = vpow2.f32 %v1565_v39 }
 0x2ff   : > { %v5332_v27 = vpop.f32.mrf.mxu0  ;;  %v1456_v30 = vpop.xlane.xlu2 %1455 }
 0x300   : > { %6731 = vst [vmem:[#allocation6_spill] sm:$0xff] %v5332_v27 }
 0x301   : > { %2195 = vmax.xlane.f32.xlu0 %v2194_v8 }
 0x302   : > { %v5336_v5 = vpop.eup %4148  ;;  %v5338_v32 = vpop.f32.mrf.mxu2  ;;  %4042 = vmatmul.msk.bf16.gmra.mxu0 %vm1264_vm3, %v5143_v38 }
 0x303   : > { %v1643_v37 = vsel %vm1414_vm4, %v5336_v5, 0.0  ;;  %v5354_v55 = vpop.eup %4150 }
 0x304   : > { %1644 = vadd.xlane.f32.xlu2 %v1643_v37  ;;  %v1640_v41 = vsel %vm1414_vm4, %v5354_v55, 0.0 }
 0x307   : > { %v5344_v63 = vpop.xlane.xlu0 %1458  ;;  %v5346_v52 = vpop.f32.mrf.mxu0 }
 0x308   : > { %v2206_v58 = vsel %vm1414_vm4, %v5346_v52, -inf  ;;  %v2163_v45 = vpop.xlane.xlu2 %2162 }
 0x309   : > { %2201 = vmax.xlane.f32.xlu0 %v2200_v20  ;;  %2207 = vmax.xlane.f32.xlu1 %v2206_v58  ;;  %v2203_v20 = vsel %vm1414_vm4, %v5332_v27, -inf }
 0x30a   : > { %v5352_v38 = vpop.f32.mrf.mxu2 }
 0x30b   : > { %v1502_v14 = vsel %vm1414_vm4, %v5352_v38, -inf }
 0x30f   : > { %v1462_v46 = vpop.xlane.xlu0 %1461  ;;  %v5357_v15 = vpop.f32.mrf.mxu0 }
 0x310   : > { %v1526_v31 = vsub.f32 %v5166_v51, %v1462_v46  ;;  %v5367_v62 = vpop.xlane.xlu2 %2165  ;;  %v1524_v51 = vsub.f32 %v5145_v26, %v1456_v30  ;;  %v2209_v46 = vsel %vm1414_vm4, %v5357_v15, -inf }
 0x311   : > { %1641 = vadd.xlane.f32.xlu0 %v1640_v41  ;;  %1503 = vmax.xlane.f32.xlu1 %v1502_v14  ;;  %v2257_v14 = vsub.f32 %v5153_v33, %v2163_v45 }
 0x312   : > { %v5363_v56 = vpop.f32.mrf.mxu2  ;;  %v1573_v19 = vmul.f32 1.442695, %v1526_v31  ;;  %v1569_v58 = vmul.f32 1.442695, %v1524_v51  ;;  %v1499_v51 = vsel %vm1414_vm4, %v5338_v32, -inf }
 0x313   : > { %v1505_v61 = vsel %vm1414_vm4, %v5363_v56, -inf }
 0x314   : > { %v5369_v21 = vpop.xlane.xlu1 %2168  ;;  %1506 = vmax.xlane.f32.xlu2 %v1505_v61  ;;  %4152 = vpow2.f32 %v1573_v19 }
 0x315   : > { %4154 = vpow2.f32 %v1569_v58 }
 0x317   : > { %v1465_v8 = vpop.xlane.xlu0 %1464  ;;  %v5373_v37 = vpop.f32.mrf.mxu0 }
 0x318   : > { %v1527_v39 = vsub.f32 %v5179_v1, %v1465_v8  ;;  %6732 = vst [vmem:[#allocation7_spill] sm:$0xff] %v5373_v37  ;;  %v2212_v41 = vsel %vm1414_vm4, %v5373_v37, -inf }
 0x319   : > { %2204 = vmax.xlane.f32.xlu0 %v2203_v20  ;;  %2210 = vmax.xlane.f32.xlu1 %v2209_v46 }
 0x31a   : > { %v1575_v31 = vmul.f32 1.442695, %v1527_v39  ;;  %v5383_v1 = vpop.eup %4152  ;;  %v2289_v39 = vmul.f32 1.442695, %v2257_v14  ;;  %v1525_v14 = vsub.f32 %v5155_v42, %v5344_v63 }
 0x31b   : > { %6733 = vst [vmem:[#allocation8_spill] sm:$0xff] %v5383_v1  ;;  %v1652_v8 = vsel %vm1414_vm4, %v5383_v1, 0.0  ;;  %v5392_v20 = vpop.eup %4154 }
 0x31c   : > { %v5381_v26 = vpop.xlane.xlu2 %2171  ;;  %v1609_v30 = vpop.xlane.xlu1 %1608  ;;  %2213 = vmax.xlane.f32.xlu2 %v2212_v41  ;;  %v1571_v63 = vmul.f32 1.442695, %v1525_v14 }
 0x31d   : > { %4156 = vrcp.f32 %v1609_v30 }
 0x31e   : > { %4158 = vpow2.f32 %v1575_v31 }
 0x31f   : > { %v1612_v61 = vpop.xlane.xlu0 %1611  ;;  %v5386_v19 = vpop.f32.mrf.mxu0 }
 0x320   : > { %4160 = vrcp.f32 %v1612_v61  ;;  %6734 = vst [vmem:[#allocation9_spill] sm:$0xff] %v5386_v19  ;;  %v2215_v33 = vsel %vm1414_vm4, %v5386_v19, -inf }
 0x321   : > { %1500 = vmax.xlane.f32.xlu0 %v1499_v51  ;;  %1653 = vadd.xlane.f32.xlu1 %v1652_v8  ;;  %4162 = vpow2.f32 %v2289_v39 }
 0x323   : > { %v4157_v45 = vpop.eup %4156 }
 0x324   : > { %v1468_v58 = vpop.xlane.xlu2 %1467  ;;  %v2175_v46 = vpop.xlane.xlu1 %2174  ;;  %2216 = vmax.xlane.f32.xlu2 %v2215_v33  ;;  %v1735_v51 = vmul.f32 %v4157_v45, %v5184_v48 }
 0x325   : > { %v5396_v31 = vpop.eup %4158  ;;  %v1528_v41 = vsub.f32 %v5195_v11, %v1468_v58  ;;  %v2261_v30 = vsub.f32 %v5199_v34, %v2175_v46  ;;  %v1646_v11 = vsel %vm1414_vm4, %v5392_v20, 0.0 }
 0x326   : > { %v4161_v61 = vpop.eup %4160  ;;  %v1655_v42 = vsel %vm1414_vm4, %v5396_v31, 0.0 }
 0x327   : > { %v1736_v8 = vmul.f32 %v4161_v61, %v5193_v25  ;;  %v1577_v37 = vmul.f32 1.442695, %v1528_v41  ;;  %v2297_v19 = vmul.f32 1.442695, %v2261_v30  ;;  %v1471_v1 = vpop.xlane.xlu0 %1470  ;;  %v5405_v27 = vpop.f32.mrf.mxu0 }
 0x328   : > { %v1529_v33 = vsub.f32 %v5206_v18, %v1471_v1  ;;  %v5412_v25 = vpop.eup %4162 }
 0x329   : > { %v1767_v34 = vpack.c.bf16 %v1736_v8, %v1735_v51  ;;  %4164 = vpow2.f32 %v1577_v37  ;;  %1647 = vadd.xlane.f32.xlu0 %v1646_v11  ;;  %1656 = vadd.xlane.f32.xlu1 %v1655_v42  ;;  %v2258_v37 = vsub.f32 %v5163_v50, %v5367_v62 }
 0x32a   : > { %4166 = vpow2.f32 %v2297_v19  ;;  %v1579_v48 = vmul.f32 1.442695, %v1529_v33  ;;  %v2353_v19 = vsel %vm1414_vm4, %v5412_v25, 0.0 }
 0x32b   : > { %4011 = vmatmul.msk.bf16.vlgmr.msrb.gmra.mxu2 %vm1414_vm4, %v1767_v34  ;;  %4168 = vpow2.f32 %v1571_v63  ;;  %v2291_v30 = vmul.f32 1.442695, %v2258_v37 }
 0x32c   : > { %v5414_v18 = vpop.xlane.xlu2 %2177  ;;  %v1615_v1 = vpop.xlane.xlu1 %1614  ;;  %4170 = vpow2.f32 %v1579_v48 }
 0x32d   : > { %4172 = vrcp.f32 %v1615_v1 }
 0x32f   : > { %v5416_v39 = vpop.eup %4164  ;;  %v5422_v58 = vpop.f32.mrf.mxu0 }
 0x330   : > { %v5420_v45 = vpop.eup %4166  ;;  %v1658_v46 = vsel %vm1414_vm4, %v5416_v39, 0.0  ;;  %v2221_v34 = vsel %vm1414_vm4, %v5422_v58, -inf }
 0x331   : > { %2354 = vadd.xlane.f32.xlu0 %v2353_v19  ;;  %v2365_v41 = vsel %vm1414_vm4, %v5420_v45, 0.0  ;;  %1659 = vadd.xlane.f32.xlu2 %v1658_v46  ;;  %v5430_v50 = vpop.eup %4168 }
 0x332   : > { %2366 = vadd.xlane.f32.xlu1 %v2365_v41  ;;  %v5434_v14 = vpop.eup %4170  ;;  %v1649_v51 = vsel %vm1414_vm4, %v5430_v50, 0.0 }
 0x333   : > { %v1661_v8 = vsel %vm1414_vm4, %v5434_v14, 0.0  ;;  %v4173_v33 = vpop.eup %4172 }
 0x334   : > { %v1618_v62 = vpop.xlane.xlu2 %1617  ;;  %v5432_v61 = vpop.xlane.xlu1 %1473  ;;  %v1737_v63 = vmul.f32 %v4173_v33, %v5211_v3 }
 0x335   : > { %4174 = vrcp.f32 %v1618_v62  ;;  %v2259_v62 = vsub.f32 %v5174_v40, %v5369_v21  ;;  %v2260_v40 = vsub.f32 %v5186_v44, %v5381_v26 }
 0x336   : > { %4176 = vpow2.f32 %v2291_v30 }
 0x337   : > { %v5440_v11 = vpop.f32.mrf.mxu0 }
 0x339   : > { %1650 = vadd.xlane.f32.xlu0 %v1649_v51  ;;  %1662 = vadd.xlane.f32.xlu2 %v1661_v8  ;;  %v2293_v8 = vmul.f32 1.442695, %v2259_v62 }
 0x33a   : > { %2222 = vmax.xlane.f32.xlu1 %v2221_v34 }
 0x33b   : > { %v4175_v42 = vpop.eup %4174 }
 0x33c   : > { %v1738_v48 = vmul.f32 %v4175_v42, %v5222_v59  ;;  %v1621_v1 = vpop.xlane.xlu2 %1620  ;;  %v2184_v37 = vpop.xlane.xlu0 %2183  ;;  %v2224_v59 = vsel %vm1414_vm4, %v5440_v11, -inf }
 0x33d   : > { %v5446_v19 = vpop.eup %4176  ;;  %v2264_v46 = vsub.f32 %v5237_v17, %v2184_v37  ;;  %v5449_v41 = vpop.xlane.xlu1 %2180 }
 0x33e   : > { %v1768_v30 = vpack.c.bf16 %v1738_v48, %v1737_v63  ;;  %v2356_v3 = vsel %vm1414_vm4, %v5446_v19, 0.0  ;;  %v5460_v42 = vpop.f32.mrf.mxu2 }
 0x33f   : > { %v2303_v51 = vmul.f32 1.442695, %v2264_v46  ;;  %v5458_v17 = vpop.f32.mrf.mxu0  ;;  %v1508_v37 = vsel %vm1414_vm4, %v5460_v42, -inf }
 0x340   : > { %4012 = vmatmul.msk.bf16.gmra.mxu2 %vm1414_vm4, %v1768_v30  ;;  %v2295_v30 = vmul.f32 1.442695, %v2260_v40 }
 0x341   : > { %4178 = vpow2.f32 %v2303_v51  ;;  %2357 = vadd.xlane.f32.xlu0 %v2356_v3  ;;  %2225 = vmax.xlane.f32.xlu2 %v2224_v59 }
 0x342   : > { %4180 = vrcp.f32 %v1621_v1 }
 0x344   : > { %v1480_v33 = vpop.xlane.xlu2 %1479  ;;  %v1624_v34 = vpop.xlane.xlu0 %1623 }
 0x345   : > { %4182 = vrcp.f32 %v1624_v34  ;;  %v1532_v63 = vsub.f32 %v5246_v0, %v1480_v33  ;;  %v5467_v48 = vpop.xlane.xlu1 %1476 }
 0x346   : > { %4184 = vpow2.f32 %v2293_v8 }
 0x347   : > { %v5464_v21 = vpop.eup %4178  ;;  %v1585_v51 = vmul.f32 1.442695, %v1532_v63  ;;  %v5477_v8 = vpop.f32.mrf.mxu0  ;;  %4186 = vpow2.f32 %v2295_v30 }
 0x348   : > { %v2374_v1 = vsel %vm1414_vm4, %v5464_v21, 0.0  ;;  %v4181_v46 = vpop.eup %4180  ;;  %v2230_v40 = vsel %vm1414_vm4, %v5477_v8, -inf }
 0x349   : > { %2375 = vadd.xlane.f32.xlu1 %v2374_v1  ;;  %1509 = vmax.xlane.f32.xlu0 %v1508_v37  ;;  %v1739_v44 = vmul.f32 %v4181_v46, %v5235_v36  ;;  %4188 = vpow2.f32 %v1585_v51 }
 0x34b   : > { %v4183_v62 = vpop.eup %4182 }
 0x34c   : > { %v1740_v26 = vmul.f32 %v4183_v62, %v5248_v47  ;;  %v2187_v3 = vpop.xlane.xlu2 %2186  ;;  %v1627_v0 = vpop.xlane.xlu0 %1626 }
 0x34d   : > { %v5475_v59 = vpop.eup %4184  ;;  %v2265_v34 = vsub.f32 %v5250_v2, %v2187_v3  ;;  %v2262_v3 = vsub.f32 %v5213_v9, %v5414_v18 }
 0x34e   : > { %v1769_v33 = vpack.c.bf16 %v1740_v26, %v1739_v44  ;;  %v2359_v36 = vsel %vm1414_vm4, %v5475_v59, 0.0  ;;  %v5485_v63 = vpop.eup %4186 }
 0x34f   : > { %v1630_v1 = vpop.xlane.xlu1 %1629  ;;  %v2305_v47 = vmul.f32 1.442695, %v2265_v34  ;;  %v5487_v30 = vpop.eup %4188 }
 0x350   : > { %4013 = vmatmul.msk.bf16.gmra.mxu2 %vm1414_vm4, %v1769_v33  ;;  %4190 = vrcp.f32 %v1630_v1  ;;  %v2362_v33 = vsel %vm1414_vm4, %v5485_v63, 0.0  ;;  %v5498_v1 = vpop.f32.mrf.mxu0 }
 0x351   : > { %2231 = vmax.xlane.f32.xlu1 %v2230_v40  ;;  %2360 = vadd.xlane.f32.xlu0 %v2359_v36  ;;  %4192 = vrcp.f32 %v1627_v0  ;;  %v1670_v0 = vsel %vm1414_vm4, %v5487_v30, 0.0 }
 0x352   : > { %4194 = vpow2.f32 %v2305_v47 }
 0x354   : > { %v1483_v37 = vpop.xlane.xlu2 %1482  ;;  %v2190_v46 = vpop.xlane.xlu0 %2189 }
 0x355   : > { %v1533_v2 = vsub.f32 %v5259_v4, %v1483_v37  ;;  %v2266_v44 = vsub.f32 %v5265_v49, %v2190_v46  ;;  %v2299_v49 = vmul.f32 1.442695, %v2262_v3 }
 0x356   : > { %v4191_v62 = vpop.eup %4190 }
 0x357   : > { %v1587_v51 = vmul.f32 1.442695, %v1533_v2  ;;  %v2193_v26 = vpop.xlane.xlu1 %2192  ;;  %v4193_v34 = vpop.eup %4192  ;;  %v1742_v4 = vmul.f32 %v4191_v62, %v5271_v28  ;;  %v2307_v40 = vmul.f32 1.442695, %v2266_v44  ;;  %v1530_v28 = vsub.f32 %v5220_v12, %v5432_v61 }
 0x358   : > { %v1741_v36 = vmul.f32 %v4193_v34, %v5263_v7  ;;  %v5503_v9 = vpop.eup %4194  ;;  %v2267_v46 = vsub.f32 %v5278_v23, %v2193_v26  ;;  %v2218_v44 = vsel %vm1414_vm4, %v5405_v27, -inf  ;;  %v5519_v3 = vpop.f32.mrf.mxu0  ;;  %v2263_v34 = vsub.f32 %v5224_v29, %v5449_v41 }
 0x359   : > { %4196 = vpow2.f32 %v1587_v51  ;;  %1671 = vadd.xlane.f32.xlu1 %v1670_v0  ;;  %2363 = vadd.xlane.f32.xlu0 %v2362_v33  ;;  %v2377_v7 = vsel %vm1414_vm4, %v5503_v9, 0.0  ;;  %v1581_v26 = vmul.f32 1.442695, %v1530_v28 }
 0x35a   : > { %v1770_v18 = vpack.c.bf16 %v1742_v4, %v1741_v36  ;;  %4198 = vpow2.f32 %v2307_v40  ;;  %v2309_v23 = vmul.f32 1.442695, %v2267_v46  ;;  %v2236_v4 = vsel %vm1414_vm4, %v5519_v3, -inf }
 0x35b   : > { %4200 = vpow2.f32 %v2299_v49  ;;  %v2301_v28 = vmul.f32 1.442695, %v2263_v34 }
 0x35c   : > { %v5501_v47 = vpop.xlane.xlu0 %1485 }
 0x35f   : > { %v5505_v37 = vpop.eup %4196  ;;  %v1636_v2 = vpop.xlane.xlu2 %1635 }
 0x360   : > { %4014 = vmatmul.msk.bf16.gmra.mxu2 %vm1414_vm4, %v1770_v18  ;;  %v1673_v62 = vsel %vm1414_vm4, %v5505_v37, 0.0  ;;  %v1492_v51 = vpop.xlane.xlu1 %1491  ;;  %4202 = vrcp.f32 %v1636_v2  ;;  %v5517_v61 = vpop.eup %4198 }
 0x361   : > { %2378 = vadd.xlane.f32.xlu1 %v2377_v7  ;;  %1674 = vadd.xlane.f32.xlu2 %v1673_v62  ;;  %v5521_v0 = vpop.eup %4200  ;;  %v1536_v33 = vsub.f32 %v5298_v35, %v1492_v51  ;;  %v2380_v40 = vsel %vm1414_vm4, %v5517_v61, 0.0 }
 0x362   : > { %2219 = vmax.xlane.f32.xlu0 %v2218_v44  ;;  %v2368_v36 = vsel %vm1414_vm4, %v5521_v0, 0.0 }
 0x363   : > { %v1593_v46 = vmul.f32 1.442695, %v1536_v33 }
 0x364   : > { %v1633_v12 = vpop.xlane.xlu0 %1632 }
 0x365   : > { %4204 = vrcp.f32 %v1633_v12  ;;  %v5544_v12 = vpop.f32.mrf.mxu0 }
 0x366   : > { %4206 = vpow2.f32 %v2309_v23  ;;  %v4203_v49 = vpop.eup %4202 }
 0x367   : > { %4208 = vpow2.f32 %v1581_v26  ;;  %v1744_v41 = vmul.f32 %v4203_v49, %v5296_v60 }
 0x368   : > { %v1639_v35 = vpop.xlane.xlu1 %1638  ;;  %4210 = vpow2.f32 %v1593_v46 }
 0x369   : > { %2237 = vmax.xlane.f32.xlu1 %v2236_v4  ;;  %2381 = vadd.xlane.f32.xlu2 %v2380_v40  ;;  %4212 = vpow2.f32 %v2301_v28 }
 0x36a   : > { %2369 = vadd.xlane.f32.xlu0 %v2368_v36  ;;  %v1531_v36 = vsub.f32 %v5231_v43, %v5467_v48 }
 0x36b   : > { %v4205_v18 = vpop.eup %4204 }
 0x36c   : > { %v1489_v2 = vpop.xlane.xlu0 %1488  ;;  %v1743_v29 = vmul.f32 %v4205_v18, %v5304_v6  ;;  %v5534_v7 = vpop.eup %4206 }
 0x36d   : > { %v1535_v62 = vsub.f32 %v5285_v24, %v1489_v2  ;;  %v5537_v51 = vpop.eup %4208  ;;  %v2383_v26 = vsel %vm1414_vm4, %v5534_v7, 0.0  ;;  %v2199_v6 = vpop.xlane.xlu2 %2198 }
 0x36e   : > { %v1771_v44 = vpack.c.bf16 %v1744_v41, %v1743_v29  ;;  %v1664_v60 = vsel %vm1414_vm4, %v5537_v51, 0.0  ;;  %v5548_v33 = vpop.eup %4210  ;;  %v2269_v49 = vsub.f32 %v5306_v10, %v2199_v6  ;;  %v1583_v29 = vmul.f32 1.442695, %v1531_v36  ;;  %v5563_v10 = vpop.f32.mrf.mxu0 }
 0x36f   : > { %v1591_v23 = vmul.f32 1.442695, %v1535_v62  ;;  %v5550_v4 = vpop.eup %4212  ;;  %v1682_v46 = vsel %vm1414_vm4, %v5548_v33, 0.0  ;;  %v2227_v6 = vsel %vm1414_vm4, %v5458_v17, -inf }
 0x370   : > { %4015 = vmatmul.msk.bf16.vlgmr.msra.gmra.mxu3 %vm1414_vm4, %v1771_v44  ;;  %v1495_v34 = vpop.xlane.xlu1 %1494  ;;  %v2371_v28 = vsel %vm1414_vm4, %v5550_v4, 0.0  ;;  %v2313_v2 = vmul.f32 1.442695, %v2269_v49 }
 0x371   : > { %4214 = vpow2.f32 %v1591_v23  ;;  %2384 = vadd.xlane.f32.xlu2 %v2383_v26  ;;  %v1537_v44 = vsub.f32 %v5312_v22, %v1495_v34 }
 0x372   : > { %1665 = vadd.xlane.f32.xlu0 %v1664_v60  ;;  %4216 = vpow2.f32 %v2313_v2  ;;  %v2242_v60 = vsel %vm1414_vm4, %v5563_v10, -inf }
 0x373   : > { %4218 = vpow2.f32 %v1583_v29  ;;  %v1595_v49 = vmul.f32 1.442695, %v1537_v44 }
 0x374   : > { %v5546_v24 = vpop.xlane.xlu0 %2195 }
 0x375   : > { %v1498_v41 = vpop.xlane.xlu2 %1497 }
 0x376   : > { %v1538_v23 = vsub.f32 %v5325_v57, %v1498_v41 }
 0x377   : > { %v5552_v40 = vpop.eup %4214 }
 0x378   : > { %v1679_v18 = vsel %vm1414_vm4, %v5552_v40, 0.0 }
 0x379   : > { %1680 = vadd.xlane.f32.xlu1 %v1679_v18  ;;  %1683 = vadd.xlane.f32.xlu2 %v1682_v46  ;;  %v5574_v18 = vpop.eup %4216 }
 0x37a   : > { %2372 = vadd.xlane.f32.xlu0 %v2371_v28  ;;  %v5576_v57 = vpop.eup %4218  ;;  %v1534_v28 = vsub.f32 %v5273_v54, %v5501_v47 }
 0x37b   : > { %v1667_v41 = vsel %vm1414_vm4, %v5576_v57, 0.0 }
 0x37c   : > { %v2202_v62 = vpop.xlane.xlu0 %2201  ;;  %v5566_v48 = vpop.xlane.xlu1 %2207 }
 0x37d   : > { %v2270_v43 = vsub.f32 %v5320_v16, %v2202_v62  ;;  %v1597_v16 = vmul.f32 1.442695, %v1538_v23 }
 0x37f   : > { %v2315_v26 = vmul.f32 1.442695, %v2270_v43 }
 0x381   : > { %4220 = vpow2.f32 %v2315_v26  ;;  %2243 = vmax.xlane.f32.xlu1 %v2242_v60 }
 0x382   : > { %2228 = vmax.xlane.f32.xlu0 %v2227_v6  ;;  %4222 = vrcp.f32 %v1639_v35  ;;  %v2389_v35 = vsel %vm1414_vm4, %v5574_v18, 0.0 }
 0x384   : > { %v1642_v36 = vpop.xlane.xlu0 %1641  ;;  %v1504_v22 = vpop.xlane.xlu1 %1503 }
 0x385   : > { %4224 = vrcp.f32 %v1642_v36  ;;  %v1540_v46 = vsub.f32 %v5352_v38, %v1504_v22  ;;  %v1589_v38 = vmul.f32 1.442695, %v1534_v28 }
 0x386   : > { %4226 = vpow2.f32 %v1595_v49 }
 0x387   : > { %v5578_v34 = vpop.eup %4220  ;;  %4228 = vpow2.f32 %v1597_v16  ;;  %v1601_v43 = vmul.f32 1.442695, %v1540_v46 }
 0x388   : > { %v2392_v2 = vsel %vm1414_vm4, %v5578_v34, 0.0  ;;  %v4223_v29 = vpop.eup %4222 }
 0x389   : > { %2390 = vadd.xlane.f32.xlu1 %v2389_v35  ;;  %2393 = vadd.xlane.f32.xlu2 %v2392_v2  ;;  %v1745_v54 = vmul.f32 %v4223_v29, %v5310_v53  ;;  %4230 = vpow2.f32 %v1601_v43  ;;  %v2233_v53 = vsel %vm1414_vm4, %v5498_v1, -inf  ;;  %v2272_v29 = vsub.f32 %v5346_v52, %v5566_v48 }
 0x38a   : > { %1668 = vadd.xlane.f32.xlu0 %v1667_v41  ;;  %4232 = vpow2.f32 %v1589_v38 }
 0x38b   : > { %v4225_v62 = vpop.eup %4224 }
 0x38c   : > { %v5589_v44 = vpop.eup %4226  ;;  %v5591_v23 = vpop.xlane.xlu0 %2204  ;;  %v1746_v47 = vmul.f32 %v4225_v62, %v5354_v55  ;;  %v2268_v62 = vsub.f32 %v5291_v13, %v5546_v24 }
 0x38d   : > { %v5595_v26 = vpop.eup %4228  ;;  %v2211_v60 = vpop.xlane.xlu1 %2210  ;;  %v1685_v16 = vsel %vm1414_vm4, %v5589_v44, 0.0 }
 0x38e   : > { %v1772_v6 = vpack.c.bf16 %v1746_v47, %v1745_v54  ;;  %v2273_v49 = vsub.f32 %v5357_v15, %v2211_v60  ;;  %v1688_v36 = vsel %vm1414_vm4, %v5595_v26, 0.0  ;;  %v1645_v55 = vpop.xlane.xlu2 %1644  ;;  %v2319_v54 = vmul.f32 1.442695, %v2272_v29 }
 0x38f   : > { %v5605_v28 = vpop.eup %4230  ;;  %v2311_v47 = vmul.f32 1.442695, %v2268_v62 }
 0x390   : > { %4016 = vmatmul.msk.bf16.gmra.mxu3 %vm1414_vm4, %v1772_v6  ;;  %v2321_v22 = vmul.f32 1.442695, %v2273_v49  ;;  %v5608_v35 = vpop.eup %4232  ;;  %v1694_v43 = vsel %vm1414_vm4, %v5605_v28, 0.0 }
 0x391   : > { %1686 = vadd.xlane.f32.xlu1 %v1685_v16  ;;  %1689 = vadd.xlane.f32.xlu2 %v1688_v36  ;;  %v1676_v38 = vsel %vm1414_vm4, %v5608_v35, 0.0  ;;  %v2239_v16 = vsel %vm1414_vm4, %v5544_v12, -inf }
 0x392   : > { %2234 = vmax.xlane.f32.xlu0 %v2233_v53  ;;  %4234 = vpow2.f32 %v2321_v22  ;;  %v5628_v53 = vpop.f32.mrf.mxu0 }
 0x394   : > { %v1501_v46 = vpop.xlane.xlu0 %1500 }
 0x395   : > { %v1539_v15 = vsub.f32 %v5338_v32, %v1501_v46  ;;  %v1654_v2 = vpop.xlane.xlu1 %1653 }
 0x396   : > { %v1507_v32 = vpop.xlane.xlu2 %1506 }
 0x397   : > { %v1599_v41 = vmul.f32 1.442695, %v1539_v15 }
 0x398   : > { %v5618_v52 = vpop.eup %4234 }
 0x399   : > { %4236 = vpow2.f32 %v1599_v41  ;;  %1695 = vadd.xlane.f32.xlu2 %v1694_v43  ;;  %v2401_v6 = vsel %vm1414_vm4, %v5618_v52, 0.0  ;;  %v1541_v43 = vsub.f32 %v5363_v56, %v1507_v32 }
 0x39a   : > { %1677 = vadd.xlane.f32.xlu0 %v1676_v38  ;;  %4238 = vrcp.f32 %v1645_v55  ;;  %v6735_v38 = vld [vmem:[#allocation6_spill] sm:$0xff]  ;;  %v5648_v56 = vpop.f32.mrf.mxu0 }
 0x39c   : > { %v1648_v60 = vpop.xlane.xlu0 %1647 }
 0x39d   : > { %4240 = vrcp.f32 %v1648_v60  ;;  %v1657_v13 = vpop.xlane.xlu1 %1656  ;;  %v1603_v60 = vmul.f32 1.442695, %v1541_v43  ;;  %v6736_v43 = vld [vmem:[#allocation8_spill] sm:$0xff] }
 0x39e   : > { %4242 = vpow2.f32 %v2319_v54  ;;  %v5630_v55 = vpop.xlane.xlu2 %2213  ;;  %v2271_v54 = vsub.f32 %v6735_v38, %v5591_v23 }
 0x39f   : > { %v5620_v48 = vpop.eup %4236  ;;  %4244 = vpow2.f32 %v2311_v47 }
 0x3a0   : > { %v1691_v24 = vsel %vm1414_vm4, %v5620_v48, 0.0  ;;  %v4239_v49 = vpop.eup %4238  ;;  %4246 = vrcp.f32 %v1654_v2 }
 0x3a1   : > { %1692 = vadd.xlane.f32.xlu1 %v1691_v24  ;;  %2402 = vadd.xlane.f32.xlu2 %v2401_v6  ;;  %v1747_v46 = vmul.f32 %v4239_v49, %v5336_v5  ;;  %v2317_v24 = vmul.f32 1.442695, %v2271_v54  ;;  %v2248_v49 = vsel %vm1414_vm4, %v5648_v56, -inf }
 0x3a2   : > { %2240 = vmax.xlane.f32.xlu0 %v2239_v16 }
 0x3a3   : > { %v4241_v36 = vpop.eup %4240 }
 0x3a4   : > { %v2355_v22 = vpop.xlane.xlu0 %2354  ;;  %v1748_v15 = vmul.f32 %v4241_v36, %v5392_v20  ;;  %v5634_v29 = vpop.eup %4242  ;;  %v2245_v36 = vsel %vm1414_vm4, %v5628_v53, -inf }
 0x3a5   : > { %v5636_v41 = vpop.eup %4244  ;;  %v2398_v47 = vsel %vm1414_vm4, %v5634_v29, 0.0  ;;  %v5646_v20 = vpop.xlane.xlu1 %2366 }
 0x3a6   : > { %v1773_v62 = vpack.c.bf16 %v1748_v15, %v1747_v46  ;;  %v2386_v5 = vsel %vm1414_vm4, %v5636_v41, 0.0  ;;  %v2217_v23 = vpop.xlane.xlu2 %2216  ;;  %v4247_v16 = vpop.eup %4246 }
 0x3a7   : > { %v1750_v38 = vmul.f32 %v4247_v16, %v6736_v43 }
 0x3a8   : > { %4017 = vmatmul.msk.bf16.gmra.mxu3 %vm1414_vm4, %v1773_v62 }
 0x3a9   : > { %2399 = vadd.xlane.f32.xlu1 %v2398_v47 }
 0x3aa   : > { %2387 = vadd.xlane.f32.xlu0 %v2386_v5 }
 0x3ac   : > { %v1651_v6 = vpop.xlane.xlu0 %1650 }
 0x3ad   : > { %4248 = vrcp.f32 %v1651_v6  ;;  %v2223_v46 = vpop.xlane.xlu1 %2222 }
 0x3ae   : > { %v1844_v32 = vpop.f32.mrf.mxu2  ;;  %4250 = vpow2.f32 %v1603_v60  ;;  %v1660_v5 = vpop.xlane.xlu2 %1659 }
 0x3af   : > { %1924 = vst.msk [vmem:[#allocation5] sm:$0xff] %vm1264_vm3, %v1844_v32  ;;  %4252 = vpow2.f32 %v2317_v24 }
 0x3b0   : > { %4254 = vrcp.f32 %v2355_v22 }
 0x3b1   : > { %2249 = vmax.xlane.f32.xlu1 %v2248_v49  ;;  %v5667_v49 = vpop.f32.mrf.mxu0 }
 0x3b2   : > { %2246 = vmax.xlane.f32.xlu0 %v2245_v36 }
 0x3b3   : > { %v4249_v2 = vpop.eup %4248 }
 0x3b4   : > { %v2358_v15 = vpop.xlane.xlu0 %2357  ;;  %v1749_v62 = vmul.f32 %v4249_v2, %v5430_v50  ;;  %v5657_v54 = vpop.eup %4250 }
 0x3b5   : > { %4256 = vrcp.f32 %v2358_v15  ;;  %v5659_v47 = vpop.eup %4252  ;;  %v1697_v22 = vsel %vm1414_vm4, %v5657_v54, 0.0 }
 0x3b6   : > { %v1846_v60 = vpop.f32.mrf.mxu2  ;;  %v1774_v24 = vpack.c.bf16 %v1750_v38, %v1749_v62  ;;  %v4255_v6 = vpop.eup %4254  ;;  %4258 = vrcp.f32 %v1660_v5  ;;  %v2395_v50 = vsel %vm1414_vm4, %v5659_v47, 0.0  ;;  %v6737_v5 = vld [vmem:[#allocation9_spill] sm:$0xff] }
 0x3b7   : > { %1925 = vst.msk [vmem:[#allocation5 + $0x8] sm:$0xff] %vm1264_vm3, %v1846_v60  ;;  %4260 = vrcp.f32 %v1657_v13  ;;  %v2481_v16 = vmul.f32 %v4255_v6, %v5412_v25  ;;  %v2275_v60 = vsub.f32 %v6737_v5, %v2217_v23  ;;  %v2251_v25 = vsel %vm1414_vm4, %v5667_v49, -inf  ;;  %v1663_v5 = vpop.xlane.xlu2 %1662 }
 0x3b8   : > { %4018 = vmatmul.msk.bf16.gmra.mxu3 %vm1414_vm4, %v1774_v24 }
 0x3b9   : > { %1698 = vadd.xlane.f32.xlu1 %v1697_v22  ;;  %v6738_v22 = vld [vmem:[#allocation7_spill] sm:$0xff]  ;;  %v2325_v6 = vmul.f32 1.442695, %v2275_v60 }
 0x3ba   : > { %2396 = vadd.xlane.f32.xlu0 %v2395_v50  ;;  %v2274_v50 = vsub.f32 %v6738_v22, %v5630_v55 }
 0x3bb   : > { %v4257_v32 = vpop.eup %4256 }
 0x3bc   : > { %v2482_v36 = vmul.f32 %v4257_v32, %v5446_v19  ;;  %v5671_v2 = vpop.xlane.xlu1 %2375  ;;  %v1510_v15 = vpop.xlane.xlu0 %1509  ;;  %v2323_v32 = vmul.f32 1.442695, %v2274_v50 }
 0x3bd   : > { %v1542_v62 = vsub.f32 %v5460_v42, %v1510_v15  ;;  %v4259_v38 = vpop.eup %4258 }
 0x3be   : > { %v2513_v43 = vpack.c.bf16 %v2482_v36, %v2481_v16  ;;  %v4261_v13 = vpop.eup %4260  ;;  %v1752_v19 = vmul.f32 %v4259_v38, %v5416_v39  ;;  %v5685_v36 = vpop.f32.mrf.mxu0 }
 0x3bf   : > { %v1605_v24 = vmul.f32 1.442695, %v1542_v62  ;;  %v1751_v55 = vmul.f32 %v4261_v13, %v5396_v31  ;;  %v2254_v38 = vsel %vm1414_vm4, %v5685_v36, -inf }
 0x3c0   : > { %4043 = vmatmul.msk.bf16.vlgmr.msrb.gmra.mxu1 %vm1414_vm4, %v2513_v43  ;;  %v2277_v43 = vsub.f32 %v5422_v58, %v2223_v46 }
 0x3c1   : > { %4262 = vpow2.f32 %v1605_v24  ;;  %v1775_v15 = vpack.c.bf16 %v1752_v19, %v1751_v55 }
 0x3c2   : > { %2252 = vmax.xlane.f32.xlu0 %v2251_v25  ;;  %4264 = vpow2.f32 %v2325_v6  ;;  %v2329_v31 = vmul.f32 1.442695, %v2277_v43 }
 0x3c3   : > { %v1849_v42 = vpop.f32.mrf.mxu2  ;;  %4266 = vpow2.f32 %v2323_v32 }
 0x3c4   : > { %1926 = vst.msk [vmem:[#allocation5 + $0x10] sm:$0xff] %vm1264_vm3, %v1849_v42  ;;  %v5682_v23 = vpop.xlane.xlu1 %2231  ;;  %v2361_v16 = vpop.xlane.xlu0 %2360 }
 0x3c5   : > { %4268 = vrcp.f32 %v2361_v16  ;;  %v2226_v16 = vpop.xlane.xlu2 %2225 }
 0x3c7   : > { %v5687_v62 = vpop.eup %4262 }
 0x3c8   : > { %4019 = vmatmul.msk.bf16.gmra.mxu3 %vm1414_vm4, %v1775_v15  ;;  %v1700_v39 = vsel %vm1414_vm4, %v5687_v62, 0.0  ;;  %v5698_v46 = vpop.eup %4264 }
 0x3c9   : > { %1701 = vadd.xlane.f32.xlu2 %v1700_v39  ;;  %v5700_v22 = vpop.eup %4266  ;;  %v2407_v50 = vsel %vm1414_vm4, %v5698_v46, 0.0 }
 0x3ca   : > { %2255 = vmax.xlane.f32.xlu0 %v2254_v38  ;;  %v2404_v13 = vsel %vm1414_vm4, %v5700_v22, 0.0 }
 0x3cb   : > { %v1851_v60 = vpop.f32.mrf.mxu2  ;;  %v4269_v25 = vpop.eup %4268 }
 0x3cc   : > { %1927 = vst.msk [vmem:[#allocation5 + $0x18] sm:$0xff] %vm1264_vm3, %v1851_v60  ;;  %v5696_v24 = vpop.xlane.xlu1 %1671  ;;  %v2364_v58 = vpop.xlane.xlu0 %2363  ;;  %v2483_v55 = vmul.f32 %v4269_v25, %v5475_v59 }
 0x3cd   : > { %4270 = vrcp.f32 %v2364_v58 }
 0x3ce   : > { %4272 = vpow2.f32 %v2329_v31  ;;  %v2278_v31 = vsub.f32 %v5440_v11, %v2226_v16 }
 0x3d0   : > { %v2331_v59 = vmul.f32 1.442695, %v2278_v31 }
 0x3d1   : > { %2408 = vadd.xlane.f32.xlu2 %v2407_v50 }
 0x3d2   : > { %2405 = vadd.xlane.f32.xlu0 %v2404_v13 }
 0x3d3   : > { %v1854_v19 = vpop.f32.mrf.mxu2  ;;  %v4271_v6 = vpop.eup %4270 }
 0x3d4   : > { %1928 = vst.msk [vmem:[#allocation5 + $0x20] sm:$0xff] %vm1264_vm3, %v1854_v19  ;;  %v5707_v42 = vpop.xlane.xlu1 %2378  ;;  %v5709_v32 = vpop.eup %4272  ;;  %v2484_v15 = vmul.f32 %v4271_v6, %v5485_v63  ;;  %v2280_v19 = vsub.f32 %v5477_v8, %v5682_v23 }
 0x3d5   : > { %v2220_v43 = vpop.xlane.xlu0 %2219  ;;  %v2413_v58 = vsel %vm1414_vm4, %v5709_v32, 0.0 }
 0x3d6   : > { %v2276_v39 = vsub.f32 %v5405_v27, %v2220_v43  ;;  %v2514_v38 = vpack.c.bf16 %v2484_v15, %v2483_v55  ;;  %v2335_v15 = vmul.f32 1.442695, %v2280_v19 }
 0x3d8   : > { %v2327_v60 = vmul.f32 1.442695, %v2276_v39  ;;  %4044 = vmatmul.msk.bf16.gmra.mxu1 %vm1414_vm4, %v2514_v38 }
 0x3d9   : > { %2414 = vadd.xlane.f32.xlu2 %v2413_v58 }
 0x3da   : > { %4274 = vpow2.f32 %v2327_v60 }
 0x3db   : > { %v1856_v50 = vpop.f32.mrf.mxu2  ;;  %4276 = vrcp.f32 %v5646_v20 }
 0x3dc   : > { %1929 = vst.msk [vmem:[#allocation5 + $0x28] sm:$0xff] %vm1264_vm3, %v1856_v50  ;;  %v2238_v63 = vpop.xlane.xlu1 %2237 }
 0x3dd   : > { %v2282_v27 = vsub.f32 %v5519_v3, %v2238_v63  ;;  %v2370_v13 = vpop.xlane.xlu0 %2369 }
 0x3de   : > { %4278 = vrcp.f32 %v2370_v13 }
 0x3df   : > { %v2339_v11 = vmul.f32 1.442695, %v2282_v27  ;;  %4280 = vpow2.f32 %v2331_v59  ;;  %v1675_v27 = vpop.xlane.xlu2 %1674 }
 0x3e0   : > { %v5721_v25 = vpop.eup %4274 }
 0x3e1   : > { %4282 = vpow2.f32 %v2339_v11  ;;  %v2410_v6 = vsel %vm1414_vm4, %v5721_v25, 0.0  ;;  %v4277_v20 = vpop.eup %4276 }
 0x3e2   : > { %2411 = vadd.xlane.f32.xlu0 %v2410_v6  ;;  %4284 = vrcp.f32 %v1663_v5  ;;  %v2485_v3 = vmul.f32 %v4277_v20, %v5420_v45 }
 0x3e3   : > { %v1859_v16 = vpop.f32.mrf.mxu2 }
 0x3e4   : > { %v4279_v55 = vpop.eup %4278  ;;  %1930 = vst.msk [vmem:[#allocation5 + $0x30] sm:$0xff] %vm1264_vm3, %v1859_v16 }
 0x3e5   : > { %v2486_v43 = vmul.f32 %v4279_v55, %v5521_v0  ;;  %v1666_v39 = vpop.xlane.xlu0 %1665  ;;  %v5730_v38 = vpop.eup %4280 }
 0x3e6   : > { %4286 = vrcp.f32 %v1666_v39  ;;  %v2416_v5 = vsel %vm1414_vm4, %v5730_v38, 0.0 }
 0x3e7   : > { %v5732_v8 = vpop.eup %4282  ;;  %v2515_v23 = vpack.c.bf16 %v2486_v43, %v2485_v3  ;;  %4288 = vpow2.f32 %v2335_v15  ;;  %v2382_v55 = vpop.xlane.xlu2 %2381 }
 0x3e8   : > { %v2428_v31 = vsel %vm1414_vm4, %v5732_v8, 0.0  ;;  %v4285_v45 = vpop.eup %4284  ;;  %4290 = vrcp.f32 %v5671_v2 }
 0x3e9   : > { %4045 = vmatmul.msk.bf16.gmra.mxu1 %vm1414_vm4, %v2515_v23  ;;  %2429 = vadd.xlane.f32.xlu1 %v2428_v31  ;;  %v1753_v50 = vmul.f32 %v4285_v45, %v5434_v14 }
 0x3ea   : > { %2417 = vadd.xlane.f32.xlu0 %v2416_v5 }
 0x3eb   : > { %v1861_v0 = vpop.f32.mrf.mxu2 }
 0x3ec   : > { %v4287_v60 = vpop.eup %4286  ;;  %1931 = vst.msk [vmem:[#allocation5 + $0x38] sm:$0xff] %vm1264_vm3, %v1861_v0  ;;  %v1681_v43 = vpop.xlane.xlu1 %1680 }
 0x3ed   : > { %v2373_v58 = vpop.xlane.xlu0 %2372  ;;  %v1754_v59 = vmul.f32 %v4287_v60, %v5537_v51  ;;  %v5743_v63 = vpop.eup %4288 }
 0x3ee   : > { %4292 = vrcp.f32 %v2373_v58  ;;  %v2422_v11 = vsel %vm1414_vm4, %v5743_v63, 0.0  ;;  %v4291_v19 = vpop.eup %4290 }
 0x3ef   : > { %v1776_v13 = vpack.c.bf16 %v1754_v59, %v1753_v50  ;;  %v2488_v14 = vmul.f32 %v4291_v19, %v5464_v21 }
 0x3f1   : > { %4020 = vmatmul.msk.bf16.gmra.mxu3 %vm1414_vm4, %v1776_v13 }
 0x3f2   : > { %2423 = vadd.xlane.f32.xlu0 %v2422_v11 }
 0x3f3   : > { %v1864_v6 = vpop.f32.mrf.mxu3 }
 0x3f4   : > { %1932 = vst.msk [vmem:[#allocation5 + $0x40] sm:$0xff] %vm1264_vm3, %v1864_v6  ;;  %v4293_v2 = vpop.eup %4292  ;;  %v2244_v60 = vpop.xlane.xlu1 %2243 }
 0x3f5   : > { %v2229_v20 = vpop.xlane.xlu0 %2228  ;;  %v2487_v51 = vmul.f32 %v4293_v2, %v5550_v4  ;;  %v2284_v13 = vsub.f32 %v5563_v10, %v2244_v60 }
 0x3f6   : > { %v2279_v16 = vsub.f32 %v5458_v17, %v2229_v20 }
 0x3f7   : > { %v2516_v3 = vpack.c.bf16 %v2488_v14, %v2487_v51  ;;  %v2343_v2 = vmul.f32 1.442695, %v2284_v13 }
 0x3f8   : > { %v2333_v15 = vmul.f32 1.442695, %v2279_v16 }
 0x3f9   : > { %4046 = vmatmul.msk.bf16.gmra.mxu1 %vm1414_vm4, %v2516_v3 }
 0x3fa   : > { %4294 = vpow2.f32 %v2333_v15 }
 0x3fb   : > { %4296 = vrcp.f32 %v2382_v55  ;;  %v1866_v39 = vpop.f32.mrf.mxu3 }
 0x3fc   : > { %4298 = vrcp.f32 %v5696_v24  ;;  %1933 = vst.msk [vmem:[#allocation5 + $0x48] sm:$0xff] %vm1264_vm3, %v1866_v39 }
 0x3fd   : > { %4300 = vrcp.f32 %v5707_v42  ;;  %v1669_v21 = vpop.xlane.xlu0 %1668 }
 0x3fe   : > { %4302 = vrcp.f32 %v1669_v21 }
 0x400   : > { %v5756_v4 = vpop.eup %4294 }
 0x401   : > { %v4297_v17 = vpop.eup %4296  ;;  %v2419_v23 = vsel %vm1414_vm4, %v5756_v4, 0.0 }
 0x402   : > { %v4299_v31 = vpop.eup %4298  ;;  %2420 = vadd.xlane.f32.xlu2 %v2419_v23  ;;  %v2490_v45 = vmul.f32 %v4297_v17, %v5517_v61  ;;  %v2385_v61 = vpop.xlane.xlu2 %2384 }
 0x403   : > { %v4301_v5 = vpop.eup %4300  ;;  %v1756_v59 = vmul.f32 %v4299_v31, %v5487_v30  ;;  %v2391_v17 = vpop.xlane.xlu1 %2390 }
 0x404   : > { %v4303_v0 = vpop.eup %4302  ;;  %v2489_v58 = vmul.f32 %v4301_v5, %v5503_v9 }
 0x405   : > { %v2235_v24 = vpop.xlane.xlu0 %2234  ;;  %v1755_v50 = vmul.f32 %v4303_v0, %v5576_v57 }
 0x406   : > { %v2281_v42 = vsub.f32 %v5498_v1, %v2235_v24  ;;  %v2517_v6 = vpack.c.bf16 %v2490_v45, %v2489_v58 }
 0x407   : > { %v1777_v19 = vpack.c.bf16 %v1756_v59, %v1755_v50 }
 0x408   : > { %v2337_v11 = vmul.f32 1.442695, %v2281_v42 }
 0x409   : > { %4021 = vmatmul.msk.bf16.gmra.mxu3 %vm1414_vm4, %v1777_v19  ;;  %4047 = vmatmul.msk.bf16.gmra.mxu1 %vm1414_vm4, %v2517_v6 }
 0x40a   : > { %4304 = vpow2.f32 %v2337_v11  ;;  %v1684_v55 = vpop.xlane.xlu2 %1683 }
 0x40b   : > { %4306 = vrcp.f32 %v1675_v27  ;;  %v1687_v60 = vpop.xlane.xlu1 %1686 }
 0x40d   : > { %v1678_v9 = vpop.xlane.xlu0 %1677 }
 0x40e   : > { %4308 = vrcp.f32 %v1678_v9 }
 0x40f   : > { %4310 = vpow2.f32 %v2343_v2 }
 0x410   : > { %v5768_v1 = vpop.eup %4304  ;;  %4312 = vrcp.f32 %v1681_v43 }
 0x411   : > { %v2425_v30 = vsel %vm1414_vm4, %v5768_v1, 0.0  ;;  %v4307_v10 = vpop.eup %4306 }
 0x412   : > { %2426 = vadd.xlane.f32.xlu0 %v2425_v30  ;;  %v1757_v51 = vmul.f32 %v4307_v10, %v5505_v37  ;;  %v2394_v23 = vpop.xlane.xlu2 %2393 }
 0x413   : > { %v1869_v57 = vpop.f32.mrf.mxu3 }
 0x414   : > { %v4309_v20 = vpop.eup %4308  ;;  %1934 = vst.msk [vmem:[#allocation5 + $0x50] sm:$0xff] %vm1264_vm3, %v1869_v57  ;;  %v1693_v6 = vpop.xlane.xlu1 %1692 }
 0x415   : > { %v2241_v14 = vpop.xlane.xlu0 %2240  ;;  %v1758_v27 = vmul.f32 %v4309_v20, %v5608_v35  ;;  %v5775_v16 = vpop.eup %4310 }
 0x416   : > { %v2283_v15 = vsub.f32 %v5544_v12, %v2241_v14  ;;  %v2434_v21 = vsel %vm1414_vm4, %v5775_v16, 0.0  ;;  %v4313_v12 = vpop.eup %4312 }
 0x417   : > { %v1778_v3 = vpack.c.bf16 %v1758_v27, %v1757_v51  ;;  %v1759_v24 = vmul.f32 %v4313_v12, %v5552_v40 }
 0x418   : > { %v2341_v39 = vmul.f32 1.442695, %v2283_v15 }
 0x419   : > { %4022 = vmatmul.msk.bf16.gmra.mxu3 %vm1414_vm4, %v1778_v3 }
 0x41a   : > { %4314 = vpow2.f32 %v2341_v39  ;;  %2435 = vadd.xlane.f32.xlu0 %v2434_v21  ;;  %v1690_v11 = vpop.xlane.xlu2 %1689 }
 0x41b   : > { %4316 = vrcp.f32 %v1684_v55  ;;  %v1871_v37 = vpop.f32.mrf.mxu3 }
 0x41c   : > { %4318 = vrcp.f32 %v2385_v61  ;;  %1935 = vst.msk [vmem:[#allocation5 + $0x58] sm:$0xff] %vm1264_vm3, %v1871_v37  ;;  %v2400_v27 = vpop.xlane.xlu1 %2399 }
 0x41d   : > { %v2388_v35 = vpop.xlane.xlu0 %2387 }
 0x41e   : > { %4320 = vrcp.f32 %v2388_v35 }
 0x41f   : > { %4322 = vrcp.f32 %v2391_v17 }
 0x420   : > { %v5782_v31 = vpop.eup %4314  ;;  %4324 = vrcp.f32 %v2394_v23 }
 0x421   : > { %v4317_v43 = vpop.eup %4316  ;;  %v2431_v5 = vsel %vm1414_vm4, %v5782_v31, 0.0  ;;  %4326 = vrcp.f32 %v1687_v60 }
 0x422   : > { %v4319_v45 = vpop.eup %4318  ;;  %2432 = vadd.xlane.f32.xlu2 %v2431_v5  ;;  %v1760_v58 = vmul.f32 %v4317_v43, %v5548_v33  ;;  %4328 = vrcp.f32 %v1690_v11  ;;  %v1696_v51 = vpop.xlane.xlu2 %1695 }
 0x423   : > { %v2491_v42 = vmul.f32 %v4319_v45, %v5534_v7 }
 0x424   : > { %v4321_v0 = vpop.eup %4320  ;;  %v1779_v19 = vpack.c.bf16 %v1760_v58, %v1759_v24  ;;  %v5808_v39 = vpop.xlane.xlu1 %2249 }
 0x425   : > { %v2492_v50 = vmul.f32 %v4321_v0, %v5636_v41  ;;  %v5790_v59 = vpop.xlane.xlu0 %2246  ;;  %v4323_v33 = vpop.eup %4322 }
 0x426   : > { %v4325_v41 = vpop.eup %4324  ;;  %v2493_v9 = vmul.f32 %v4323_v33, %v5574_v18 }
 0x427   : > { %v2518_v13 = vpack.c.bf16 %v2492_v50, %v2491_v42  ;;  %v4327_v61 = vpop.eup %4326  ;;  %v2494_v30 = vmul.f32 %v4325_v41, %v5578_v34 }
 0x428   : > { %v4329_v2 = vpop.eup %4328  ;;  %v1761_v57 = vmul.f32 %v4327_v61, %v5589_v44 }
 0x429   : > { %4048 = vmatmul.msk.bf16.gmra.mxu1 %vm1414_vm4, %v2518_v13  ;;  %4023 = vmatmul.msk.bf16.gmra.mxu3 %vm1414_vm4, %v1779_v19  ;;  %v1762_v20 = vmul.f32 %v4329_v2, %v5595_v26  ;;  %v2519_v55 = vpack.c.bf16 %v2494_v30, %v2493_v9 }
 0x42a   : > { %v2403_v3 = vpop.xlane.xlu2 %2402 }
 0x42b   : > { %v1874_v40 = vpop.f32.mrf.mxu3  ;;  %v1780_v15 = vpack.c.bf16 %v1762_v20, %v1761_v57 }
 0x42c   : > { %1936 = vst.msk [vmem:[#allocation5 + $0x60] sm:$0xff] %vm1264_vm3, %v1874_v40  ;;  %v1699_v42 = vpop.xlane.xlu1 %1698 }
 0x42d   : > { %v2397_v7 = vpop.xlane.xlu0 %2396 }
 0x42e   : > { %4330 = vrcp.f32 %v2397_v7 }
 0x42f   : > { %4332 = vrcp.f32 %v1693_v6 }
 0x430   : > { %4334 = vrcp.f32 %v2400_v27 }
 0x431   : > { %4336 = vrcp.f32 %v1696_v51 }
 0x433   : > { %v1876_v10 = vpop.f32.mrf.mxu3 }
 0x434   : > { %1937 = vst.msk [vmem:[#allocation5 + $0x68] sm:$0xff] %vm1264_vm3, %v1876_v10  ;;  %v4331_v26 = vpop.eup %4330 }
 0x435   : > { %v5800_v14 = vpop.xlane.xlu0 %2252  ;;  %v4333_v21 = vpop.eup %4332  ;;  %v2495_v35 = vmul.f32 %v4331_v26, %v5659_v47 }
 0x436   : > { %v4335_v17 = vpop.eup %4334  ;;  %v1763_v12 = vmul.f32 %v4333_v21, %v5620_v48 }
 0x437   : > { %v4337_v37 = vpop.eup %4336  ;;  %v2496_v43 = vmul.f32 %v4335_v17, %v5634_v29 }
 0x438   : > { %v1764_v45 = vmul.f32 %v4337_v37, %v5605_v28 }
 0x439   : > { %4049 = vmatmul.msk.bf16.gmra.mxu1 %vm1414_vm4, %v2519_v55  ;;  %4024 = vmatmul.msk.bf16.gmra.mxu3 %vm1414_vm4, %v1780_v15  ;;  %v2520_v60 = vpack.c.bf16 %v2496_v43, %v2495_v35 }
 0x43a   : > { %v1781_v58 = vpack.c.bf16 %v1764_v45, %v1763_v12 }
 0x43b   : > { %v1879_v18 = vpop.f32.mrf.mxu3 }
 0x43c   : > { %1938 = vst.msk [vmem:[#allocation5 + $0x70] sm:$0xff] %vm1264_vm3, %v1879_v18  ;;  %v1702_v24 = vpop.xlane.xlu2 %1701  ;;  %v2286_v18 = vsub.f32 %v5648_v56, %v5808_v39 }
 0x43d   : > { %v5805_v34 = vpop.xlane.xlu0 %2255  ;;  %v2590_v44 = vpop.f32.mrf.mxu1 }
 0x43e   : > { %2702 = vrot.lane.b32.xlu1 %v2590_v44, %s4460_s23  ;;  %v2347_v17 = vmul.f32 1.442695, %v2286_v18 }
 0x443   : > { %v1881_v23 = vpop.f32.mrf.mxu3 }
 0x444   : > { %1939 = vst.msk [vmem:[#allocation5 + $0x78] sm:$0xff] %vm1264_vm3, %v1881_v23  ;;  %v2409_v2 = vpop.xlane.xlu2 %2408 }
 0x445   : > { %v2592_v5 = vpop.f32.mrf.mxu1  ;;  %v2406_v0 = vpop.xlane.xlu0 %2405 }
 0x446   : > { %2704 = vrot.lane.b32.xlu2 %v2592_v5, %s4460_s23  ;;  %4338 = vrcp.f32 %v2406_v0 }
 0x447   : > { %4340 = vrcp.f32 %v1702_v24 }
 0x448   : > { %4342 = vrcp.f32 %v2403_v3 }
 0x449   : > { %4050 = vmatmul.msk.bf16.gmra.mxu1 %vm1414_vm4, %v2520_v60  ;;  %4025 = vmatmul.msk.bf16.gmra.mxu3 %vm1414_vm4, %v1781_v58  ;;  %4344 = vrcp.f32 %v1699_v42 }
 0x44b   : > { %v1884_v47 = vpop.f32.mrf.mxu3 }
 0x44c   : > { %1940 = vst.msk [vmem:[#allocation5 + $0x80] sm:$0xff] %vm1264_vm3, %v1884_v47  ;;  %v4339_v48 = vpop.eup %4338  ;;  %v2415_v20 = vpop.xlane.xlu2 %2414 }
 0x44d   : > { %v4341_v29 = vpop.eup %4340  ;;  %v2498_v13 = vmul.f32 %v4339_v48, %v5700_v22 }
 0x44e   : > { %v4343_v50 = vpop.eup %4342  ;;  %v1766_v19 = vmul.f32 %v4341_v29, %v5687_v62  ;;  %v4092_v29 = vld [vmem:[%s6713_s5 + $0x8] sm:$0xff] }
 0x44f   : > { %v4345_v28 = vpop.eup %4344  ;;  %v2497_v40 = vmul.f32 %v4343_v50, %v5618_v52  ;;  %2953 = vmatpush.bf16.msrb.mxu3 %v4092_v29 }
 0x450   : > { %v1765_v7 = vmul.f32 %v4345_v28, %v5657_v54 }
 0x451   : > { %v2521_v41 = vpack.c.bf16 %v2498_v13, %v2497_v40  ;;  %v4091_v13 = vld [vmem:[%s6713_s5] sm:$0xff] }
 0x452   : > { %v1782_v61 = vpack.c.bf16 %v1766_v19, %v1765_v7 }
 0x453   : > { %v1886_v11 = vpop.f32.mrf.mxu3  ;;  %2954 = vmatpush.bf16.msrb.mxu3 %v4091_v13 }
 0x454   : > { %1941 = vst.msk [vmem:[#allocation5 + $0x88] sm:$0xff] %vm1264_vm3, %v1886_v11 }
 0x455   : > { %v2595_v6 = vpop.f32.mrf.mxu1  ;;  %v2412_v33 = vpop.xlane.xlu0 %2411 }
 0x456   : > { %2706 = vrot.lane.b32.xlu2 %v2595_v6, %s4460_s23  ;;  %4346 = vrcp.f32 %v2412_v33 }
 0x457   : > { %4348 = vrcp.f32 %v2409_v2 }
 0x459   : > { %4051 = vmatmul.msk.bf16.gmra.mxu1 %vm1414_vm4, %v2521_v41  ;;  %4026 = vmatmul.msk.bf16.gmra.mxu3 %vm1414_vm4, %v1782_v61 }
 0x45c   : > { %v4347_v62 = vpop.eup %4346  ;;  %v2430_v0 = vpop.xlane.xlu1 %2429 }
 0x45d   : > { %v2597_v22 = vpop.f32.mrf.mxu1  ;;  %v4349_v52 = vpop.eup %4348  ;;  %v2500_v9 = vmul.f32 %v4347_v62, %v5721_v25 }
 0x45e   : > { %2708 = vrot.lane.b32.xlu0 %v2597_v22, %s4460_s23  ;;  %v2499_v54 = vmul.f32 %v4349_v52, %v5698_v46  ;;  %v2418_v10 = vpop.xlane.xlu0 %2417 }
 0x45f   : > { %4350 = vrcp.f32 %v2418_v10 }
 0x460   : > { %v2522_v57 = vpack.c.bf16 %v2500_v9, %v2499_v54  ;;  %4352 = vrcp.f32 %v2415_v20 }
 0x465   : > { %v4351_v27 = vpop.eup %4350 }
 0x466   : > { %v2600_v30 = vpop.f32.mrf.mxu1  ;;  %v4353_v55 = vpop.eup %4352  ;;  %v2502_v15 = vmul.f32 %v4351_v27, %v5730_v38 }
 0x467   : > { %2710 = vrot.lane.b32.xlu1 %v2600_v30, %s4460_s23  ;;  %v2501_v46 = vmul.f32 %v4353_v55, %v5709_v32  ;;  %v2424_v21 = vpop.xlane.xlu0 %2423  ;;  %v2285_v32 = vsub.f32 %v5628_v53, %v5790_v59 }
 0x469   : > { %4052 = vmatmul.msk.bf16.gmra.mxu1 %vm1414_vm4, %v2522_v57  ;;  %v2523_v3 = vpack.c.bf16 %v2502_v15, %v2501_v46  ;;  %v2345_v39 = vmul.f32 1.442695, %v2285_v32 }
 0x46e   : > { %v2602_v51 = vpop.f32.mrf.mxu1 }
 0x46f   : > { %2712 = vrot.lane.b32.xlu2 %v2602_v51, %s4460_s23 }
 0x474   : > { %v1889_v25 = vpop.f32.mrf.mxu3 }
 0x475   : > { %1942 = vst.msk [vmem:[#allocation5 + $0x90] sm:$0xff] %vm1264_vm3, %v1889_v25  ;;  %v2421_v44 = vpop.xlane.xlu2 %2420 }
 0x476   : > { %v2605_v26 = vpop.f32.mrf.mxu1  ;;  %4354 = vrcp.f32 %v2421_v44 }
 0x477   : > { %2714 = vrot.lane.b32.xlu2 %v2605_v26, %s4460_s23  ;;  %4356 = vrcp.f32 %v2424_v21 }
 0x478   : > { %4358 = vpow2.f32 %v2347_v17 }
 0x479   : > { %4053 = vmatmul.msk.bf16.gmra.mxu1 %vm1414_vm4, %v2523_v3  ;;  %4360 = vpow2.f32 %v2345_v39 }
 0x47c   : > { %v1891_v38 = vpop.f32.mrf.mxu3  ;;  %v4355_v37 = vpop.eup %4354 }
 0x47d   : > { %1943 = vst.msk [vmem:[#allocation5 + $0x98] sm:$0xff] %vm1264_vm3, %v1891_v38  ;;  %v4357_v56 = vpop.eup %4356  ;;  %v2503_v35 = vmul.f32 %v4355_v37, %v5756_v4 }
 0x47e   : > { %v5844_v23 = vpop.eup %4358  ;;  %v2504_v12 = vmul.f32 %v4357_v56, %v5743_v63  ;;  %v2607_v53 = vpop.f32.mrf.mxu1  ;;  %v2287_v63 = vsub.f32 %v5667_v49, %v5800_v14 }
 0x47f   : > { %v2440_v45 = vsel %vm1414_vm4, %v5844_v23, 0.0  ;;  %v5850_v59 = vpop.eup %4360 }
 0x480   : > { %v2524_v5 = vpack.c.bf16 %v2504_v12, %v2503_v35  ;;  %v2437_v24 = vsel %vm1414_vm4, %v5850_v59, 0.0  ;;  %v2349_v42 = vmul.f32 1.442695, %v2287_v63 }
 0x485   : > { %v2427_v43 = vpop.xlane.xlu0 %2426 }
 0x486   : > { %4362 = vrcp.f32 %v2427_v43  ;;  %v2610_v48 = vpop.f32.mrf.mxu1 }
 0x487   : > { %4364 = vrcp.f32 %v2430_v0 }
 0x488   : > { %2441 = vadd.xlane.f32.xlu0 %v2440_v45  ;;  %4366 = vpow2.f32 %v2349_v42 }
 0x489   : > { %4054 = vmatmul.msk.bf16.gmra.mxu1 %vm1414_vm4, %v2524_v5 }
 0x48c   : > { %v1894_v4 = vpop.f32.mrf.mxu3  ;;  %v4363_v60 = vpop.eup %4362 }
 0x48d   : > { %1944 = vst.msk [vmem:[#allocation5 + $0xa0] sm:$0xff] %vm1264_vm3, %v1894_v4  ;;  %v4365_v58 = vpop.eup %4364  ;;  %v2505_v47 = vmul.f32 %v4363_v60, %v5768_v1  ;;  %v2436_v11 = vpop.xlane.xlu0 %2435 }
 0x48e   : > { %v2506_v50 = vmul.f32 %v4365_v58, %v5732_v8  ;;  %v5867_v1 = vpop.eup %4366  ;;  %v2612_v19 = vpop.f32.mrf.mxu1 }
 0x48f   : > { %v2443_v6 = vsel %vm1414_vm4, %v5867_v1, 0.0 }
 0x490   : > { %v2525_v14 = vpack.c.bf16 %v2506_v50, %v2505_v47 }
 0x491   : > { %2438 = vadd.xlane.f32.xlu1 %v2437_v24 }
 0x494   : > { %v1896_v28 = vpop.f32.mrf.mxu3 }
 0x495   : > { %1945 = vst.msk [vmem:[#allocation5 + $0xa8] sm:$0xff] %vm1264_vm3, %v1896_v28  ;;  %v2433_v49 = vpop.xlane.xlu2 %2432 }
 0x496   : > { %4368 = vrcp.f32 %v2433_v49 }
 0x497   : > { %4370 = vrcp.f32 %v2436_v11 }
 0x499   : > { %4055 = vmatmul.msk.bf16.gmra.mxu1 %vm1414_vm4, %v2525_v14 }
 0x49c   : > { %v1899_v8 = vpop.f32.mrf.mxu3  ;;  %2716 = vrot.lane.b32.xlu0 %v2607_v53, %s4460_s23  ;;  %v4369_v40 = vpop.eup %4368 }
 0x49d   : > { %1946 = vst.msk [vmem:[#allocation5 + $0xb0] sm:$0xff] %vm1264_vm3, %v1899_v8  ;;  %v4371_v33 = vpop.eup %4370  ;;  %v2507_v41 = vmul.f32 %v4369_v40, %v5782_v31 }
 0x49e   : > { %v2508_v61 = vmul.f32 %v4371_v33, %v5775_v16  ;;  %v2288_v16 = vsub.f32 %v5685_v36, %v5805_v34 }
 0x4a0   : > { %v2705_v7 = vpop.permute.xlu2 %2704  ;;  %2444 = vadd.xlane.f32.xlu2 %v2443_v6  ;;  %v2526_v62 = vpack.c.bf16 %v2508_v61, %v2507_v41  ;;  %v2351_v51 = vmul.f32 1.442695, %v2288_v16 }
 0x4a1   : > { %2800 = vst.msk [vmem:[#allocation5 + $0x8] sm:$0xff] %vm2798_vm5, %v2705_v7 }
 0x4a2   : > { %4372 = vpow2.f32 %v2351_v51 }
 0x4a4   : > { %v1901_v2 = vpop.f32.mrf.mxu3 }
 0x4a5   : > { %1947 = vst.msk [vmem:[#allocation5 + $0xb8] sm:$0xff] %vm1264_vm3, %v1901_v2 }
 0x4a6   : > { %v2615_v22 = vpop.f32.mrf.mxu1 }
 0x4a8   : > { %v2832_v20 = vld [vmem:[#allocation5 + $0x8] sm:$0xff]  ;;  %v5891_v36 = vpop.eup %4372 }
 0x4a9   : > { %4056 = vmatmul.msk.bf16.gmra.mxu1 %vm1414_vm4, %v2526_v62  ;;  %v2446_v46 = vsel %vm1414_vm4, %v5891_v36, 0.0 }
 0x4aa   : > { %2718 = vrot.lane.b32.xlu1 %v2610_v48, %s4460_s23 }
 0x4ac   : > { %v1904_v52 = vpop.f32.mrf.mxu3 }
 0x4ad   : > { %1948 = vst.msk [vmem:[#allocation5 + $0xc0] sm:$0xff] %vm1264_vm3, %v1904_v52 }
 0x4ae   : > { %v2617_v9 = vpop.f32.mrf.mxu1 }
 0x4b0   : > { %v2703_v54 = vpop.permute.xlu1 %2702  ;;  %v2707_v30 = vpop.permute.xlu2 %2706 }
 0x4b1   : > { %2799 = vst.msk [vmem:[#allocation5] sm:$0xff] %vm2798_vm5, %v2703_v54 }
 0x4b2   : > { %2801 = vst.msk [vmem:[#allocation5 + $0x10] sm:$0xff] %vm2798_vm5, %v2707_v30  ;;  %2722 = vrot.lane.b32.xlu1 %v2615_v22, %s4460_s23 }
 0x4b4   : > { %v1906_v31 = vpop.f32.mrf.mxu3 }
 0x4b5   : > { %1949 = vst.msk [vmem:[#allocation5 + $0xc8] sm:$0xff] %vm1264_vm3, %v1906_v31 }
 0x4b6   : > { %v2620_v10 = vpop.f32.mrf.mxu1 }
 0x4b8   : > { %v2831_v57 = vld [vmem:[#allocation5] sm:$0xff]  ;;  %2720 = vrot.lane.b32.xlu2 %v2612_v19, %s4460_s23 }
 0x4b9   : > { %v2863_v27 = vpack.c.bf16 %v2832_v20, %v2831_v57  ;;  %v2833_v37 = vld [vmem:[#allocation5 + $0x10] sm:$0xff] }
 0x4ba   : > { %2726 = vrot.lane.b32.xlu1 %v2620_v10, %s4460_s23 }
 0x4bb   : > { %4067 = vmatmul.msk.bf16.vlgmr.msrb.gmra.mxu3 %vm398_vm0, %v2863_v27 }
 0x4bc   : > { %v1909_v55 = vpop.f32.mrf.mxu3 }
 0x4bd   : > { %1950 = vst.msk [vmem:[#allocation5 + $0xd0] sm:$0xff] %vm1264_vm3, %v1909_v55 }
 0x4be   : > { %v2622_v15 = vpop.f32.mrf.mxu1 }
 0x4c0   : > { %2728 = vrot.lane.b32.xlu2 %v2622_v15, %s4460_s23 }
 0x4c4   : > { %v1911_v34 = vpop.f32.mrf.mxu3 }
 0x4c5   : > { %1951 = vst.msk [vmem:[#allocation5 + $0xd8] sm:$0xff] %vm1264_vm3, %v1911_v34 }
 0x4c6   : > { %v2625_v25 = vpop.f32.mrf.mxu1  ;;  %2447 = vadd.xlane.f32.xlu0 %v2446_v46 }
 0x4c7   : > { %2730 = vrot.lane.b32.xlu1 %v2625_v25, %s4460_s23 }
 0x4c9   : > { %v2713_v18 = vpop.permute.xlu2 %2712 }
 0x4ca   : > { %2804 = vst.msk [vmem:[#allocation5 + $0x28] sm:$0xff] %vm2798_vm5, %v2713_v18 }
 0x4cc   : > { %v1914_v44 = vpop.f32.mrf.mxu3 }
 0x4cd   : > { %1952 = vst.msk [vmem:[#allocation5 + $0xe0] sm:$0xff] %vm1264_vm3, %v1914_v44 }
 0x4ce   : > { %v2627_v26 = vpop.f32.mrf.mxu1 }
 0x4cf   : > { %2732 = vrot.lane.b32.xlu2 %v2627_v26, %s4460_s23 }
 0x4d0   : > { %v2709_v3 = vpop.permute.xlu0 %2708 }
 0x4d1   : > { %v2715_v21 = vpop.permute.xlu2 %2714  ;;  %2802 = vst.msk [vmem:[#allocation5 + $0x18] sm:$0xff] %vm2798_vm5, %v2709_v3  ;;  %v2836_v0 = vld [vmem:[#allocation5 + $0x28] sm:$0xff] }
 0x4d2   : > { %2805 = vst.msk [vmem:[#allocation5 + $0x30] sm:$0xff] %vm2798_vm5, %v2715_v21 }
 0x4d4   : > { %v1916_v17 = vpop.f32.mrf.mxu3 }
 0x4d5   : > { %1953 = vst.msk [vmem:[#allocation5 + $0xe8] sm:$0xff] %vm1264_vm3, %v1916_v17 }
 0x4d6   : > { %v2630_v38 = vpop.f32.mrf.mxu1 }
 0x4d7   : > { %2734 = vrot.lane.b32.xlu1 %v2630_v38, %s4460_s23 }
 0x4d8   : > { %v2834_v56 = vld [vmem:[#allocation5 + $0x18] sm:$0xff] }
 0x4d9   : > { %v2711_v32 = vpop.permute.xlu1 %2710  ;;  %v2864_v39 = vpack.c.bf16 %v2834_v56, %v2833_v37  ;;  %v2837_v8 = vld [vmem:[#allocation5 + $0x30] sm:$0xff] }
 0x4da   : > { %2803 = vst.msk [vmem:[#allocation5 + $0x20] sm:$0xff] %vm2798_vm5, %v2711_v32  ;;  %2724 = vrot.lane.b32.xlu0 %v2617_v9, %s4460_s23 }
 0x4db   : > { %4068 = vmatmul.msk.bf16.gmra.mxu3 %vm398_vm0, %v2864_v39 }
 0x4dc   : > { %v1919_v35 = vpop.f32.mrf.mxu3 }
 0x4dd   : > { %1954 = vst.msk [vmem:[#allocation5 + $0xf0] sm:$0xff] %vm1264_vm3, %v1919_v35 }
 0x4de   : > { %v2632_v12 = vpop.f32.mrf.mxu1 }
 0x4e1   : > { %v2835_v45 = vld [vmem:[#allocation5 + $0x20] sm:$0xff] }
 0x4e2   : > { %2736 = vrot.lane.b32.xlu0 %v2632_v12, %s4460_s23  ;;  %v2865_v53 = vpack.c.bf16 %v2836_v0, %v2835_v45 }
 0x4e4   : > { %v1921_v43 = vpop.f32.mrf.mxu3 }
 0x4e5   : > { %1955 = vst.msk [vmem:[#allocation5 + $0xf8] sm:$0xff] %vm1264_vm3, %v1921_v43 }
 0x4e6   : > { %v2635_v5 = vpop.f32.mrf.mxu1 }
 0x4e7   : > { %2738 = vrot.lane.b32.xlu2 %v2635_v5, %s4460_s23 }
 0x4eb   : > { %4069 = vmatmul.msk.bf16.gmra.mxu3 %vm398_vm0, %v2865_v53 }
 0x4ee   : > { %v2637_v4 = vpop.f32.mrf.mxu1 }
 0x4ef   : > { %2740 = vrot.lane.b32.xlu1 %v2637_v4, %s4460_s23 }
 0x4f6   : > { %v2640_v63 = vpop.f32.mrf.mxu1 }
 0x4f7   : > { %2742 = vrot.lane.b32.xlu0 %v2640_v63, %s4460_s23 }
 0x4fb   : > { %v2442_v24 = vpop.xlane.xlu0 %2441 }
 0x4fc   : > { %4374 = vrcp.f32 %v2442_v24 }
 0x4fe   : > { %v2642_v60 = vpop.f32.mrf.mxu1 }
 0x4ff   : > { %2744 = vrot.lane.b32.xlu2 %v2642_v60, %s4460_s23 }
 0x502   : > { %v4375_v47 = vpop.eup %4374 }
 0x503   : > { %v2510_v29 = vmul.f32 %v4375_v47, %v5844_v23 }
 0x504   : > { %v2439_v58 = vpop.xlane.xlu1 %2438 }
 0x505   : > { %4376 = vrcp.f32 %v2439_v58 }
 0x506   : > { %v2645_v42 = vpop.f32.mrf.mxu1 }
 0x507   : > { %2746 = vrot.lane.b32.xlu1 %v2645_v42, %s4460_s23 }
 0x50b   : > { %v4377_v48 = vpop.eup %4376 }
 0x50c   : > { %v2509_v50 = vmul.f32 %v4377_v48, %v5850_v59 }
 0x50e   : > { %v2647_v28 = vpop.f32.mrf.mxu1  ;;  %v2527_v49 = vpack.c.bf16 %v2510_v29, %v2509_v50  ;;  %v2717_v14 = vpop.permute.xlu0 %2716 }
 0x50f   : > { %2748 = vrot.lane.b32.xlu0 %v2647_v28, %s4460_s23  ;;  %2806 = vst.msk [vmem:[#allocation5 + $0x38] sm:$0xff] %vm2798_vm5, %v2717_v14 }
 0x510   : > { %4057 = vmatmul.msk.bf16.gmra.mxu1 %vm1414_vm4, %v2527_v49 }
 0x513   : > { %v2445_v13 = vpop.xlane.xlu2 %2444 }
 0x514   : > { %4378 = vrcp.f32 %v2445_v13 }
 0x516   : > { %v2650_v11 = vpop.f32.mrf.mxu1  ;;  %v2838_v19 = vld [vmem:[#allocation5 + $0x38] sm:$0xff] }
 0x517   : > { %2750 = vrot.lane.b32.xlu2 %v2650_v11, %s4460_s23  ;;  %v2866_v40 = vpack.c.bf16 %v2838_v19, %v2837_v8  ;;  %v5963_v19 = vld [vmem:[%s6714_s6] ss:$0 sm:$0xff] }
 0x519   : > { %4070 = vmatmul.msk.bf16.gmra.mxu3 %vm398_vm0, %v2866_v40 }
 0x51a   : > { %v4379_v16 = vpop.eup %4378 }
 0x51b   : > { %v2721_v23 = vpop.permute.xlu2 %2720  ;;  %v2511_v57 = vmul.f32 %v4379_v16, %v5867_v1 }
 0x51c   : > { %v2719_v59 = vpop.permute.xlu1 %2718  ;;  %2808 = vst.msk [vmem:[#allocation5 + $0x48] sm:$0xff] %vm2798_vm5, %v2721_v23 }
 0x51d   : > { %2807 = vst.msk [vmem:[#allocation5 + $0x40] sm:$0xff] %vm2798_vm5, %v2719_v59 }
 0x51e   : > { %v2652_v6 = vpop.f32.mrf.mxu1 }
 0x51f   : > { %2752 = vrot.lane.b32.xlu1 %v2652_v6, %s4460_s23 }
 0x523   : > { %v2729_v7 = vpop.permute.xlu2 %2728  ;;  %v2840_v61 = vld [vmem:[#allocation5 + $0x48] sm:$0xff] }
 0x524   : > { %v2723_v33 = vpop.permute.xlu1 %2722  ;;  %2812 = vst.msk [vmem:[#allocation5 + $0x68] sm:$0xff] %vm2798_vm5, %v2729_v7  ;;  %v2839_v41 = vld [vmem:[#allocation5 + $0x40] sm:$0xff] }
 0x525   : > { %2809 = vst.msk [vmem:[#allocation5 + $0x50] sm:$0xff] %vm2798_vm5, %v2723_v33  ;;  %v2867_v22 = vpack.c.bf16 %v2840_v61, %v2839_v41 }
 0x526   : > { %v2655_v2 = vpop.f32.mrf.mxu1 }
 0x527   : > { %2754 = vrot.lane.b32.xlu0 %v2655_v2, %s4460_s23 }
 0x529   : > { %4071 = vmatmul.msk.bf16.gmra.mxu3 %vm398_vm0, %v2867_v22 }
 0x52b   : > { %v2733_v62 = vpop.permute.xlu2 %2732  ;;  %v2844_v44 = vld [vmem:[#allocation5 + $0x68] sm:$0xff] }
 0x52c   : > { %v2727_v52 = vpop.permute.xlu1 %2726  ;;  %2814 = vst.msk [vmem:[#allocation5 + $0x78] sm:$0xff] %vm2798_vm5, %v2733_v62  ;;  %v2841_v34 = vld [vmem:[#allocation5 + $0x50] sm:$0xff] }
 0x52d   : > { %2811 = vst.msk [vmem:[#allocation5 + $0x60] sm:$0xff] %vm2798_vm5, %v2727_v52 }
 0x52e   : > { %v2657_v9 = vpop.f32.mrf.mxu1 }
 0x52f   : > { %2756 = vrot.lane.b32.xlu2 %v2657_v9, %s4460_s23 }
 0x533   : > { %v2846_v38 = vld [vmem:[#allocation5 + $0x78] sm:$0xff] }
 0x534   : > { %v2843_v18 = vld [vmem:[#allocation5 + $0x60] sm:$0xff] }
 0x535   : > { %v2869_v26 = vpack.c.bf16 %v2844_v44, %v2843_v18 }
 0x539   : > { %v2731_v54 = vpop.permute.xlu1 %2730  ;;  %v2448_v30 = vpop.xlane.xlu0 %2447 }
 0x53a   : > { %2813 = vst.msk [vmem:[#allocation5 + $0x70] sm:$0xff] %vm2798_vm5, %v2731_v54  ;;  %4380 = vrcp.f32 %v2448_v30 }
 0x53e   : > { %v2956_v56 = vpop.f32.mrf.mxu3 }
 0x53f   : > { %v5967_v40 = vadd.f32 %v5963_v19, %v2956_v56 }
 0x540   : > { %v4381_v31 = vpop.eup %4380 }
 0x541   : > { %v2739_v10 = vpop.permute.xlu2 %2738  ;;  %v2512_v20 = vmul.f32 %v4381_v31, %v5891_v36  ;;  %v2845_v17 = vld [vmem:[#allocation5 + $0x70] sm:$0xff]  ;;  %v3036_v59 = vsel %vm398_vm0, %v5967_v40, 0.0 }
 0x542   : > { %2817 = vst.msk [vmem:[#allocation5 + $0x90] sm:$0xff] %vm2798_vm5, %v2739_v10  ;;  %v2870_v32 = vpack.c.bf16 %v2846_v38, %v2845_v17 }
 0x543   : > { %v2528_v51 = vpack.c.bf16 %v2512_v20, %v2511_v57 }
 0x545   : > { %4058 = vmatmul.msk.bf16.gmra.mxu1 %vm1414_vm4, %v2528_v51 }
 0x546   : > { %v2958_v12 = vpop.f32.mrf.mxu3 }
 0x549   : > { %v2735_v27 = vpop.permute.xlu1 %2734  ;;  %v2849_v24 = vld [vmem:[#allocation5 + $0x90] sm:$0xff] }
 0x54a   : > { %2815 = vst.msk [vmem:[#allocation5 + $0x80] sm:$0xff] %vm2798_vm5, %v2735_v27  ;;  %v5991_v27 = vadd.f32 %v5963_v19, %v2958_v12 }
 0x54c   : > { %v2725_v55 = vpop.permute.xlu0 %2724 }
 0x54d   : > { %2810 = vst.msk [vmem:[#allocation5 + $0x58] sm:$0xff] %vm2798_vm5, %v2725_v55 }
 0x551   : > { %v2847_v43 = vld [vmem:[#allocation5 + $0x80] sm:$0xff] }
 0x554   : > { %v2737_v15 = vpop.permute.xlu0 %2736  ;;  %v2842_v25 = vld [vmem:[#allocation5 + $0x58] sm:$0xff] }
 0x555   : > { %2816 = vst.msk [vmem:[#allocation5 + $0x88] sm:$0xff] %vm2798_vm5, %v2737_v15  ;;  %v2868_v46 = vpack.c.bf16 %v2842_v25, %v2841_v34  ;;  %v3039_v34 = vsel %vm398_vm0, %v5991_v27, 0.0 }
 0x557   : > { %4072 = vmatmul.msk.bf16.gmra.mxu3 %vm398_vm0, %v2868_v46 }
 0x559   : > { %v2745_v1 = vpop.permute.xlu2 %2744 }
 0x55a   : > { %2820 = vst.msk [vmem:[#allocation5 + $0xa8] sm:$0xff] %vm2798_vm5, %v2745_v1 }
 0x55c   : > { %v2848_v35 = vld [vmem:[#allocation5 + $0x88] sm:$0xff] }
 0x55d   : > { %v2871_v5 = vpack.c.bf16 %v2848_v35, %v2847_v43 }
 0x55e   : > { %v5952_v0 = vpop.f32.mrf.mxu3 }
 0x55f   : > { %v6005_v1 = vadd.f32 %v5963_v19, %v5952_v0 }
 0x561   : > { %v2741_v36 = vpop.permute.xlu1 %2740  ;;  %v2852_v50 = vld [vmem:[#allocation5 + $0xa8] sm:$0xff]  ;;  %v3042_v44 = vsel %vm398_vm0, %v6005_v1, 0.0 }
 0x562   : > { %2818 = vst.msk [vmem:[#allocation5 + $0x98] sm:$0xff] %vm2798_vm5, %v2741_v36 }
 0x566   : > { %v2963_v58 = vpop.f32.mrf.mxu3 }
 0x567   : > { %4073 = vmatmul.msk.bf16.gmra.mxu3 %vm398_vm0, %v2869_v26  ;;  %v5972_v6 = vadd.f32 %v5963_v19, %v2963_v58 }
 0x569   : > { %v2743_v3 = vpop.permute.xlu0 %2742  ;;  %v2850_v63 = vld [vmem:[#allocation5 + $0x98] sm:$0xff]  ;;  %v3045_v22 = vsel %vm398_vm0, %v5972_v6, 0.0 }
 0x56a   : > { %2819 = vst.msk [vmem:[#allocation5 + $0xa0] sm:$0xff] %vm2798_vm5, %v2743_v3  ;;  %v2872_v42 = vpack.c.bf16 %v2850_v63, %v2849_v24 }
 0x56e   : > { %v2966_v48 = vpop.f32.mrf.mxu3 }
 0x56f   : > { %v6001_v46 = vadd.f32 %v5963_v19, %v2966_v48 }
 0x571   : > { %v2751_v21 = vpop.permute.xlu2 %2750  ;;  %v2851_v29 = vld [vmem:[#allocation5 + $0xa0] sm:$0xff]  ;;  %v3048_v18 = vsel %vm398_vm0, %v6001_v46, 0.0 }
 0x572   : > { %2823 = vst.msk [vmem:[#allocation5 + $0xc0] sm:$0xff] %vm2798_vm5, %v2751_v21  ;;  %v2873_v28 = vpack.c.bf16 %v2852_v50, %v2851_v29 }
 0x576   : > { %v2968_v49 = vpop.f32.mrf.mxu3 }
 0x577   : > { %4074 = vmatmul.msk.bf16.gmra.mxu3 %vm398_vm0, %v2870_v32  ;;  %v6015_v3 = vadd.f32 %v5963_v19, %v2968_v49  ;;  %v4461_v49 = vmov 32.0  }
 0x578   : > { %4382 = vrcp.f32 %v4461_v49 }
 0x579   : > { %v2747_v37 = vpop.permute.xlu1 %2746  ;;  %v2855_v41 = vld [vmem:[#allocation5 + $0xc0] sm:$0xff]  ;;  %v3051_v38 = vsel %vm398_vm0, %v6015_v3, 0.0 }
 0x57a   : > { %2821 = vst.msk [vmem:[#allocation5 + $0xb0] sm:$0xff] %vm2798_vm5, %v2747_v37 }
 0x581   : > { %v2749_v39 = vpop.permute.xlu0 %2748  ;;  %v2853_v11 = vld [vmem:[#allocation5 + $0xb0] sm:$0xff] }
 0x582   : > { %2822 = vst.msk [vmem:[#allocation5 + $0xb8] sm:$0xff] %vm2798_vm5, %v2749_v39 }
 0x587   : > { %4075 = vmatmul.msk.bf16.gmra.mxu3 %vm398_vm0, %v2871_v5 }
 0x589   : > { %v2757_v45 = vpop.permute.xlu2 %2756  ;;  %v2854_v13 = vld [vmem:[#allocation5 + $0xb8] sm:$0xff] }
 0x58a   : > { %2826 = vst.msk [vmem:[#allocation5 + $0xd8] sm:$0xff] %vm2798_vm5, %v2757_v45  ;;  %v2874_v8 = vpack.c.bf16 %v2854_v13, %v2853_v11  ;;  %v4383_v13 = vpop.eup %4382 }
 0x58b   : > { %vm3137_vm6 = vweird.f32 %v4383_v13 }
 0x58d   : > { %v2660_v53 = vpop.f32.mrf.mxu1 }
 0x58e   : > { %2758 = vrot.lane.b32.xlu1 %v2660_v53, %s4460_s23 }
 0x591   : > { %v2753_v4 = vpop.permute.xlu1 %2752  ;;  %v2858_v31 = vld [vmem:[#allocation5 + $0xd8] sm:$0xff] }
 0x592   : > { %2824 = vst.msk [vmem:[#allocation5 + $0xc8] sm:$0xff] %vm2798_vm5, %v2753_v4 }
 0x595   : > { %v2662_v60 = vpop.f32.mrf.mxu1 }
 0x596   : > { %2760 = vrot.lane.b32.xlu0 %v2662_v60, %s4460_s23 }
 0x597   : > { %4076 = vmatmul.msk.bf16.gmra.mxu3 %vm398_vm0, %v2872_v42 }
 0x599   : > { %v2755_v47 = vpop.permute.xlu0 %2754  ;;  %v2856_v33 = vld [vmem:[#allocation5 + $0xc8] sm:$0xff] }
 0x59a   : > { %2825 = vst.msk [vmem:[#allocation5 + $0xd0] sm:$0xff] %vm2798_vm5, %v2755_v47  ;;  %v2875_v2 = vpack.c.bf16 %v2856_v33, %v2855_v41 }
 0x59c   : > { %v2971_v14 = vpop.f32.mrf.mxu3 }
 0x59d   : > { %v5979_v62 = vadd.f32 %v5963_v19, %v2971_v14 }
 0x59f   : > { %v3054_v9 = vsel %vm398_vm0, %v5979_v62, 0.0 }
 0x5a1   : > { %v2857_v16 = vld [vmem:[#allocation5 + $0xd0] sm:$0xff] }
 0x5a2   : > { %v2876_v10 = vpack.c.bf16 %v2858_v31, %v2857_v16 }
 0x5a4   : > { %v2973_v23 = vpop.f32.mrf.mxu3 }
 0x5a5   : > { %v6012_v26 = vadd.f32 %v5963_v19, %v2973_v23 }
 0x5a7   : > { %4077 = vmatmul.msk.bf16.gmra.mxu3 %vm398_vm0, %v2873_v28  ;;  %v3057_v17 = vsel %vm398_vm0, %v6012_v26, 0.0 }
 0x5ac   : > { %v2976_v61 = vpop.f32.mrf.mxu3 }
 0x5ad   : > { %v6025_v56 = vadd.f32 %v5963_v19, %v2976_v61 }
 0x5af   : > { %v3060_v43 = vsel %vm398_vm0, %v6025_v56, 0.0 }
 0x5b4   : > { %v2978_v54 = vpop.f32.mrf.mxu3 }
 0x5b5   : > { %v5985_v30 = vadd.f32 %v5963_v19, %v2978_v54 }
 0x5b7   : > { %4078 = vmatmul.msk.bf16.gmra.mxu3 %vm398_vm0, %v2874_v8  ;;  %v3063_v57 = vsel %vm398_vm0, %v5985_v30, 0.0  ;;  %v3133_v8 = vmul.f32 32.0, %v4383_v13 }
 0x5c0   : > { %3037 = vadd.xlane.f32.xlu0 %v3036_v59  ;;  %v3134_v59 = vsub.f32 1.0, %v3133_v8 }
 0x5c2   : > { %v2665_v7 = vpop.f32.mrf.mxu1 }
 0x5c3   : > { %2762 = vrot.lane.b32.xlu2 %v2665_v7, %s4460_s23  ;;  %v3135_v7 = vmul.f32 %v4383_v13, %v3134_v59 }
 0x5c5   : > { %v3136_v33 = vadd.f32 %v4383_v13, %v3135_v7 }
 0x5c7   : > { %4079 = vmatmul.msk.bf16.gmra.mxu3 %vm398_vm0, %v2875_v2  ;;  %v6064_v61 = vsel %vm3137_vm6, %v4383_v13, %v3136_v33 }
 0x5c8   : > { %3046 = vadd.xlane.f32.xlu0 %v3045_v22 }
 0x5ca   : > { %v2667_v52 = vpop.f32.mrf.mxu1 }
 0x5cb   : > { %2764 = vrot.lane.b32.xlu1 %v2667_v52, %s4460_s23 }
 0x5d0   : > { %3055 = vadd.xlane.f32.xlu0 %v3054_v9 }
 0x5d7   : > { %4080 = vmatmul.msk.bf16.gmra.mxu3 %vm398_vm0, %v2876_v10 }
 0x5d8   : > { %3064 = vadd.xlane.f32.xlu0 %v3063_v57 }
 0x5da   : > { %v2981_v20 = vpop.f32.mrf.mxu3 }
 0x5db   : > { %v6022_v32 = vadd.f32 %v5963_v19, %v2981_v20 }
 0x5dd   : > { %v3066_v12 = vsel %vm398_vm0, %v6022_v32, 0.0 }
 0x5e2   : > { %v2983_v51 = vpop.f32.mrf.mxu3 }
 0x5e3   : > { %v6041_v53 = vadd.f32 %v5963_v19, %v2983_v51 }
 0x5e5   : > { %v3069_v60 = vsel %vm398_vm0, %v6041_v53, 0.0 }
 0x5ea   : > { %v2986_v55 = vpop.f32.mrf.mxu3 }
 0x5eb   : > { %v5994_v15 = vadd.f32 %v5963_v19, %v2986_v55 }
 0x5ec   : > { %3040 = vadd.xlane.f32.xlu2 %v3039_v34 }
 0x5ed   : > { %v3072_v25 = vsel %vm398_vm0, %v5994_v15, 0.0 }
 0x5ee   : > { %3073 = vadd.xlane.f32.xlu0 %v3072_v25 }
 0x5f2   : > { %v2988_v36 = vpop.f32.mrf.mxu3 }
 0x5f3   : > { %v6038_v45 = vadd.f32 %v5963_v19, %v2988_v36 }
 0x5f4   : > { %3049 = vadd.xlane.f32.xlu2 %v3048_v18 }
 0x5f5   : > { %3043 = vadd.xlane.f32.xlu1 %v3042_v44  ;;  %6740 = vst [vmem:[#allocation8_spill] sm:$0xff] %v6038_v45  ;;  %v3075_v63 = vsel %vm398_vm0, %v6038_v45, 0.0 }
 0x5fa   : > { %v2991_v21 = vpop.f32.mrf.mxu3 }
 0x5fb   : > { %v6052_v47 = vadd.f32 %v5963_v19, %v2991_v21 }
 0x5fc   : > { %3058 = vadd.xlane.f32.xlu2 %v3057_v17 }
 0x5fd   : > { %3052 = vadd.xlane.f32.xlu1 %v3051_v38  ;;  %6741 = vst [vmem:[#allocation9_spill] sm:$0xff] %v6052_v47  ;;  %v3078_v28 = vsel %vm398_vm0, %v6052_v47, 0.0 }
 0x600   : > { %v2759_v37 = vpop.permute.xlu1 %2758 }
 0x601   : > { %2827 = vst.msk [vmem:[#allocation5 + $0xe0] sm:$0xff] %vm2798_vm5, %v2759_v37 }
 0x602   : > { %v2993_v39 = vpop.f32.mrf.mxu3 }
 0x603   : > { %v6029_v35 = vadd.f32 %v5963_v19, %v2993_v39 }
 0x604   : > { %3067 = vadd.xlane.f32.xlu2 %v3066_v12 }
 0x605   : > { %6739 = vst [vmem:[#allocation6_spill] sm:$0xff] %v6029_v35  ;;  %3061 = vadd.xlane.f32.xlu1 %v3060_v43  ;;  %v3081_v5 = vsel %vm398_vm0, %v6029_v35, 0.0 }
 0x606   : > { %3082 = vadd.xlane.f32.xlu0 %v3081_v5 }
 0x608   : > { %v2761_v0 = vpop.permute.xlu0 %2760  ;;  %v2859_v58 = vld [vmem:[#allocation5 + $0xe0] sm:$0xff] }
 0x609   : > { %2828 = vst.msk [vmem:[#allocation5 + $0xe8] sm:$0xff] %vm2798_vm5, %v2761_v0 }
 0x60a   : > { %v2996_v4 = vpop.f32.mrf.mxu3 }
 0x60b   : > { %v6049_v24 = vadd.f32 %v5963_v19, %v2996_v4 }
 0x60c   : > { %3076 = vadd.xlane.f32.xlu2 %v3075_v63 }
 0x60d   : > { %3070 = vadd.xlane.f32.xlu1 %v3069_v60  ;;  %v3084_v50 = vsel %vm398_vm0, %v6049_v24, 0.0 }
 0x610   : > { %v2860_v42 = vld [vmem:[#allocation5 + $0xe8] sm:$0xff] }
 0x611   : > { %v2877_v48 = vpack.c.bf16 %v2860_v42, %v2859_v58 }
 0x612   : > { %v2998_v29 = vpop.f32.mrf.mxu3 }
 0x613   : > { %4081 = vmatmul.msk.bf16.gmra.mxu3 %vm398_vm0, %v2877_v48  ;;  %v6076_v10 = vadd.f32 %v5963_v19, %v2998_v29 }
 0x614   : > { %3085 = vadd.xlane.f32.xlu2 %v3084_v50 }
 0x615   : > { %3079 = vadd.xlane.f32.xlu1 %v3078_v28  ;;  %6742 = vst [vmem:[#allocation7_spill] sm:$0xff] %v6076_v10  ;;  %v3087_v55 = vsel %vm398_vm0, %v6076_v10, 0.0 }
 0x61a   : > { %v6059_v14 = vpop.f32.mrf.mxu3 }
 0x61d   : > { %v2763_v11 = vpop.permute.xlu2 %2762 }
 0x61e   : > { %2829 = vst.msk [vmem:[#allocation5 + $0xf0] sm:$0xff] %vm2798_vm5, %v2763_v11 }
 0x622   : > { %v6062_v23 = vpop.f32.mrf.mxu3 }
 0x625   : > { %v2861_v25 = vld [vmem:[#allocation5 + $0xf0] sm:$0xff] }
 0x62a   : > { %v3006_v41 = vpop.f32.mrf.mxu3 }
 0x62b   : > { %v6092_v37 = vadd.f32 %v5963_v19, %v3006_v41 }
 0x62d   : > { %6743 = vst [vmem:[#allocation10_spill] sm:$0xff] %v6092_v37  ;;  %v3096_v43 = vsel %vm398_vm0, %v6092_v37, 0.0 }
 0x632   : > { %v6072_v54 = vpop.f32.mrf.mxu3 }
 0x633   : > { %v3038_v2 = vpop.xlane.xlu0 %3037 }
 0x634   : > { %v3139_v22 = vmul.f32 %v6064_v61, %v3038_v2  ;;  %v6129_v2 = vadd.f32 %v5963_v19, %v6059_v14 }
 0x636   : > { %v6068_v52 = vsub.f32 %v5967_v40, %v3139_v22  ;;  %6744 = vst [vmem:[#allocation11_spill] sm:$0xff] %v6129_v2  ;;  %v3090_v14 = vsel %vm398_vm0, %v6129_v2, 0.0 }
 0x638   : > { %v3203_v9 = vmul.f32 %v6068_v52, %v6068_v52 }
 0x63a   : > { %v3235_v16 = vsel %vm398_vm0, %v3203_v9, 0.0  ;;  %v6085_v34 = vpop.f32.mrf.mxu3 }
 0x63b   : > { %3236 = vadd.xlane.f32.xlu1 %v3235_v16  ;;  %v3047_v31 = vpop.xlane.xlu0 %3046 }
 0x63c   : > { %v3142_v57 = vmul.f32 %v6064_v61, %v3047_v31 }
 0x63d   : > { %v2765_v20 = vpop.permute.xlu1 %2764 }
 0x63e   : > { %2830 = vst.msk [vmem:[#allocation5 + $0xf8] sm:$0xff] %vm2798_vm5, %v2765_v20  ;;  %v6081_v51 = vsub.f32 %v5972_v6, %v3142_v57 }
 0x640   : > { %v3206_v18 = vmul.f32 %v6081_v51, %v6081_v51 }
 0x642   : > { %v3244_v21 = vsel %vm398_vm0, %v3206_v18, 0.0  ;;  %v3013_v38 = vpop.f32.mrf.mxu3 }
 0x643   : > { %3088 = vadd.xlane.f32.xlu1 %v3087_v55  ;;  %v3056_v17 = vpop.xlane.xlu0 %3055  ;;  %v6106_v60 = vadd.f32 %v5963_v19, %v3013_v38  ;;  %v6156_v38 = vadd.f32 %v5963_v19, %v6062_v23  ;;  %v6170_v23 = vadd.f32 %v5963_v19, %v6072_v54 }
 0x644   : > { %v3145_v39 = vmul.f32 %v6064_v61, %v3056_v17 }
 0x645   : > { %v2862_v36 = vld [vmem:[#allocation5 + $0xf8] sm:$0xff]  ;;  %v3105_v28 = vsel %vm398_vm0, %v6106_v60, 0.0 }
 0x646   : > { %v2878_v44 = vpack.c.bf16 %v2862_v36, %v2861_v25  ;;  %v6096_v12 = vsub.f32 %v5979_v62, %v3145_v39 }
 0x648   : > { %4082 = vmatmul.msk.bf16.gmra.mxu3 %vm398_vm0, %v2878_v44  ;;  %v3209_v5 = vmul.f32 %v6096_v12, %v6096_v12 }
 0x64a   : > { %v6102_v0 = vpop.f32.mrf.mxu3  ;;  %v3253_v4 = vsel %vm398_vm0, %v3209_v5, 0.0 }
 0x64b   : > { %3245 = vadd.xlane.f32.xlu1 %v3244_v21  ;;  %v3065_v63 = vpop.xlane.xlu0 %3064 }
 0x64c   : > { %v3148_v58 = vmul.f32 %v6064_v61, %v3065_v63 }
 0x64e   : > { %v6113_v50 = vsub.f32 %v5985_v30, %v3148_v58  ;;  %v3093_v58 = vsel %vm398_vm0, %v6156_v38, 0.0 }
 0x650   : > { %v3212_v11 = vmul.f32 %v6113_v50, %v6113_v50 }
 0x652   : > { %v6109_v48 = vpop.f32.mrf.mxu3  ;;  %v3262_v41 = vsel %vm398_vm0, %v3212_v11, 0.0  ;;  %v3099_v11 = vsel %vm398_vm0, %v6170_v23, 0.0 }
 0x653   : > { %3097 = vadd.xlane.f32.xlu1 %v3096_v43 }
 0x65a   : > { %v3021_v22 = vpop.f32.mrf.mxu3 }
 0x65b   : > { %3254 = vadd.xlane.f32.xlu1 %v3253_v4  ;;  %v6136_v57 = vadd.f32 %v5963_v19, %v3021_v22 }
 0x65d   : > { %v3114_v21 = vsel %vm398_vm0, %v6136_v57, 0.0 }
 0x65f   : > { %v3041_v42 = vpop.xlane.xlu2 %3040 }
 0x660   : > { %v3140_v29 = vmul.f32 %v6064_v61, %v3041_v42 }
 0x661   : > { %v3074_v9 = vpop.xlane.xlu0 %3073 }
 0x662   : > { %v6118_v49 = vsub.f32 %v5991_v27, %v3140_v29  ;;  %v3151_v20 = vmul.f32 %v6064_v61, %v3074_v9 }
 0x663   : > { %3106 = vadd.xlane.f32.xlu1 %v3105_v28 }
 0x664   : > { %v3204_v13 = vmul.f32 %v6118_v49, %v6118_v49  ;;  %v6148_v44 = vsub.f32 %v5994_v15, %v3151_v20  ;;  %v6196_v20 = vadd.f32 %v5963_v19, %v6102_v0 }
 0x666   : > { %v3238_v8 = vsel %vm398_vm0, %v3204_v13, 0.0  ;;  %v3215_v43 = vmul.f32 %v6148_v44, %v6148_v44 }
 0x667   : > { %v3050_v59 = vpop.xlane.xlu2 %3049  ;;  %3239 = vadd.xlane.f32.xlu0 %v3238_v8 }
 0x668   : > { %v3044_v7 = vpop.xlane.xlu1 %3043  ;;  %v3143_v16 = vmul.f32 %v6064_v61, %v3050_v59  ;;  %v3271_v42 = vsel %vm398_vm0, %v3215_v43, 0.0 }
 0x669   : > { %v3141_v33 = vmul.f32 %v6064_v61, %v3044_v7  ;;  %v6185_v7 = vadd.f32 %v5963_v19, %v6085_v34 }
 0x66a   : > { %v6142_v25 = vsub.f32 %v6001_v46, %v3143_v16 }
 0x66b   : > { %3263 = vadd.xlane.f32.xlu1 %v3262_v41  ;;  %v6133_v31 = vsub.f32 %v6005_v1, %v3141_v33  ;;  %v3102_v16 = vsel %vm398_vm0, %v6185_v7, 0.0 }
 0x66c   : > { %v3207_v17 = vmul.f32 %v6142_v25, %v6142_v25 }
 0x66d   : > { %v3205_v55 = vmul.f32 %v6133_v31, %v6133_v31 }
 0x66e   : > { %v3247_v5 = vsel %vm398_vm0, %v3207_v17, 0.0 }
 0x66f   : > { %3091 = vadd.xlane.f32.xlu0 %v3090_v14  ;;  %v3241_v36 = vsel %vm398_vm0, %v3205_v55, 0.0  ;;  %v3059_v4 = vpop.xlane.xlu2 %3058  ;;  %v3023_v14 = vpop.f32.mrf.mxu3 }
 0x670   : > { %v3053_v18 = vpop.xlane.xlu1 %3052  ;;  %3242 = vadd.xlane.f32.xlu2 %v3241_v36  ;;  %v3146_v29 = vmul.f32 %v6064_v61, %v3059_v4 }
 0x671   : > { %v3144_v39 = vmul.f32 %v6064_v61, %v3053_v18  ;;  %v3108_v18 = vsel %vm398_vm0, %v6196_v20, 0.0 }
 0x672   : > { %v6176_v13 = vsub.f32 %v6012_v26, %v3146_v29 }
 0x673   : > { %3115 = vadd.xlane.f32.xlu1 %v3114_v21  ;;  %v6163_v63 = vsub.f32 %v6015_v3, %v3144_v39  ;;  %v6211_v39 = vadd.f32 %v5963_v19, %v6109_v48 }
 0x674   : > { %v3210_v54 = vmul.f32 %v6176_v13, %v6176_v13 }
 0x675   : > { %v3208_v28 = vmul.f32 %v6163_v63, %v6163_v63  ;;  %v3111_v29 = vsel %vm398_vm0, %v6211_v39, 0.0 }
 0x676   : > { %v3256_v41 = vsel %vm398_vm0, %v3210_v54, 0.0 }
 0x677   : > { %3248 = vadd.xlane.f32.xlu0 %v3247_v5  ;;  %v3250_v8 = vsel %vm398_vm0, %v3208_v28, 0.0  ;;  %v3068_v22 = vpop.xlane.xlu2 %3067 }
 0x678   : > { %3094 = vadd.xlane.f32.xlu2 %v3093_v58  ;;  %v3062_v59 = vpop.xlane.xlu1 %3061  ;;  %v3149_v34 = vmul.f32 %v6064_v61, %v3068_v22 }
 0x679   : > { %v3147_v33 = vmul.f32 %v6064_v61, %v3062_v59  ;;  %v3083_v28 = vpop.xlane.xlu0 %3082 }
 0x67a   : > { %v6202_v36 = vsub.f32 %v6022_v32, %v3149_v34  ;;  %v3154_v59 = vmul.f32 %v6064_v61, %v3083_v28 }
 0x67b   : > { %3272 = vadd.xlane.f32.xlu1 %v3271_v42  ;;  %v6190_v9 = vsub.f32 %v6025_v56, %v3147_v33 }
 0x67c   : > { %v3213_v0 = vmul.f32 %v6202_v36, %v6202_v36  ;;  %v6237_v34 = vsub.f32 %v6029_v35, %v3154_v59 }
 0x67d   : > { %v3211_v55 = vmul.f32 %v6190_v9, %v6190_v9 }
 0x67e   : > { %v3265_v4 = vsel %vm398_vm0, %v3213_v0, 0.0 }
 0x67f   : > { %3100 = vadd.xlane.f32.xlu0 %v3099_v11  ;;  %v3259_v21 = vsel %vm398_vm0, %v3211_v55, 0.0  ;;  %v3077_v58 = vpop.xlane.xlu2 %3076  ;;  %v6221_v11 = vadd.f32 %v5963_v19, %v3023_v14 }
 0x680   : > { %3251 = vadd.xlane.f32.xlu2 %v3250_v8  ;;  %v3071_v17 = vpop.xlane.xlu1 %3070  ;;  %v3152_v48 = vmul.f32 %v6064_v61, %v3077_v58 }
 0x681   : > { %v3150_v43 = vmul.f32 %v6064_v61, %v3071_v17  ;;  %v3117_v22 = vsel %vm398_vm0, %v6221_v11, 0.0 }
 0x682   : > { %v6228_v33 = vsub.f32 %v6038_v45, %v3152_v48 }
 0x683   : > { %v6216_v42 = vsub.f32 %v6041_v53, %v3150_v43 }
 0x684   : > { %v3216_v14 = vmul.f32 %v6228_v33, %v6228_v33 }
 0x685   : > { %v3214_v8 = vmul.f32 %v6216_v42, %v6216_v42 }
 0x686   : > { %v3274_v0 = vsel %vm398_vm0, %v3216_v14, 0.0 }
 0x687   : > { %3257 = vadd.xlane.f32.xlu0 %v3256_v41 }
 0x688   : > { %3103 = vadd.xlane.f32.xlu2 %v3102_v16  ;;  %v3268_v16 = vsel %vm398_vm0, %v3214_v8, 0.0  ;;  %v3080_v17 = vpop.xlane.xlu1 %3079 }
 0x68f   : > { %3109 = vadd.xlane.f32.xlu0 %v3108_v18 }
 0x690   : > { %3260 = vadd.xlane.f32.xlu2 %v3259_v21  ;;  %v3218_v21 = vmul.f32 %v6237_v34, %v6237_v34 }
 0x696   : > { %v3026_v5 = vpop.f32.mrf.mxu3 }
 0x697   : > { %3266 = vadd.xlane.f32.xlu0 %v3265_v4  ;;  %v6244_v18 = vadd.f32 %v5963_v19, %v3026_v5  ;;  %v3280_v4 = vsel %vm398_vm0, %v3218_v21, 0.0  ;;  %v6257_v21 = vld [vmem:[%s6715_s7] ss:$0 sm:$0xff] }
 0x698   : > { %3112 = vadd.xlane.f32.xlu2 %v3111_v29 }
 0x699   : > { %v3120_v43 = vsel %vm398_vm0, %v6244_v18, 0.0 }
 0x69e   : > { %v3028_v54 = vpop.f32.mrf.mxu3 }
 0x69f   : > { %v6231_v41 = vadd.f32 %v5963_v19, %v3028_v54  ;;  %3118 = vadd.xlane.f32.xlu0 %v3117_v22 }
 0x6a0   : > { %3269 = vadd.xlane.f32.xlu2 %v3268_v16 }
 0x6a1   : > { %v3123_v55 = vsel %vm398_vm0, %v6231_v41, 0.0 }
 0x6a2   : > { %3124 = vadd.xlane.f32.xlu1 %v3123_v55 }
 0x6a7   : > { %3275 = vadd.xlane.f32.xlu0 %v3274_v0 }
 0x6a8   : > { %3121 = vadd.xlane.f32.xlu2 %v3120_v43 }
 0x6aa   : > { %3281 = vadd.xlane.f32.xlu1 %v3280_v4  ;;  %v6262_v4 = vld [vmem:[%s6716_s8] ss:$0 sm:$0xff] }
 0x6ae   : > { %v3237_v58 = vpop.xlane.xlu1 %3236 }
 0x6af   : > { %v3331_v29 = vmul.f32 %v3237_v58, %v6064_v61 }
 0x6b1   : > { %v3363_v28 = vadd.f32 1e-05, %v3331_v29 }
 0x6b3   : > { %4384 = vrsqrt.f32 %v3363_v28  ;;  %vm3401_vm8 = vweird.f32 %v3363_v28 }
 0x6b6   : > { %v3089_v5 = vpop.xlane.xlu1 %3088 }
 0x6b9   : > { %v4385_v48 = vpop.eup %4384 }
 0x6ba   : > { %v3396_v8 = vmul.f32 %v4385_v48, %v3363_v28  ;;  %vm3402_vm7 = vweird.f32 %v4385_v48 }
 0x6bb   : > { %vm3403_vm9 = vmor %vm3401_vm8, %vm3402_vm7 }
 0x6bc   : > { %v3397_v59 = vmul.f32 %v4385_v48, %v3396_v8 }
 0x6be   : > { %v3398_v54 = vmul.f32 0.5, %v3397_v59  ;;  %v3246_v22 = vpop.xlane.xlu1 %3245  ;;  %v3086_v59 = vpop.xlane.xlu2 %3085 }
 0x6bf   : > { %v3334_v16 = vmul.f32 %v3246_v22, %v6064_v61  ;;  %v3155_v22 = vmul.f32 %v6064_v61, %v3086_v59 }
 0x6c0   : > { %v3399_v55 = vsub.f32 1.5, %v3398_v54 }
 0x6c1   : > { %v3366_v14 = vadd.f32 1e-05, %v3334_v16 }
 0x6c2   : > { %v3400_v0 = vmul.f32 %v4385_v48, %v3399_v55 }
 0x6c3   : > { %4386 = vrsqrt.f32 %v3366_v14  ;;  %vm3431_vm11 = vweird.f32 %v3366_v14 }
 0x6c4   : > { %v3404_v43 = vsel %vm3403_vm9, %v4385_v48, %v3400_v0 }
 0x6c5   : > { %v3715_v58 = vmul.f32 %v3404_v43, %v6068_v52 }
 0x6c6   : > { %v3098_v29 = vpop.xlane.xlu1 %3097 }
 0x6c7   : > { %v3751_v8 = vmul.f32 %v6257_v21, %v3715_v58 }
 0x6c9   : > { %v4387_v28 = vpop.eup %4386  ;;  %v3787_v54 = vadd.f32 %v6262_v4, %v3751_v8  ;;  %v6282_v8 = vsub.f32 %v6049_v24, %v3155_v22 }
 0x6ca   : > { %v3426_v48 = vmul.f32 %v4387_v28, %v3366_v14  ;;  %vm3432_vm10 = vweird.f32 %v4387_v28 }
 0x6cb   : > { %v3819_v16 = vadd.f32 %v3787_v54, %v5967_v40  ;;  %v3031_v55 = vpop.f32.mrf.mxu3  ;;  %vm3433_vm12 = vmor %vm3431_vm11, %vm3432_vm10 }
 0x6cc   : > { %v3427_v52 = vmul.f32 %v4387_v28, %v3426_v48  ;;  %v6279_v0 = vadd.f32 %v5963_v19, %v3031_v55  ;;  %v3153_v48 = vmul.f32 %v6064_v61, %v3080_v17 }
 0x6cd   : > { %3851 = vst.msk [vmem:[%s6272_s21] sm:$0xff] %vm398_vm0, %v3819_v16  ;;  %v3219_v16 = vmul.f32 %v6282_v8, %v6282_v8 }
 0x6ce   : > { %v3428_v43 = vmul.f32 0.5, %v3427_v52  ;;  %v3255_v58 = vpop.xlane.xlu1 %3254  ;;  %v3126_v45 = vsel %vm398_vm0, %v6279_v0, 0.0 }
 0x6cf   : > { %v3337_v35 = vmul.f32 %v3255_v58, %v6064_v61  ;;  %3127 = vadd.xlane.f32.xlu0 %v3126_v45  ;;  %v3283_v17 = vsel %vm398_vm0, %v3219_v16, 0.0 }
 0x6d0   : > { %v3429_v59 = vsub.f32 1.5, %v3428_v43 }
 0x6d1   : > { %v3369_v40 = vadd.f32 1e-05, %v3337_v35  ;;  %v6295_v35 = vsub.f32 %v6052_v47, %v3153_v48 }
 0x6d2   : > { %v3430_v54 = vmul.f32 %v4387_v28, %v3429_v59 }
 0x6d3   : > { %4388 = vrsqrt.f32 %v3369_v40  ;;  %v3033_v52 = vpop.f32.mrf.mxu3  ;;  %v3217_v48 = vmul.f32 %v6295_v35, %v6295_v35  ;;  %vm3461_vm14 = vweird.f32 %v3369_v40 }
 0x6d4   : > { %v3434_v22 = vsel %vm3433_vm12, %v4387_v28, %v3430_v54  ;;  %v6292_v58 = vadd.f32 %v5963_v19, %v3033_v52  ;;  %v3156_v19 = vmul.f32 %v6064_v61, %v3089_v5 }
 0x6d5   : > { %v3718_v55 = vmul.f32 %v3434_v22, %v6081_v51  ;;  %v3277_v5 = vsel %vm398_vm0, %v3217_v48, 0.0 }
 0x6d6   : > { %v3107_v43 = vpop.xlane.xlu1 %3106  ;;  %v3129_v14 = vsel %vm398_vm0, %v6292_v58, 0.0  ;;  %v6310_v47 = vsub.f32 %v6076_v10, %v3156_v19 }
 0x6d7   : > { %v3754_v45 = vmul.f32 %v6257_v21, %v3718_v55  ;;  %3284 = vadd.xlane.f32.xlu0 %v3283_v17  ;;  %3130 = vadd.xlane.f32.xlu2 %v3129_v14 }
 0x6d8   : > { %6745 = vst [vmem:[#allocation12_spill] sm:$0xff] %v6310_v47  ;;  %v3220_v19 = vmul.f32 %v6310_v47, %v6310_v47 }
 0x6d9   : > { %v4389_v28 = vpop.eup %4388  ;;  %v3790_v51 = vadd.f32 %v6262_v4, %v3754_v45 }
 0x6da   : > { %v3456_v59 = vmul.f32 %v4389_v28, %v3369_v40  ;;  %v3240_v22 = vpop.xlane.xlu0 %3239  ;;  %vm3462_vm13 = vweird.f32 %v4389_v28 }
 0x6db   : > { %v3822_v54 = vadd.f32 %v3790_v51, %v5972_v6  ;;  %v3332_v16 = vmul.f32 %v3240_v22, %v6064_v61  ;;  %vm3463_vm15 = vmor %vm3461_vm14, %vm3462_vm13 }
 0x6dc   : > { %v3457_v52 = vmul.f32 %v4389_v28, %v3456_v59  ;;  %v3159_v59 = vmul.f32 %v6064_v61, %v3098_v29 }
 0x6dd   : > { %3854 = vst.msk [vmem:[%s6272_s21 + $0x18] sm:$0xff] %vm398_vm0, %v3822_v54  ;;  %v3364_v17 = vadd.f32 1e-05, %v3332_v16 }
 0x6de   : > { %v3458_v55 = vmul.f32 0.5, %v3457_v52  ;;  %v3264_v14 = vpop.xlane.xlu1 %3263  ;;  %v6324_v29 = vsub.f32 %v6092_v37, %v3159_v59 }
 0x6df   : > { %v3340_v45 = vmul.f32 %v3264_v14, %v6064_v61  ;;  %4390 = vrsqrt.f32 %v3364_v17  ;;  %3278 = vadd.xlane.f32.xlu2 %v3277_v5  ;;  %vm3411_vm2 = vweird.f32 %v3364_v17 }
 0x6e0   : > { %v3459_v6 = vsub.f32 1.5, %v3458_v55  ;;  %6746 = vst [vmem:[#allocation13_spill] sm:$0xff] %v6324_v29 }
 0x6e1   : > { %v6314_v51 = vadd.f32 1e-05, %v3340_v45 }
 0x6e2   : > { %v3460_v22 = vmul.f32 %v4389_v28, %v3459_v6  ;;  %v3092_v54 = vpop.xlane.xlu0 %3091 }
 0x6e3   : > { %4392 = vrsqrt.f32 %v6314_v51  ;;  %v3157_v48 = vmul.f32 %v6064_v61, %v3092_v54  ;;  %v3243_v16 = vpop.xlane.xlu2 %3242  ;;  %vm3491_vm5 = vweird.f32 %v6314_v51 }
 0x6e4   : > { %v3464_v52 = vsel %vm3463_vm15, %v4389_v28, %v3460_v22  ;;  %v3333_v14 = vmul.f32 %v3243_v16, %v6064_v61  ;;  %v3286_v28 = vsel %vm398_vm0, %v3220_v19, 0.0  ;;  %v3223_v19 = vmul.f32 %v6324_v29, %v6324_v29 }
 0x6e5   : > { %v3721_v55 = vmul.f32 %v3464_v52, %v6096_v12  ;;  %v4391_v45 = vpop.eup %4390  ;;  %v6327_v40 = vsub.f32 %v6129_v2, %v3157_v48  ;;  %v3162_v52 = vmul.f32 %v6064_v61, %v3107_v43 }
 0x6e6   : > { %v3116_v5 = vpop.xlane.xlu1 %3115  ;;  %v3406_v10 = vmul.f32 %v4391_v45, %v3364_v17  ;;  %v6330_v47 = vadd.f32 1e-05, %v3333_v14  ;;  %vm3412_vm1 = vweird.f32 %v4391_v45 }
 0x6e7   : > { %6747 = vst [vmem:[#allocation14_spill] sm:$0xff] %v6327_v40  ;;  %v3757_v6 = vmul.f32 %v6257_v21, %v3721_v55  ;;  %3287 = vadd.xlane.f32.xlu2 %v3286_v28  ;;  %v3221_v12 = vmul.f32 %v6327_v40, %v6327_v40  ;;  %vm3413_vm3 = vmor %vm3411_vm2, %vm3412_vm1 }
 0x6e8   : > { %v3407_v54 = vmul.f32 %v4391_v45, %v3406_v10  ;;  %4394 = vrsqrt.f32 %v6330_v47  ;;  %vm3421_vm8 = vweird.f32 %v6330_v47 }
 0x6e9   : > { %v4393_v22 = vpop.eup %4392  ;;  %v3793_v59 = vadd.f32 %v6262_v4, %v3757_v6  ;;  %v3289_v16 = vsel %vm398_vm0, %v3221_v12, 0.0  ;;  %v6348_v12 = vsub.f32 %v6106_v60, %v3162_v52 }
 0x6ea   : > { %v3486_v48 = vmul.f32 %v4393_v22, %v6314_v51  ;;  %v3408_v14 = vmul.f32 0.5, %v3407_v54  ;;  %3290 = vadd.xlane.f32.xlu1 %v3289_v16  ;;  %v3249_v28 = vpop.xlane.xlu0 %3248  ;;  %vm3492_vm4 = vweird.f32 %v4393_v22 }
 0x6eb   : > { %v3825_v55 = vadd.f32 %v3793_v59, %v5979_v62  ;;  %v3335_v6 = vmul.f32 %v3249_v28, %v6064_v61  ;;  %v3095_v10 = vpop.xlane.xlu2 %3094  ;;  %v3295_v59 = vsel %vm398_vm0, %v3223_v19, 0.0  ;;  %v3165_v28 = vmul.f32 %v6064_v61, %v3116_v5  ;;  %vm3493_vm6 = vmor %vm3491_vm5, %vm3492_vm4 }
 0x6ec   : > { %v3487_v37 = vmul.f32 %v4393_v22, %v3486_v48  ;;  %v3409_v2 = vsub.f32 1.5, %v3408_v14  ;;  %v3158_v43 = vmul.f32 %v6064_v61, %v3095_v10 }
 0x6ed   : > { %3857 = vst.msk [vmem:[%s6272_s21 + $0x30] sm:$0xff] %vm398_vm0, %v3825_v55  ;;  %v6350_v29 = vadd.f32 1e-05, %v3335_v6 }
 0x6ee   : > { %v3488_v40 = vmul.f32 0.5, %v3487_v37  ;;  %v3273_v62 = vpop.xlane.xlu1 %3272  ;;  %v4395_v54 = vpop.eup %4394  ;;  %v3410_v48 = vmul.f32 %v4391_v45, %v3409_v2  ;;  %v6354_v16 = vsub.f32 %v6156_v38, %v3158_v43 }
 0x6ef   : > { %v3343_v55 = vmul.f32 %v3273_v62, %v6064_v61  ;;  %v3416_v52 = vmul.f32 %v4395_v54, %v6330_v47  ;;  %4396 = vrsqrt.f32 %v6350_v29  ;;  %3296 = vadd.xlane.f32.xlu2 %v3295_v59  ;;  %vm3422_vm7 = vweird.f32 %v4395_v54 }
 0x6f0   : > { %v3489_v14 = vsub.f32 1.5, %v3488_v40  ;;  %v3414_v37 = vsel %vm3413_vm3, %v4391_v45, %v3410_v48  ;;  %v3222_v2 = vmul.f32 %v6354_v16, %v6354_v16  ;;  %v3226_v45 = vmul.f32 %v6348_v12, %v6348_v12  ;;  %vm3423_vm9 = vmor %vm3421_vm8, %vm3422_vm7 }
 0x6f1   : > { %v6360_v19 = vadd.f32 1e-05, %v3343_v55  ;;  %v3716_v17 = vmul.f32 %v3414_v37, %v6118_v49  ;;  %v3417_v40 = vmul.f32 %v4395_v54, %v3416_v52  ;;  %v6374_v55 = vsub.f32 %v6136_v57, %v3165_v28 }
 0x6f2   : > { %v3490_v6 = vmul.f32 %v4393_v22, %v3489_v14  ;;  %v3101_v10 = vpop.xlane.xlu0 %3100  ;;  %v3292_v43 = vsel %vm398_vm0, %v3222_v2, 0.0  ;;  %vm3441_vm11 = vweird.f32 %v6350_v29 }
 0x6f3   : > { %4398 = vrsqrt.f32 %v6360_v19  ;;  %v3752_v5 = vmul.f32 %v6257_v21, %v3716_v17  ;;  %v3418_v59 = vmul.f32 0.5, %v3417_v40  ;;  %v3160_v48 = vmul.f32 %v6064_v61, %v3101_v10  ;;  %v3252_v49 = vpop.xlane.xlu2 %3251  ;;  %3293 = vadd.xlane.f32.xlu0 %v3292_v43 }
 0x6f4   : > { %v3494_v62 = vsel %vm3493_vm6, %v4393_v22, %v3490_v6  ;;  %v3336_v14 = vmul.f32 %v3252_v49, %v6064_v61  ;;  %v3229_v47 = vmul.f32 %v6374_v55, %v6374_v55  ;;  %vm3521_vm14 = vweird.f32 %v6360_v19 }
 0x6f5   : > { %v3724_v51 = vmul.f32 %v3494_v62, %v6113_v50  ;;  %v4397_v52 = vpop.eup %4396  ;;  %v3788_v37 = vadd.f32 %v6262_v4, %v3752_v5  ;;  %v3419_v2 = vsub.f32 1.5, %v3418_v59  ;;  %v6379_v22 = vsub.f32 %v6170_v23, %v3160_v48 }
 0x6f6   : > { %v3436_v6 = vmul.f32 %v4397_v52, %v6350_v29  ;;  %v6383_v40 = vadd.f32 1e-05, %v3336_v14  ;;  %v3304_v50 = vsel %vm398_vm0, %v3226_v45, 0.0  ;;  %vm3442_vm10 = vweird.f32 %v4397_v52 }
 0x6f7   : > { %v3760_v17 = vmul.f32 %v6257_v21, %v3724_v51  ;;  %v3820_v28 = vadd.f32 %v3788_v37, %v5991_v27  ;;  %v3420_v10 = vmul.f32 %v4395_v54, %v3419_v2  ;;  %3305 = vadd.xlane.f32.xlu2 %v3304_v50  ;;  %v3224_v43 = vmul.f32 %v6379_v22, %v6379_v22  ;;  %vm3443_vm12 = vmor %vm3441_vm11, %vm3442_vm10 }
 0x6f8   : > { %v3437_v59 = vmul.f32 %v4397_v52, %v3436_v6  ;;  %4400 = vrsqrt.f32 %v6383_v40  ;;  %vm3451_vm2 = vweird.f32 %v6383_v40 }
 0x6f9   : > { %v4399_v5 = vpop.eup %4398  ;;  %v3796_v62 = vadd.f32 %v6262_v4, %v3760_v17  ;;  %3852 = vst.msk [vmem:[%s6272_s21 + $0x8] sm:$0xff] %vm398_vm0, %v3820_v28  ;;  %v3424_v45 = vsel %vm3423_vm9, %v4395_v54, %v3420_v10  ;;  %v3298_v48 = vsel %vm398_vm0, %v3224_v43, 0.0 }
 0x6fa   : > { %v3516_v27 = vmul.f32 %v4399_v5, %v6360_v19  ;;  %v3717_v51 = vmul.f32 %v3424_v45, %v6133_v31  ;;  %v3438_v14 = vmul.f32 0.5, %v3437_v59  ;;  %3299 = vadd.xlane.f32.xlu1 %v3298_v48  ;;  %v3258_v37 = vpop.xlane.xlu0 %3257  ;;  %vm3522_vm13 = vweird.f32 %v4399_v5 }
 0x6fb   : > { %v3828_v49 = vadd.f32 %v3796_v62, %v5985_v30  ;;  %v3338_v17 = vmul.f32 %v3258_v37, %v6064_v61  ;;  %v3104_v6 = vpop.xlane.xlu2 %3103  ;;  %v3313_v30 = vsel %vm398_vm0, %v3229_v47, 0.0  ;;  %vm3523_vm15 = vmor %vm3521_vm14, %vm3522_vm13 }
 0x6fc   : > { %v3517_v2 = vmul.f32 %v4399_v5, %v3516_v27  ;;  %v3753_v54 = vmul.f32 %v6257_v21, %v3717_v51  ;;  %v3439_v50 = vsub.f32 1.5, %v3438_v14  ;;  %v3161_v28 = vmul.f32 %v6064_v61, %v3104_v6 }
 0x6fd   : > { %3860 = vst.msk [vmem:[%s6272_s21 + $0x48] sm:$0xff] %vm398_vm0, %v3828_v49  ;;  %v6405_v43 = vadd.f32 1e-05, %v3338_v17 }
 0x6fe   : > { %v3518_v10 = vmul.f32 0.5, %v3517_v2  ;;  %v4401_v31 = vpop.eup %4400  ;;  %v3789_v62 = vadd.f32 %v6262_v4, %v3753_v54  ;;  %v3440_v59 = vmul.f32 %v4397_v52, %v3439_v50  ;;  %v6411_v45 = vsub.f32 %v6185_v7, %v3161_v28 }
 0x6ff   : > { %v3446_v48 = vmul.f32 %v4401_v31, %v6383_v40  ;;  %4402 = vrsqrt.f32 %v6405_v43  ;;  %3314 = vadd.xlane.f32.xlu2 %v3313_v30  ;;  %vm3452_vm1 = vweird.f32 %v4401_v31  ;;  %vm3471_vm5 = vweird.f32 %v6405_v43 }
 0x700   : > { %v3519_v27 = vsub.f32 1.5, %v3518_v10  ;;  %v3821_v47 = vadd.f32 %v3789_v62, %v6005_v1  ;;  %v3444_v49 = vsel %vm3443_vm12, %v4397_v52, %v3440_v59  ;;  %v3225_v51 = vmul.f32 %v6411_v45, %v6411_v45  ;;  %vm3453_vm3 = vmor %vm3451_vm2, %vm3452_vm1 }
 0x701   : > { %v3719_v14 = vmul.f32 %v3444_v49, %v6142_v25  ;;  %v3447_v37 = vmul.f32 %v4401_v31, %v3446_v48 }
 0x702   : > { %v3520_v29 = vmul.f32 %v4399_v5, %v3519_v27  ;;  %3853 = vst.msk [vmem:[%s6272_s21 + $0x10] sm:$0xff] %vm398_vm0, %v3821_v47  ;;  %v3110_v2 = vpop.xlane.xlu0 %3109  ;;  %v3301_v17 = vsel %vm398_vm0, %v3225_v51, 0.0 }
 0x703   : > { %v3755_v6 = vmul.f32 %v6257_v21, %v3719_v14  ;;  %v3448_v1 = vmul.f32 0.5, %v3447_v37  ;;  %v3163_v52 = vmul.f32 %v6064_v61, %v3110_v2  ;;  %v3261_v50 = vpop.xlane.xlu2 %3260  ;;  %3302 = vadd.xlane.f32.xlu0 %v3301_v17 }
 0x704   : > { %v3524_v54 = vsel %vm3523_vm15, %v4399_v5, %v3520_v29  ;;  %v3339_v28 = vmul.f32 %v3261_v50, %v6064_v61 }
 0x705   : > { %v3727_v25 = vmul.f32 %v3524_v54, %v6148_v44  ;;  %v4403_v19 = vpop.eup %4402  ;;  %v3791_v10 = vadd.f32 %v6262_v4, %v3755_v6  ;;  %v3449_v30 = vsub.f32 1.5, %v3448_v1  ;;  %v6429_v62 = vsub.f32 %v6196_v20, %v3163_v52 }
 0x706   : > { %v3466_v59 = vmul.f32 %v4403_v19, %v6405_v43  ;;  %v3371_v27 = vadd.f32 1e-05, %v3339_v28  ;;  %vm3472_vm4 = vweird.f32 %v4403_v19 }
 0x707   : > { %v3763_v5 = vmul.f32 %v6257_v21, %v3727_v25  ;;  %v3823_v48 = vadd.f32 %v3791_v10, %v6001_v46  ;;  %v3450_v47 = vmul.f32 %v4401_v31, %v3449_v30  ;;  %v3227_v44 = vmul.f32 %v6429_v62, %v6429_v62  ;;  %vm3473_vm6 = vmor %vm3471_vm5, %vm3472_vm4 }
 0x708   : > { %v3467_v51 = vmul.f32 %v4403_v19, %v3466_v59  ;;  %4404 = vrsqrt.f32 %v3371_v27  ;;  %vm3481_vm8 = vweird.f32 %v3371_v27 }
 0x709   : > { %v3799_v49 = vadd.f32 %v6262_v4, %v3763_v5  ;;  %3855 = vst.msk [vmem:[%s6272_s21 + $0x20] sm:$0xff] %vm398_vm0, %v3823_v48  ;;  %v3454_v14 = vsel %vm3453_vm3, %v4401_v31, %v3450_v47  ;;  %v3307_v29 = vsel %vm398_vm0, %v3227_v44, 0.0 }
 0x70a   : > { %v3720_v46 = vmul.f32 %v3454_v14, %v6163_v63  ;;  %v3468_v2 = vmul.f32 0.5, %v3467_v51  ;;  %3308 = vadd.xlane.f32.xlu1 %v3307_v29  ;;  %v3267_v40 = vpop.xlane.xlu0 %3266 }
 0x70b   : > { %v3831_v37 = vadd.f32 %v3799_v49, %v5994_v15  ;;  %v3341_v17 = vmul.f32 %v3267_v40, %v6064_v61  ;;  %v3113_v6 = vpop.xlane.xlu2 %3112 }
 0x70c   : > { %v3756_v54 = vmul.f32 %v6257_v21, %v3720_v46  ;;  %v3469_v1 = vsub.f32 1.5, %v3468_v2  ;;  %v3164_v31 = vmul.f32 %v6064_v61, %v3113_v6 }
 0x70d   : > { %3863 = vst.msk [vmem:[%s6272_s21 + $0x60] sm:$0xff] %vm398_vm0, %v3831_v37  ;;  %v6448_v52 = vadd.f32 1e-05, %v3341_v17 }
 0x70e   : > { %v4405_v15 = vpop.eup %4404  ;;  %v3792_v63 = vadd.f32 %v6262_v4, %v3756_v54  ;;  %v3470_v50 = vmul.f32 %v4403_v19, %v3469_v1  ;;  %v6453_v25 = vsub.f32 %v6211_v39, %v3164_v31 }
 0x70f   : > { %v3476_v28 = vmul.f32 %v4405_v15, %v3371_v27  ;;  %4406 = vrsqrt.f32 %v6448_v52  ;;  %vm3482_vm7 = vweird.f32 %v4405_v15  ;;  %vm3501_vm11 = vweird.f32 %v6448_v52 }
 0x710   : > { %v3824_v10 = vadd.f32 %v3792_v63, %v6015_v3  ;;  %v3474_v30 = vsel %vm3473_vm6, %v4403_v19, %v3470_v50  ;;  %v3228_v5 = vmul.f32 %v6453_v25, %v6453_v25  ;;  %vm3483_vm9 = vmor %vm3481_vm8, %vm3482_vm7 }
 0x711   : > { %v3722_v59 = vmul.f32 %v3474_v30, %v6176_v13  ;;  %v3477_v48 = vmul.f32 %v4405_v15, %v3476_v28 }
 0x712   : > { %3856 = vst.msk [vmem:[%s6272_s21 + $0x28] sm:$0xff] %vm398_vm0, %v3824_v10  ;;  %v3119_v47 = vpop.xlane.xlu0 %3118  ;;  %v3310_v43 = vsel %vm398_vm0, %v3228_v5, 0.0 }
 0x713   : > { %v3758_v44 = vmul.f32 %v6257_v21, %v3722_v59  ;;  %v3478_v49 = vmul.f32 0.5, %v3477_v48  ;;  %v3166_v51 = vmul.f32 %v6064_v61, %v3119_v47  ;;  %v3270_v14 = vpop.xlane.xlu2 %3269  ;;  %3311 = vadd.xlane.f32.xlu0 %v3310_v43 }
 0x714   : > { %v3342_v3 = vmul.f32 %v3270_v14, %v6064_v61 }
 0x715   : > { %v3125_v19 = vpop.xlane.xlu1 %3124  ;;  %v4407_v29 = vpop.eup %4406  ;;  %v3794_v13 = vadd.f32 %v6262_v4, %v3758_v44  ;;  %v3479_v37 = vsub.f32 1.5, %v3478_v49  ;;  %v6468_v46 = vsub.f32 %v6221_v11, %v3166_v51 }
 0x716   : > { %v3168_v2 = vmul.f32 %v6064_v61, %v3125_v19  ;;  %v3496_v40 = vmul.f32 %v4407_v29, %v6448_v52  ;;  %v3374_v17 = vadd.f32 1e-05, %v3342_v3  ;;  %vm3502_vm10 = vweird.f32 %v4407_v29 }
 0x717   : > { %v3826_v6 = vadd.f32 %v3794_v13, %v6012_v26  ;;  %v3480_v54 = vmul.f32 %v4405_v15, %v3479_v37  ;;  %v3230_v31 = vmul.f32 %v6468_v46, %v6468_v46  ;;  %vm3503_vm12 = vmor %vm3501_vm11, %vm3502_vm10 }
 0x718   : > { %v6474_v1 = vsub.f32 %v6231_v41, %v3168_v2  ;;  %v3497_v63 = vmul.f32 %v4407_v29, %v3496_v40  ;;  %4408 = vrsqrt.f32 %v3374_v17  ;;  %vm3511_vm14 = vweird.f32 %v3374_v17 }
 0x719   : > { %3858 = vst.msk [vmem:[%s6272_s21 + $0x38] sm:$0xff] %vm398_vm0, %v3826_v6  ;;  %v3484_v50 = vsel %vm3483_vm9, %v4405_v15, %v3480_v54  ;;  %v3316_v27 = vsel %vm398_vm0, %v3230_v31, 0.0 }
 0x71a   : > { %v3232_v28 = vmul.f32 %v6474_v1, %v6474_v1  ;;  %v3723_v26 = vmul.f32 %v3484_v50, %v6190_v9  ;;  %v3498_v10 = vmul.f32 0.5, %v3497_v63  ;;  %3317 = vadd.xlane.f32.xlu1 %v3316_v27  ;;  %v3276_v30 = vpop.xlane.xlu0 %3275 }
 0x71b   : > { %v3344_v5 = vmul.f32 %v3276_v30, %v6064_v61  ;;  %v3122_v59 = vpop.xlane.xlu2 %3121 }
 0x71c   : > { %v3322_v48 = vsel %vm398_vm0, %v3232_v28, 0.0  ;;  %v3759_v47 = vmul.f32 %v6257_v21, %v3723_v26  ;;  %v3499_v43 = vsub.f32 1.5, %v3498_v10  ;;  %v3167_v15 = vmul.f32 %v6064_v61, %v3122_v59 }
 0x71d   : > { %3323 = vadd.xlane.f32.xlu2 %v3322_v48  ;;  %v3282_v44 = vpop.xlane.xlu1 %3281  ;;  %v3376_v49 = vadd.f32 1e-05, %v3344_v5 }
 0x71e   : > { %v3346_v9 = vmul.f32 %v3282_v44, %v6064_v61  ;;  %v4409_v51 = vpop.eup %4408  ;;  %v3795_v14 = vadd.f32 %v6262_v4, %v3759_v47  ;;  %v3500_v3 = vmul.f32 %v4407_v29, %v3499_v43  ;;  %v6493_v19 = vsub.f32 %v6244_v18, %v3167_v15 }
 0x71f   : > { %v3506_v13 = vmul.f32 %v4409_v51, %v3374_v17  ;;  %4410 = vrsqrt.f32 %v3376_v49  ;;  %vm3512_vm13 = vweird.f32 %v4409_v51  ;;  %vm3531_vm2 = vweird.f32 %v3376_v49 }
 0x720   : > { %v3827_v37 = vadd.f32 %v3795_v14, %v6025_v56  ;;  %v3504_v2 = vsel %vm3503_vm12, %v4407_v29, %v3500_v3  ;;  %v3378_v40 = vadd.f32 1e-05, %v3346_v9  ;;  %v3231_v6 = vmul.f32 %v6493_v19, %v6493_v19  ;;  %vm3513_vm15 = vmor %vm3511_vm14, %vm3512_vm13 }
 0x721   : > { %v3725_v54 = vmul.f32 %v3504_v2, %v6202_v36  ;;  %v3507_v31 = vmul.f32 %v4409_v51, %v3506_v13 }
 0x722   : > { %3859 = vst.msk [vmem:[%s6272_s21 + $0x40] sm:$0xff] %vm398_vm0, %v3827_v37  ;;  %4412 = vrsqrt.f32 %v3378_v40  ;;  %v3319_v52 = vsel %vm398_vm0, %v3231_v6, 0.0  ;;  %vm3551_vm5 = vweird.f32 %v3378_v40 }
 0x723   : > { %v3761_v63 = vmul.f32 %v6257_v21, %v3725_v54  ;;  %v3508_v50 = vmul.f32 0.5, %v3507_v31  ;;  %3320 = vadd.xlane.f32.xlu0 %v3319_v52  ;;  %v6748_v31 = vld [vmem:[#allocation8_spill] sm:$0xff] }
 0x725   : > { %v4411_v27 = vpop.eup %4410  ;;  %v3797_v56 = vadd.f32 %v6262_v4, %v3761_v63  ;;  %v3509_v29 = vsub.f32 1.5, %v3508_v50 }
 0x726   : > { %v3526_v28 = vmul.f32 %v4411_v27, %v3376_v49  ;;  %vm3532_vm1 = vweird.f32 %v4411_v27 }
 0x727   : > { %v3829_v26 = vadd.f32 %v3797_v56, %v6022_v32  ;;  %v3510_v36 = vmul.f32 %v4409_v51, %v3509_v29  ;;  %vm3533_vm3 = vmor %vm3531_vm2, %vm3532_vm1 }
 0x728   : > { %v4413_v10 = vpop.eup %4412  ;;  %v3527_v30 = vmul.f32 %v4411_v27, %v3526_v28 }
 0x729   : > { %3861 = vst.msk [vmem:[%s6272_s21 + $0x50] sm:$0xff] %vm398_vm0, %v3829_v26  ;;  %v3514_v5 = vsel %vm3513_vm15, %v4409_v51, %v3510_v36  ;;  %v3546_v59 = vmul.f32 %v4413_v10, %v3378_v40  ;;  %vm3552_vm4 = vweird.f32 %v4413_v10 }
 0x72a   : > { %v3726_v48 = vmul.f32 %v3514_v5, %v6216_v42  ;;  %v3528_v47 = vmul.f32 0.5, %v3527_v30  ;;  %vm3553_vm6 = vmor %vm3551_vm5, %vm3552_vm4 }
 0x72b   : > { %v3547_v43 = vmul.f32 %v4413_v10, %v3546_v59 }
 0x72c   : > { %v3762_v15 = vmul.f32 %v6257_v21, %v3726_v48  ;;  %v3529_v44 = vsub.f32 1.5, %v3528_v47 }
 0x72d   : > { %v3548_v9 = vmul.f32 0.5, %v3547_v43 }
 0x72e   : > { %v3798_v32 = vadd.f32 %v6262_v4, %v3762_v15  ;;  %v3530_v17 = vmul.f32 %v4411_v27, %v3529_v44 }
 0x72f   : > { %v3549_v14 = vsub.f32 1.5, %v3548_v9 }
 0x730   : > { %v3830_v51 = vadd.f32 %v3798_v32, %v6041_v53  ;;  %v3534_v42 = vsel %vm3533_vm3, %v4411_v27, %v3530_v17 }
 0x731   : > { %v3728_v3 = vmul.f32 %v3534_v42, %v6228_v33  ;;  %v3550_v13 = vmul.f32 %v4413_v10, %v3549_v14  ;;  %v6749_v33 = vld [vmem:[#allocation6_spill] sm:$0xff] }
 0x732   : > { %3862 = vst.msk [vmem:[%s6272_s21 + $0x58] sm:$0xff] %vm398_vm0, %v3830_v51 }
 0x733   : > { %v3764_v37 = vmul.f32 %v6257_v21, %v3728_v3  ;;  %v3554_v2 = vsel %vm3553_vm6, %v4413_v10, %v3550_v13 }
 0x734   : > { %v3730_v49 = vmul.f32 %v3554_v2, %v6237_v34 }
 0x735   : > { %v3800_v6 = vadd.f32 %v6262_v4, %v3764_v37 }
 0x736   : > { %v3766_v54 = vmul.f32 %v6257_v21, %v3730_v49 }
 0x737   : > { %v3832_v53 = vadd.f32 %v3800_v6, %v6748_v31 }
 0x738   : > { %v3802_v52 = vadd.f32 %v6262_v4, %v3766_v54 }
 0x739   : > { %3864 = vst.msk [vmem:[%s6272_s21 + $0x68] sm:$0xff] %vm398_vm0, %v3832_v53 }
 0x73a   : > { %v3834_v40 = vadd.f32 %v3802_v52, %v6749_v33 }
 0x73c   : > { %3866 = vst.msk [vmem:[%s6272_s21 + $0x78] sm:$0xff] %vm398_vm0, %v3834_v40 }
 0x742   : > { %v3128_v63 = vpop.xlane.xlu0 %3127 }
 0x743   : > { %v3169_v50 = vmul.f32 %v6064_v61, %v3128_v63 }
 0x745   : > { %v6527_v27 = vsub.f32 %v6279_v0, %v3169_v50 }
 0x747   : > { %v3233_v34 = vmul.f32 %v6527_v27, %v6527_v27 }
 0x749   : > { %v3325_v56 = vsel %vm398_vm0, %v3233_v34, 0.0 }
 0x74a   : > { %v3131_v29 = vpop.xlane.xlu2 %3130  ;;  %3326 = vadd.xlane.f32.xlu1 %v3325_v56  ;;  %v3285_v28 = vpop.xlane.xlu0 %3284 }
 0x74b   : > { %v3170_v26 = vmul.f32 %v6064_v61, %v3131_v29  ;;  %v3347_v36 = vmul.f32 %v3285_v28, %v6064_v61 }
 0x74d   : > { %v6535_v10 = vsub.f32 %v6292_v58, %v3170_v26  ;;  %v3379_v30 = vadd.f32 1e-05, %v3347_v36 }
 0x74f   : > { %4414 = vrsqrt.f32 %v3379_v30  ;;  %v3234_v5 = vmul.f32 %v6535_v10, %v6535_v10  ;;  %vm3561_vm8 = vweird.f32 %v3379_v30 }
 0x751   : > { %v3328_v59 = vsel %vm398_vm0, %v3234_v5, 0.0 }
 0x752   : > { %3329 = vadd.xlane.f32.xlu0 %v3328_v59  ;;  %v3279_v48 = vpop.xlane.xlu2 %3278 }
 0x753   : > { %v3345_v47 = vmul.f32 %v3279_v48, %v6064_v61 }
 0x755   : > { %v4415_v43 = vpop.eup %4414  ;;  %v3377_v15 = vadd.f32 1e-05, %v3345_v47 }
 0x756   : > { %v3556_v44 = vmul.f32 %v4415_v43, %v3379_v30  ;;  %vm3562_vm7 = vweird.f32 %v4415_v43 }
 0x757   : > { %4416 = vrsqrt.f32 %v3377_v15  ;;  %vm3563_vm9 = vmor %vm3561_vm8, %vm3562_vm7  ;;  %vm3541_vm11 = vweird.f32 %v3377_v15 }
 0x758   : > { %v3557_v9 = vmul.f32 %v4415_v43, %v3556_v44 }
 0x75a   : > { %v3558_v32 = vmul.f32 0.5, %v3557_v9  ;;  %v3288_v17 = vpop.xlane.xlu2 %3287 }
 0x75b   : > { %v3348_v14 = vmul.f32 %v3288_v17, %v6064_v61 }
 0x75c   : > { %v3559_v51 = vsub.f32 1.5, %v3558_v32 }
 0x75d   : > { %v4417_v42 = vpop.eup %4416  ;;  %v3380_v3 = vadd.f32 1e-05, %v3348_v14  ;;  %v3291_v13 = vpop.xlane.xlu1 %3290 }
 0x75e   : > { %v3560_v37 = vmul.f32 %v4415_v43, %v3559_v51  ;;  %v3536_v2 = vmul.f32 %v4417_v42, %v3377_v15  ;;  %v3349_v49 = vmul.f32 %v3291_v13, %v6064_v61  ;;  %vm3542_vm10 = vweird.f32 %v4417_v42 }
 0x75f   : > { %4418 = vrsqrt.f32 %v3380_v3  ;;  %vm3543_vm12 = vmor %vm3541_vm11, %vm3542_vm10  ;;  %vm3571_vm14 = vweird.f32 %v3380_v3 }
 0x760   : > { %v3564_v6 = vsel %vm3563_vm9, %v4415_v43, %v3560_v37  ;;  %v3537_v54 = vmul.f32 %v4417_v42, %v3536_v2  ;;  %v3381_v31 = vadd.f32 1e-05, %v3349_v49 }
 0x761   : > { %v3731_v53 = vmul.f32 %v3564_v6, %v6282_v8  ;;  %v6750_v6 = vld [vmem:[#allocation9_spill] sm:$0xff] }
 0x762   : > { %v3538_v52 = vmul.f32 0.5, %v3537_v54  ;;  %4420 = vrsqrt.f32 %v3381_v31  ;;  %v3297_v33 = vpop.xlane.xlu2 %3296  ;;  %vm3581_vm2 = vweird.f32 %v3381_v31 }
 0x763   : > { %v3767_v40 = vmul.f32 %v6257_v21, %v3731_v53  ;;  %v3351_v63 = vmul.f32 %v3297_v33, %v6064_v61 }
 0x764   : > { %v3539_v50 = vsub.f32 1.5, %v3538_v52 }
 0x765   : > { %v4419_v34 = vpop.eup %4418  ;;  %v3803_v56 = vadd.f32 %v6262_v4, %v3767_v40  ;;  %v6547_v29 = vadd.f32 1e-05, %v3351_v63 }
 0x766   : > { %v3540_v28 = vmul.f32 %v4417_v42, %v3539_v50  ;;  %v3566_v26 = vmul.f32 %v4419_v34, %v3380_v3  ;;  %v3294_v36 = vpop.xlane.xlu0 %3293  ;;  %vm3572_vm13 = vweird.f32 %v4419_v34  ;;  %v6751_v50 = vld [vmem:[#allocation12_spill] sm:$0xff] }
 0x767   : > { %v3835_v8 = vadd.f32 %v3803_v56, %v6049_v24  ;;  %4422 = vrsqrt.f32 %v6547_v29  ;;  %v3350_v30 = vmul.f32 %v3294_v36, %v6064_v61  ;;  %vm3573_vm15 = vmor %vm3571_vm14, %vm3572_vm13  ;;  %vm3601_vm5 = vweird.f32 %v6547_v29 }
 0x768   : > { %v4421_v5 = vpop.eup %4420  ;;  %v3544_v59 = vsel %vm3543_vm12, %v4417_v42, %v3540_v28  ;;  %v3567_v48 = vmul.f32 %v4419_v34, %v3566_v26 }
 0x769   : > { %3867 = vst.msk [vmem:[%s6272_s21 + $0x80] sm:$0xff] %vm398_vm0, %v3835_v8  ;;  %v3729_v47 = vmul.f32 %v3544_v59, %v6295_v35  ;;  %v3576_v43 = vmul.f32 %v4421_v5, %v3381_v31  ;;  %v6555_v44 = vadd.f32 1e-05, %v3350_v30  ;;  %vm3582_vm1 = vweird.f32 %v4421_v5  ;;  %v6752_v59 = vld [vmem:[#allocation14_spill] sm:$0xff] }
 0x76a   : > { %v3568_v15 = vmul.f32 0.5, %v3567_v48  ;;  %v3306_v9 = vpop.xlane.xlu2 %3305  ;;  %vm3583_vm3 = vmor %vm3581_vm2, %vm3582_vm1 }
 0x76b   : > { %v3765_v32 = vmul.f32 %v6257_v21, %v3729_v47  ;;  %v3577_v24 = vmul.f32 %v4421_v5, %v3576_v43  ;;  %4424 = vrsqrt.f32 %v6555_v44  ;;  %v3354_v14 = vmul.f32 %v3306_v9, %v6064_v61 }
 0x76c   : > { %v3569_v17 = vsub.f32 1.5, %v3568_v15  ;;  %vm3591_vm8 = vweird.f32 %v6555_v44 }
 0x76d   : > { %v4423_v51 = vpop.eup %4422  ;;  %v3801_v42 = vadd.f32 %v6262_v4, %v3765_v32  ;;  %v3578_v13 = vmul.f32 0.5, %v3577_v24  ;;  %v3300_v35 = vpop.xlane.xlu1 %3299  ;;  %v6562_v49 = vadd.f32 1e-05, %v3354_v14 }
 0x76e   : > { %v3570_v37 = vmul.f32 %v4419_v34, %v3569_v17  ;;  %v3596_v2 = vmul.f32 %v4423_v51, %v6547_v29  ;;  %v3352_v52 = vmul.f32 %v3300_v35, %v6064_v61  ;;  %vm3602_vm4 = vweird.f32 %v4423_v51 }
 0x76f   : > { %v3833_v54 = vadd.f32 %v3801_v42, %v6750_v6  ;;  %v3579_v53 = vsub.f32 1.5, %v3578_v13  ;;  %4426 = vrsqrt.f32 %v6562_v49  ;;  %v6753_v42 = vld [vmem:[#allocation7_spill] sm:$0xff]  ;;  %vm3603_vm6 = vmor %vm3601_vm5, %vm3602_vm4  ;;  %vm3631_vm11 = vweird.f32 %v6562_v49 }
 0x770   : > { %v3574_v33 = vsel %vm3573_vm15, %v4419_v34, %v3570_v37  ;;  %v3597_v40 = vmul.f32 %v4423_v51, %v3596_v2  ;;  %v6570_v28 = vadd.f32 1e-05, %v3352_v52 }
 0x771   : > { %v4425_v63 = vpop.eup %4424  ;;  %3865 = vst.msk [vmem:[%s6272_s21 + $0x70] sm:$0xff] %vm398_vm0, %v3833_v54  ;;  %v3732_v3 = vmul.f32 %v3574_v33, %v6751_v50  ;;  %v3580_v56 = vmul.f32 %v4421_v5, %v3579_v53  ;;  %v6754_v53 = vld [vmem:[#allocation13_spill] sm:$0xff]  ;;  %v6755_v50 = vld [vmem:[#allocation11_spill] sm:$0xff] }
 0x772   : > { %v3598_v26 = vmul.f32 0.5, %v3597_v40  ;;  %v3586_v36 = vmul.f32 %v4425_v63, %v6555_v44  ;;  %v3315_v8 = vpop.xlane.xlu2 %3314  ;;  %4428 = vrsqrt.f32 %v6570_v28  ;;  %vm3592_vm7 = vweird.f32 %v4425_v63 }
 0x773   : > { %v3768_v30 = vmul.f32 %v6257_v21, %v3732_v3  ;;  %v3584_v34 = vsel %vm3583_vm3, %v4421_v5, %v3580_v56  ;;  %v3357_v15 = vmul.f32 %v3315_v8, %v6064_v61  ;;  %vm3593_vm9 = vmor %vm3591_vm8, %vm3592_vm7  ;;  %vm3611_vm14 = vweird.f32 %v6570_v28 }
 0x774   : > { %v3733_v48 = vmul.f32 %v3584_v34, %v6752_v59  ;;  %v3599_v47 = vsub.f32 1.5, %v3598_v26  ;;  %v3587_v43 = vmul.f32 %v4425_v63, %v3586_v36 }
 0x775   : > { %v3804_v31 = vadd.f32 %v6262_v4, %v3768_v30  ;;  %v4427_v9 = vpop.eup %4426  ;;  %v6580_v5 = vadd.f32 1e-05, %v3357_v15  ;;  %v6756_v15 = vld [vmem:[#allocation10_spill] sm:$0xff] }
 0x776   : > { %v3769_v32 = vmul.f32 %v6257_v21, %v3733_v48  ;;  %v3600_v24 = vmul.f32 %v4423_v51, %v3599_v47  ;;  %v3588_v17 = vmul.f32 0.5, %v3587_v43  ;;  %v3303_v14 = vpop.xlane.xlu0 %3302  ;;  %v3626_v35 = vmul.f32 %v4427_v9, %v6562_v49 }
 0x777   : > { %v3836_v13 = vadd.f32 %v3804_v31, %v6753_v42  ;;  %v3353_v37 = vmul.f32 %v3303_v14, %v6064_v61  ;;  %4430 = vrsqrt.f32 %v6580_v5  ;;  %vm3632_vm10 = vweird.f32 %v4427_v9  ;;  %v6620_v14 = vld [vmem:[%s6716_s8] ss:$0 sm:$0xff] }
 0x778   : > { %v3805_v29 = vadd.f32 %v6262_v4, %v3769_v32  ;;  %v3604_v2 = vsel %vm3603_vm6, %v4423_v51, %v3600_v24  ;;  %v3589_v6 = vsub.f32 1.5, %v3588_v17  ;;  %v4429_v54 = vpop.eup %4428  ;;  %v3627_v33 = vmul.f32 %v4427_v9, %v3626_v35  ;;  %vm3633_vm12 = vmor %vm3631_vm11, %vm3632_vm10 }
 0x779   : > { %3868 = vst.msk [vmem:[%s6272_s21 + $0x88] sm:$0xff] %vm398_vm0, %v3836_v13  ;;  %v3735_v52 = vmul.f32 %v3604_v2, %v6754_v53  ;;  %v6591_v40 = vadd.f32 1e-05, %v3353_v37  ;;  %v3606_v26 = vmul.f32 %v4429_v54, %v6570_v28  ;;  %vm3612_vm13 = vweird.f32 %v4429_v54 }
 0x77a   : > { %v3837_v3 = vadd.f32 %v3805_v29, %v6755_v50  ;;  %v3590_v56 = vmul.f32 %v4425_v63, %v3589_v6  ;;  %v3628_v36 = vmul.f32 0.5, %v3627_v33  ;;  %vm3613_vm15 = vmor %vm3611_vm14, %vm3612_vm13  ;;  %vm3661_vm2 = vweird.f32 %v6580_v5 }
 0x77b   : > { %v3771_v51 = vmul.f32 %v6257_v21, %v3735_v52  ;;  %4432 = vrsqrt.f32 %v6591_v40  ;;  %v3607_v30 = vmul.f32 %v4429_v54, %v3606_v26  ;;  %vm3621_vm5 = vweird.f32 %v6591_v40 }
 0x77c   : > { %3869 = vst.msk [vmem:[%s6272_s21 + $0x90] sm:$0xff] %vm398_vm0, %v3837_v3  ;;  %v3594_v8 = vsel %vm3593_vm9, %v4425_v63, %v3590_v56  ;;  %v3629_v48 = vsub.f32 1.5, %v3628_v36  ;;  %v6609_v63 = vld [vmem:[%s6715_s7] ss:$0 sm:$0xff] }
 0x77d   : > { %v3807_v34 = vadd.f32 %v6262_v4, %v3771_v51  ;;  %v3734_v59 = vmul.f32 %v3594_v8, %v6354_v16  ;;  %v3309_v44 = vpop.xlane.xlu1 %3308  ;;  %v4431_v47 = vpop.eup %4430  ;;  %v3608_v21 = vmul.f32 0.5, %v3607_v30 }
 0x77e   : > { %v3355_v43 = vmul.f32 %v3309_v44, %v6064_v61  ;;  %v3630_v16 = vmul.f32 %v4427_v9, %v3629_v48  ;;  %v3656_v32 = vmul.f32 %v4431_v47, %v6580_v5  ;;  %vm3662_vm1 = vweird.f32 %v4431_v47 }
 0x77f   : > { %v3839_v31 = vadd.f32 %v3807_v34, %v6756_v15  ;;  %v3770_v4 = vmul.f32 %v6609_v63, %v3734_v59  ;;  %v3609_v24 = vsub.f32 1.5, %v3608_v21  ;;  %vm3663_vm3 = vmor %vm3661_vm2, %vm3662_vm1 }
 0x780   : > { %v6613_v17 = vadd.f32 1e-05, %v3355_v43  ;;  %v3634_v13 = vsel %vm3633_vm12, %v4427_v9, %v3630_v16  ;;  %v3657_v35 = vmul.f32 %v4431_v47, %v3656_v32 }
 0x781   : > { %v4433_v49 = vpop.eup %4432  ;;  %3871 = vst.msk [vmem:[%s6272_s21 + $0xa0] sm:$0xff] %vm398_vm0, %v3839_v31  ;;  %v3806_v42 = vadd.f32 %v6620_v14, %v3770_v4  ;;  %v3738_v37 = vmul.f32 %v3634_v13, %v6348_v12  ;;  %v3610_v29 = vmul.f32 %v4429_v54, %v3609_v24 }
 0x782   : > { %v3616_v2 = vmul.f32 %v4433_v49, %v6591_v40  ;;  %v3658_v53 = vmul.f32 0.5, %v3657_v35  ;;  %4434 = vrsqrt.f32 %v6613_v17  ;;  %vm3622_vm4 = vweird.f32 %v4433_v49 }
 0x783   : > { %v3838_v6 = vadd.f32 %v3806_v42, %v6156_v38  ;;  %v3774_v52 = vmul.f32 %v6609_v63, %v3738_v37  ;;  %v3614_v33 = vsel %vm3613_vm15, %v4429_v54, %v3610_v29  ;;  %vm3623_vm6 = vmor %vm3621_vm5, %vm3622_vm4  ;;  %vm3641_vm8 = vweird.f32 %v6613_v17 }
 0x784   : > { %v3617_v50 = vmul.f32 %v4433_v49, %v3616_v2  ;;  %v3736_v9 = vmul.f32 %v3614_v33, %v6379_v22  ;;  %v3659_v12 = vsub.f32 1.5, %v3658_v53 }
 0x785   : > { %3870 = vst.msk [vmem:[%s6272_s21 + $0x98] sm:$0xff] %vm398_vm0, %v3838_v6  ;;  %v3810_v28 = vadd.f32 %v6620_v14, %v3774_v52 }
 0x786   : > { %v3618_v3 = vmul.f32 0.5, %v3617_v50  ;;  %v3312_v56 = vpop.xlane.xlu0 %3311  ;;  %v3772_v38 = vmul.f32 %v6609_v63, %v3736_v9  ;;  %v3660_v26 = vmul.f32 %v4431_v47, %v3659_v12 }
 0x787   : > { %v3356_v51 = vmul.f32 %v3312_v56, %v6064_v61  ;;  %v3842_v54 = vadd.f32 %v3810_v28, %v6106_v60 }
 0x788   : > { %v3619_v36 = vsub.f32 1.5, %v3618_v3  ;;  %v4435_v22 = vpop.eup %4434  ;;  %v3808_v8 = vadd.f32 %v6620_v14, %v3772_v38  ;;  %v3664_v30 = vsel %vm3663_vm3, %v4431_v47, %v3660_v26 }
 0x789   : > { %v3388_v34 = vadd.f32 1e-05, %v3356_v51  ;;  %3874 = vst.msk [vmem:[%s6272_s21 + $0xb8] sm:$0xff] %vm398_vm0, %v3842_v54  ;;  %v3741_v59 = vmul.f32 %v3664_v30, %v6374_v55  ;;  %v3636_v5 = vmul.f32 %v4435_v22, %v6613_v17  ;;  %vm3642_vm7 = vweird.f32 %v4435_v22 }
 0x78a   : > { %v3620_v48 = vmul.f32 %v4433_v49, %v3619_v36  ;;  %v3840_v60 = vadd.f32 %v3808_v8, %v6170_v23  ;;  %vm3643_vm9 = vmor %vm3641_vm8, %vm3642_vm7 }
 0x78b   : > { %4436 = vrsqrt.f32 %v3388_v34  ;;  %v3777_v44 = vmul.f32 %v6609_v63, %v3741_v59  ;;  %v3637_v43 = vmul.f32 %v4435_v22, %v3636_v5  ;;  %vm3651_vm11 = vweird.f32 %v3388_v34 }
 0x78c   : > { %v3624_v21 = vsel %vm3623_vm6, %v4433_v49, %v3620_v48  ;;  %3872 = vst.msk [vmem:[%s6272_s21 + $0xa8] sm:$0xff] %vm398_vm0, %v3840_v60 }
 0x78d   : > { %v3737_v47 = vmul.f32 %v3624_v21, %v6411_v45  ;;  %v3318_v15 = vpop.xlane.xlu1 %3317  ;;  %v3813_v55 = vadd.f32 %v6620_v14, %v3777_v44  ;;  %v3638_v31 = vmul.f32 0.5, %v3637_v43 }
 0x78e   : > { %v3358_v40 = vmul.f32 %v3318_v15, %v6064_v61 }
 0x78f   : > { %v3773_v4 = vmul.f32 %v6609_v63, %v3737_v47  ;;  %v3845_v16 = vadd.f32 %v3813_v55, %v6136_v57  ;;  %v3639_v32 = vsub.f32 1.5, %v3638_v31 }
 0x790   : > { %v3324_v23 = vpop.xlane.xlu2 %3323  ;;  %v3390_v24 = vadd.f32 1e-05, %v3358_v40 }
 0x791   : > { %v3360_v49 = vmul.f32 %v3324_v23, %v6064_v61  ;;  %v4437_v42 = vpop.eup %4436  ;;  %v3809_v45 = vadd.f32 %v6620_v14, %v3773_v4  ;;  %3877 = vst.msk [vmem:[%s6272_s21 + $0xd0] sm:$0xff] %vm398_vm0, %v3845_v16  ;;  %v3640_v13 = vmul.f32 %v4435_v22, %v3639_v32 }
 0x792   : > { %v3646_v35 = vmul.f32 %v4437_v42, %v3388_v34  ;;  %4438 = vrsqrt.f32 %v3390_v24  ;;  %vm3652_vm10 = vweird.f32 %v4437_v42  ;;  %vm3671_vm14 = vweird.f32 %v3390_v24 }
 0x793   : > { %v3841_v37 = vadd.f32 %v3809_v45, %v6185_v7  ;;  %v3392_v29 = vadd.f32 1e-05, %v3360_v49  ;;  %v3644_v57 = vsel %vm3643_vm9, %v4435_v22, %v3640_v13  ;;  %vm3653_vm12 = vmor %vm3651_vm11, %vm3652_vm10 }
 0x794   : > { %v3647_v2 = vmul.f32 %v4437_v42, %v3646_v35  ;;  %v3739_v6 = vmul.f32 %v3644_v57, %v6429_v62 }
 0x795   : > { %3873 = vst.msk [vmem:[%s6272_s21 + $0xb0] sm:$0xff] %vm398_vm0, %v3841_v37  ;;  %4440 = vrsqrt.f32 %v3392_v29  ;;  %vm3691_vm2 = vweird.f32 %v3392_v29 }
 0x796   : > { %v3648_v53 = vmul.f32 0.5, %v3647_v2  ;;  %v3321_v52 = vpop.xlane.xlu0 %3320  ;;  %v3775_v33 = vmul.f32 %v6609_v63, %v3739_v6 }
 0x797   : > { %v3359_v50 = vmul.f32 %v3321_v52, %v6064_v61 }
 0x798   : > { %v4439_v17 = vpop.eup %4438  ;;  %v3649_v9 = vsub.f32 1.5, %v3648_v53  ;;  %v3811_v7 = vadd.f32 %v6620_v14, %v3775_v33 }
 0x799   : > { %v3666_v12 = vmul.f32 %v4439_v17, %v3390_v24  ;;  %v3391_v28 = vadd.f32 1e-05, %v3359_v50  ;;  %vm3672_vm13 = vweird.f32 %v4439_v17 }
 0x79a   : > { %v3650_v3 = vmul.f32 %v4437_v42, %v3649_v9  ;;  %v3843_v62 = vadd.f32 %v3811_v7, %v6196_v20  ;;  %vm3673_vm15 = vmor %vm3671_vm14, %vm3672_vm13 }
 0x79b   : > { %v4441_v56 = vpop.eup %4440  ;;  %v3667_v38 = vmul.f32 %v4439_v17, %v3666_v12  ;;  %4442 = vrsqrt.f32 %v3391_v28  ;;  %vm3681_vm5 = vweird.f32 %v3391_v28 }
 0x79c   : > { %v3654_v26 = vsel %vm3653_vm12, %v4437_v42, %v3650_v3  ;;  %v3686_v51 = vmul.f32 %v4441_v56, %v3392_v29  ;;  %3875 = vst.msk [vmem:[%s6272_s21 + $0xc0] sm:$0xff] %vm398_vm0, %v3843_v62  ;;  %vm3692_vm1 = vweird.f32 %v4441_v56 }
 0x79d   : > { %v3740_v54 = vmul.f32 %v3654_v26, %v6453_v25  ;;  %v3668_v36 = vmul.f32 0.5, %v3667_v38  ;;  %vm3693_vm3 = vmor %vm3691_vm2, %vm3692_vm1 }
 0x79e   : > { %v3687_v22 = vmul.f32 %v4441_v56, %v3686_v51 }
 0x79f   : > { %v3776_v8 = vmul.f32 %v6609_v63, %v3740_v54  ;;  %v3669_v30 = vsub.f32 1.5, %v3668_v36 }
 0x7a0   : > { %v3688_v34 = vmul.f32 0.5, %v3687_v22 }
 0x7a1   : > { %v4443_v59 = vpop.eup %4442  ;;  %v3812_v20 = vadd.f32 %v6620_v14, %v3776_v8  ;;  %v3670_v48 = vmul.f32 %v4439_v17, %v3669_v30 }
 0x7a2   : > { %v3689_v5 = vsub.f32 1.5, %v3688_v34  ;;  %v3676_v60 = vmul.f32 %v4443_v59, %v3391_v28  ;;  %vm3682_vm4 = vweird.f32 %v4443_v59 }
 0x7a3   : > { %v3844_v44 = vadd.f32 %v3812_v20, %v6211_v39  ;;  %v3674_v25 = vsel %vm3673_vm15, %v4439_v17, %v3670_v48  ;;  %vm3683_vm6 = vmor %vm3681_vm5, %vm3682_vm4 }
 0x7a4   : > { %v3742_v21 = vmul.f32 %v3674_v25, %v6468_v46  ;;  %v3690_v43 = vmul.f32 %v4441_v56, %v3689_v5  ;;  %v3677_v47 = vmul.f32 %v4443_v59, %v3676_v60 }
 0x7a5   : > { %3876 = vst.msk [vmem:[%s6272_s21 + $0xc8] sm:$0xff] %vm398_vm0, %v3844_v44 }
 0x7a6   : > { %v3778_v15 = vmul.f32 %v6609_v63, %v3742_v21  ;;  %v3694_v55 = vsel %vm3693_vm3, %v4441_v56, %v3690_v43  ;;  %v3678_v31 = vmul.f32 0.5, %v3677_v47 }
 0x7a7   : > { %v3744_v40 = vmul.f32 %v3694_v55, %v6474_v1 }
 0x7a8   : > { %v3814_v4 = vadd.f32 %v6620_v14, %v3778_v15  ;;  %v3679_v39 = vsub.f32 1.5, %v3678_v31 }
 0x7a9   : > { %v3780_v46 = vmul.f32 %v6609_v63, %v3744_v40 }
 0x7aa   : > { %v3846_v23 = vadd.f32 %v3814_v4, %v6221_v11  ;;  %v3680_v16 = vmul.f32 %v4443_v59, %v3679_v39 }
 0x7ab   : > { %v3816_v32 = vadd.f32 %v6620_v14, %v3780_v46 }
 0x7ac   : > { %3878 = vst.msk [vmem:[%s6272_s21 + $0xd8] sm:$0xff] %vm398_vm0, %v3846_v23  ;;  %v3684_v24 = vsel %vm3683_vm6, %v4443_v59, %v3680_v16 }
 0x7ad   : > { %v3848_v49 = vadd.f32 %v3816_v32, %v6231_v41  ;;  %v3743_v1 = vmul.f32 %v3684_v24, %v6493_v19 }
 0x7af   : > { %3880 = vst.msk [vmem:[%s6272_s21 + $0xe8] sm:$0xff] %vm398_vm0, %v3848_v49  ;;  %v3779_v42 = vmul.f32 %v6609_v63, %v3743_v1 }
 0x7b1   : > { %v3815_v45 = vadd.f32 %v6620_v14, %v3779_v42 }
 0x7b3   : > { %v3847_v11 = vadd.f32 %v3815_v45, %v6244_v18 }
 0x7b5   : > { %3879 = vst.msk [vmem:[%s6272_s21 + $0xe0] sm:$0xff] %vm398_vm0, %v3847_v11 }
 0x7bd   : > { %v3327_v13 = vpop.xlane.xlu1 %3326 }
 0x7be   : > { %v3361_v35 = vmul.f32 %v3327_v13, %v6064_v61 }
 0x7c0   : > { %v3393_v37 = vadd.f32 1e-05, %v3361_v35 }
 0x7c2   : > { %4444 = vrsqrt.f32 %v3393_v37  ;;  %vm3701_vm8 = vweird.f32 %v3393_v37 }
 0x7c5   : > { %v3330_v29 = vpop.xlane.xlu0 %3329 }
 0x7c6   : > { %v3362_v41 = vmul.f32 %v3330_v29, %v6064_v61 }
 0x7c8   : > { %v4445_v57 = vpop.eup %4444  ;;  %v3394_v19 = vadd.f32 1e-05, %v3362_v41 }
 0x7c9   : > { %v3696_v2 = vmul.f32 %v4445_v57, %v3393_v37  ;;  %vm3702_vm7 = vweird.f32 %v4445_v57 }
 0x7ca   : > { %4446 = vrsqrt.f32 %v3394_v19  ;;  %vm3703_vm9 = vmor %vm3701_vm8, %vm3702_vm7  ;;  %vm3711_vm11 = vweird.f32 %v3394_v19 }
 0x7cb   : > { %v3697_v6 = vmul.f32 %v4445_v57, %v3696_v2 }
 0x7cd   : > { %v3698_v53 = vmul.f32 0.5, %v3697_v6 }
 0x7cf   : > { %v3699_v52 = vsub.f32 1.5, %v3698_v53 }
 0x7d0   : > { %v4447_v33 = vpop.eup %4446 }
 0x7d1   : > { %v3700_v18 = vmul.f32 %v4445_v57, %v3699_v52  ;;  %v3706_v50 = vmul.f32 %v4447_v33, %v3394_v19  ;;  %vm3712_vm10 = vweird.f32 %v4447_v33 }
 0x7d2   : > { %vm3713_vm12 = vmor %vm3711_vm11, %vm3712_vm10 }
 0x7d3   : > { %v3704_v17 = vsel %vm3703_vm9, %v4445_v57, %v3700_v18  ;;  %v3707_v9 = vmul.f32 %v4447_v33, %v3706_v50 }
 0x7d4   : > { %v3745_v7 = vmul.f32 %v3704_v17, %v6527_v27 }
 0x7d5   : > { %v3708_v61 = vmul.f32 0.5, %v3707_v9 }
 0x7d6   : > { %v3781_v12 = vmul.f32 %v6609_v63, %v3745_v7 }
 0x7d7   : > { %v3709_v28 = vsub.f32 1.5, %v3708_v61 }
 0x7d8   : > { %v3817_v3 = vadd.f32 %v6620_v14, %v3781_v12 }
 0x7d9   : > { %v3710_v56 = vmul.f32 %v4447_v33, %v3709_v28 }
 0x7da   : > { %v3849_v62 = vadd.f32 %v3817_v3, %v6279_v0 }
 0x7db   : > { %v3714_v38 = vsel %vm3713_vm12, %v4447_v33, %v3710_v56 }
 0x7dc   : > { %3881 = vst.msk [vmem:[%s6272_s21 + $0xf0] sm:$0xff] %vm398_vm0, %v3849_v62  ;;  %v3746_v26 = vmul.f32 %v3714_v38, %v6535_v10 }
 0x7de   : > { %v3782_v27 = vmul.f32 %v6609_v63, %v3746_v26 }
 0x7e0   : > { %v3818_v51 = vadd.f32 %v6620_v14, %v3782_v27 }
 0x7e2   : > { %v3850_v54 = vadd.f32 %v3818_v51, %v6292_v58 }
 0x7e4   : > { %3882 = vst.msk [vmem:[%s6272_s21 + $0xf8] sm:$0xff] %vm398_vm0, %v3850_v54 }
 0x7e5 PF: > { %s19_s30 = sadd.s32 1, %s4456_s30  }
 0x7e6   : > { %p16_p4 = scmp.ge.s32.totalorder %s19_s30, 4  }
 0x7e8   :  { %18 = sbr.rel (!%p16_p4) target bundleno = 1 (0x1), region = 121 }

</bundles_post_ra>
